<compile_context>
chip_gen: v7x
topology: tpu7x:2x2x1
jax: 0.10.0
libtpu: 0.0.40
codegen_flags: <defaults>
</compile_context>

<pallas_src>
import functools

import jax
import jax.numpy as jnp
import numpy as np
from jax.experimental import pallas as pl
from jax.experimental.pallas import tpu as pltpu


def _urnet_down_kernel(L, B, C, Cin, K, MK,
                       xpad_ref, w1_ref, b1_ref, g1_ref, be1_ref,
                       w2_ref, b2_ref, g2_ref, be2_ref,
                       wih_ref, bih_ref, whh_ref, bhh_ref,
                       cnv_ref, rnn_ref, max_ref,
                       h1pad_ref):
    pad = (K - 1) // 2
    eps = 1e-5
    LB = L * B
    inv_n = 1.0 / float(LB)

    def bn_relu(y2d, g_ref, be_ref):
        # One-pass batch-norm stats over rows of the [LB, C] slab (channels on lanes).
        s = jnp.sum(y2d, axis=0, keepdims=True)
        ss = jnp.sum(y2d * y2d, axis=0, keepdims=True)
        mean = s * inv_n
        var = ss * inv_n - mean * mean
        scale = g_ref[...] * jax.lax.rsqrt(var + eps)
        shift = be_ref[...] - mean * scale
        return jnp.maximum(y2d * scale + shift, 0.0)           # fused affine + ReLU

    def im2col_conv(xp, ci, w_ref, b_ref):
        # xp: [L + 2*pad, B, ci] (already zero-padded along time), w_ref: [K*ci, C]
        cols = jnp.concatenate([xp[k:k + L] for k in range(K)], axis=-1)  # [L, B, K*ci]
        y = jnp.dot(cols.reshape(LB, K * ci), w_ref[...],
                    preferred_element_type=jnp.float32)        # single MXU matmul
        return y + b_ref[...]                                  # [LB, C]

    # --- conv1 + BN + ReLU (input pre-padded in the wrapper) ---
    xp = xpad_ref[...].astype(jnp.float32)                     # [L+2p, B, Cin]
    h1 = bn_relu(im2col_conv(xp, Cin, w1_ref, b1_ref), g1_ref, be1_ref)  # [LB, C]

    # --- conv2 + BN + ReLU (pad h1 via VMEM scratch, no concatenate for padding) ---
    if pad > 0:
        zrow = jnp.zeros((pad, B, C), jnp.float32)
        h1pad_ref[pl.ds(0, pad)] = zrow
        h1pad_ref[pl.ds(L + pad, pad)] = zrow
    h1pad_ref[pl.ds(pad, L)] = h1.reshape(L, B, C)
    cnv2d = bn_relu(im2col_conv(h1pad_ref[...], C, w2_ref, b2_ref),
                    g2_ref, be2_ref)                           # [LB, C]
    cnv_ref[...] = cnv2d.reshape(L, B, C)

    # --- GRU (PyTorch gate order r, z, n) ---
    # Hoisted input projections: one [LB, C] x [C, 3C] matmul for all time steps.
    gx = jnp.dot(cnv2d, wih_ref[...], preferred_element_type=jnp.float32) + bih_ref[...]
    gx = gx.reshape(L, B, 3 * C)
    whh = whh_ref[...]                                         # [C, 3C]
    bhh = bhh_ref[...]                                         # [1, 3C]

    h = jnp.zeros((B, C), jnp.float32)
    hs = []
    pooled = []
    win = None
    for t in range(L):                                         # static unroll (L compile-time)
        gh = jnp.dot(h, whh, preferred_element_type=jnp.float32) + bhh   # one matmul / step
        gx_t = gx[t]
        r = jax.nn.sigmoid(gx_t[:, :C] + gh[:, :C])
        z = jax.nn.sigmoid(gx_t[:, C:2 * C] + gh[:, C:2 * C])
        n = jnp.tanh(gx_t[:, 2 * C:] + r * gh[:, 2 * C:])
        h = (1.0 - z) * n + z * h
        hs.append(h)
        # MaxPool1d(MK, stride=MK) folded into the recurrence as a running window max.
        win = h if win is None else jnp.maximum(win, h)
        if (t + 1) % MK == 0:
            pooled.append(win)
            win = None

    rnn_ref[...] = jnp.stack(hs, axis=0)                       # [L, B, C]
    max_ref[...] = jnp.stack(pooled, axis=0)                   # [L//MK, B, C]


def prepare_params(params):
    """One-time repack of PyTorch-layout parameters into kernel-friendly layouts."""
    C, Cin, K = params["conv1_w"].shape
    f32 = lambda a: jnp.asarray(a, jnp.float32)
    return {
        # conv weights: [C, Ci, K] -> [K*Ci, C] (tap-major rows, matching im2col columns)
        "w1": f32(jnp.transpose(params["conv1_w"], (2, 1, 0)).reshape(K * Cin, C)),
        "w2": f32(jnp.transpose(params["conv2_w"], (2, 1, 0)).reshape(K * C, C)),
        "b1": f32(params["conv1_b"]).reshape(1, C),
        "b2": f32(params["conv2_b"]).reshape(1, C),
        "g1": f32(params["bn1_g"]).reshape(1, C),
        "be1": f32(params["bn1_b"]).reshape(1, C),
        "g2": f32(params["bn2_g"]).reshape(1, C),
        "be2": f32(params["bn2_b"]).reshape(1, C),
        # GRU weights: [3C, C] -> [C, 3C] so gates come out fused and lane-wide (3C lanes)
        "wih": f32(params["gru_w_ih"]).T,
        "whh": f32(params["gru_w_hh"]).T,
        "bih": f32(params["gru_b_ih"]).reshape(1, 3 * C),
        "bhh": f32(params["gru_b_hh"]).reshape(1, 3 * C),
        "conv_kernel": K,
    }


def urnet_down_block(x_bcl, prep, *, conv_kernel, max_kernel):
    assert conv_kernel % 2 == 1, "only odd conv_kernel supported ('same' padding)"
    B, Cin, L = x_bcl.shape
    C = prep["b1"].shape[1]
    K = conv_kernel
    pad = (K - 1) // 2
    Lout = L // max_kernel

    # Time-major [L, B, Cin], zero-padded along time once (outside the kernel).
    x_lbc = jnp.transpose(x_bcl, (2, 0, 1)).astype(jnp.float32)
    x_pad = jnp.pad(x_lbc, ((pad, pad), (0, 0), (0, 0)))

    kern = functools.partial(_urnet_down_kernel, L, B, C, Cin, K, max_kernel)
    vmem = pl.BlockSpec(memory_space=pltpu.MemorySpace.VMEM)
    # Toy sizes fit comfortably in VMEM as a single block; for production L/B add a grid
    # over L (halo-padded conv tiles, "arbitrary" time axis carrying the GRU state).
    cnv_lbc, rnn_lbc, max_lbc = pl.pallas_call(
        kern,
        out_shape=(
            jax.ShapeDtypeStruct((L, B, C), jnp.float32),
            jax.ShapeDtypeStruct((L, B, C), jnp.float32),
            jax.ShapeDtypeStruct((Lout, B, C), jnp.float32),
        ),
        in_specs=[vmem] * 13,
        out_specs=(vmem, vmem, vmem),
        scratch_shapes=[pltpu.VMEM((L + 2 * pad, B, C), jnp.float32)],
    )(x_pad, prep["w1"], prep["b1"], prep["g1"], prep["be1"],
      prep["w2"], prep["b2"], prep["g2"], prep["be2"],
      prep["wih"], prep["bih"], prep["whh"], prep["bhh"])

    cnv_out = jnp.transpose(cnv_lbc, (1, 2, 0))   # [B, C, L]
    rnn_out = jnp.transpose(rnn_lbc, (1, 2, 0))   # [B, C, L] (module permutes GRU output back)
    max_out = jnp.transpose(max_lbc, (1, 2, 0))   # [B, C, L // max_kernel]
    return cnv_out, rnn_out, max_out


def reference(x_bcl, params, conv_kernel, max_kernel):
    """Pure-JAX reference matching the PyTorch module (training-mode BN)."""
    K = conv_kernel
    pad = (K - 1) // 2

    def conv1d(x, w, b):
        y = jax.lax.conv_general_dilated(
            x, w, window_strides=(1,), padding=[(pad, pad)],
            dimension_numbers=("NCH", "OIH", "NCH"))
        return y + b[None, :, None]

    def bn(x, g, be):
        mean = jnp.mean(x, axis=(0, 2), keepdims=True)
        var = jnp.mean((x - mean) ** 2, axis=(0, 2), keepdims=True)
        return (x - mean) * jax.lax.rsqrt(var + 1e-5) * g[None, :, None] + be[None, :, None]

    y = jax.nn.relu(bn(conv1d(x_bcl, params["conv1_w"], params["conv1_b"]),
                       params["bn1_g"], params["bn1_b"]))
    cnv = jax.nn.relu(bn(conv1d(y, params["conv2_w"], params["conv2_b"]),
                         params["bn2_g"], params["bn2_b"]))
    B, C, L = cnv.shape
    x_lbc = jnp.transpose(cnv, (2, 0, 1))
    w_ih, w_hh = params["gru_w_ih"], params["gru_w_hh"]
    b_ih, b_hh = params["gru_b_ih"], params["gru_b_hh"]

    def cell(h, x_t):
        gi = x_t @ w_ih.T + b_ih
        gh = h @ w_hh.T + b_hh
        r = jax.nn.sigmoid(gi[:, :C] + gh[:, :C])
        z = jax.nn.sigmoid(gi[:, C:2 * C] + gh[:, C:2 * C])
        n = jnp.tanh(gi[:, 2 * C:] + r * gh[:, 2 * C:])
        h_new = (1.0 - z) * n + z * h
        return h_new, h_new

    _, rnn = jax.lax.scan(cell, jnp.zeros((B, C), jnp.float32), x_lbc)
    rnn_bcl = jnp.transpose(rnn, (1, 2, 0))
    Lout = L // max_kernel
    max_out = jnp.max(rnn_bcl[:, :, :Lout * max_kernel].reshape(B, C, Lout, max_kernel), axis=-1)
    return cnv, rnn_bcl, max_out


if __name__ == "__main__":
    B, Cin, C, L = 2, 4, 32, 16       # input_size=4, channel_size=32, seq len=16
    K, MK = 3, 2                      # conv_kernel=3, max_kernel=2

    key = jax.random.PRNGKey(0)
    ks = jax.random.split(key, 12)
    u = lambda k, shape, s=0.3: jax.random.uniform(k, shape, jnp.float32, -s, s)
    params = {
        "conv1_w": u(ks[0], (C, Cin, K)),
        "conv1_b": u(ks[1], (C,)),
        "conv2_w": u(ks[2], (C, C, K)),
        "conv2_b": u(ks[3], (C,)),
        "bn1_g": 1.0 + u(ks[4], (C,), 0.1),
        "bn1_b": u(ks[5], (C,), 0.1),
        "bn2_g": 1.0 + u(ks[6], (C,), 0.1),
        "bn2_b": u(ks[7], (C,), 0.1),
        "gru_w_ih": u(ks[8], (3 * C, C)),   # PyTorch gate order: r, z, n
        "gru_w_hh": u(ks[9], (3 * C, C)),
        "gru_b_ih": u(ks[10], (3 * C,)),
        "gru_b_hh": u(ks[11], (3 * C,)),
    }
    x = jax.random.normal(jax.random.PRNGKey(42), (B, Cin, L), jnp.float32)

    prepared = prepare_params(params)   # one-time repack, outside the per-call jit path
    fn = jax.jit(functools.partial(urnet_down_block, conv_kernel=K, max_kernel=MK))
    cnv, rnn, mx = fn(x, prepared)
    jax.block_until_ready((cnv, rnn, mx))

    assert cnv.shape == (B, C, L)
    assert rnn.shape == (B, C, L)
    assert mx.shape == (B, C, L // MK)

    cnv_r, rnn_r, mx_r = reference(x, params, K, MK)
    np.testing.assert_allclose(np.asarray(cnv), np.asarray(cnv_r), rtol=2e-3, atol=2e-3)
    np.testing.assert_allclose(np.asarray(rnn), np.asarray(rnn_r), rtol=2e-3, atol=2e-3)
    np.testing.assert_allclose(np.asarray(mx), np.asarray(mx_r), rtol=2e-3, atol=2e-3)

    print("KERNEL_OK")
</pallas_src>

<mosaic_0001>
module attributes {stable_mosaic.version = 11 : i64} {
  func.func @_urnet_down_kernel(%arg0: memref<18x2x4xf32, #tpu.memory_space<vmem>>, %arg1: memref<12x32xf32, #tpu.memory_space<vmem>>, %arg2: memref<1x32xf32, #tpu.memory_space<vmem>>, %arg3: memref<1x32xf32, #tpu.memory_space<vmem>>, %arg4: memref<1x32xf32, #tpu.memory_space<vmem>>, %arg5: memref<96x32xf32, #tpu.memory_space<vmem>>, %arg6: memref<1x32xf32, #tpu.memory_space<vmem>>, %arg7: memref<1x32xf32, #tpu.memory_space<vmem>>, %arg8: memref<1x32xf32, #tpu.memory_space<vmem>>, %arg9: memref<32x96xf32, #tpu.memory_space<vmem>>, %arg10: memref<1x96xf32, #tpu.memory_space<vmem>>, %arg11: memref<32x96xf32, #tpu.memory_space<vmem>>, %arg12: memref<1x96xf32, #tpu.memory_space<vmem>>, %arg13: memref<16x2x32xf32, #tpu.memory_space<vmem>>, %arg14: memref<16x2x32xf32, #tpu.memory_space<vmem>>, %arg15: memref<8x2x32xf32, #tpu.memory_space<vmem>>, %arg16: memref<18x2x32xf32, #tpu.memory_space<vmem>>) attributes {dimension_semantics = [], scalar_prefetch = 0 : i64, scratch_operands = 1 : i64, tpu.core_type = #tpu.core_type<tc>} {
    %c0 = arith.constant 0 : index
    %c0_0 = arith.constant 0 : index
    %c0_1 = arith.constant 0 : index
    %0 = vector.load %arg0[%c0, %c0_0, %c0_1] : memref<18x2x4xf32, #tpu.memory_space<vmem>>, vector<18x2x4xf32>
    %1 = vector.extract_strided_slice %0 {offsets = [0, 0, 0], sizes = [16, 2, 4], strides = [1, 1, 1]} : vector<18x2x4xf32> to vector<16x2x4xf32>
    %2 = vector.extract_strided_slice %0 {offsets = [1, 0, 0], sizes = [16, 2, 4], strides = [1, 1, 1]} : vector<18x2x4xf32> to vector<16x2x4xf32>
    %3 = vector.extract_strided_slice %0 {offsets = [2, 0, 0], sizes = [16, 2, 4], strides = [1, 1, 1]} : vector<18x2x4xf32> to vector<16x2x4xf32>
    %4 = tpu.concatenate %1, %2, %3 in 2 : vector<16x2x4xf32>, vector<16x2x4xf32>, vector<16x2x4xf32> -> vector<16x2x12xf32>
    %5 = vector.shape_cast %4 : vector<16x2x12xf32> to vector<32x12xf32>
    %c0_2 = arith.constant 0 : index
    %c0_3 = arith.constant 0 : index
    %6 = vector.load %arg1[%c0_2, %c0_3] : memref<12x32xf32, #tpu.memory_space<vmem>>, vector<12x32xf32>
    %cst = arith.constant dense<0.000000e+00> : vector<32x32xf32>
    %7 = tpu.matmul %5, %6, %cst {dimension_numbers = #tpu.dot_dimension_numbers<[1], [0], [0], [1], [0, 0, 1, 1], [], []>} : vector<32x12xf32>, vector<12x32xf32>, vector<32x32xf32> -> vector<32x32xf32>
    %c0_4 = arith.constant 0 : index
    %c0_5 = arith.constant 0 : index
    %8 = vector.load %arg2[%c0_4, %c0_5] : memref<1x32xf32, #tpu.memory_space<vmem>>, vector<1x32xf32>
    %9 = vector.broadcast %8 : vector<1x32xf32> to vector<32x32xf32>
    %10 = arith.addf %7, %9 : vector<32x32xf32>
    %cst_6 = arith.constant dense<0.000000e+00> : vector<32xf32>
    %11 = vector.multi_reduction <add>, %10, %cst_6 [0] : vector<32x32xf32> to vector<32xf32>
    %12 = vector.shape_cast %11 : vector<32xf32> to vector<1x32xf32>
    %13 = arith.mulf %10, %10 : vector<32x32xf32>
    %cst_7 = arith.constant dense<0.000000e+00> : vector<32xf32>
    %14 = vector.multi_reduction <add>, %13, %cst_7 [0] : vector<32x32xf32> to vector<32xf32>
    %15 = vector.shape_cast %14 : vector<32xf32> to vector<1x32xf32>
    %cst_8 = arith.constant 3.125000e-02 : f32
    %16 = vector.broadcast %cst_8 : f32 to vector<1x32xf32>
    %17 = arith.mulf %12, %16 : vector<1x32xf32>
    %cst_9 = arith.constant 3.125000e-02 : f32
    %18 = vector.broadcast %cst_9 : f32 to vector<1x32xf32>
    %19 = arith.mulf %15, %18 : vector<1x32xf32>
    %20 = arith.mulf %17, %17 : vector<1x32xf32>
    %21 = arith.subf %19, %20 : vector<1x32xf32>
    %c0_10 = arith.constant 0 : index
    %c0_11 = arith.constant 0 : index
    %22 = vector.load %arg3[%c0_10, %c0_11] : memref<1x32xf32, #tpu.memory_space<vmem>>, vector<1x32xf32>
    %cst_12 = arith.constant 9.99999974E-6 : f32
    %23 = vector.broadcast %cst_12 : f32 to vector<1x32xf32>
    %24 = arith.addf %21, %23 : vector<1x32xf32>
    %25 = math.rsqrt %24 : vector<1x32xf32>
    %26 = arith.mulf %22, %25 : vector<1x32xf32>
    %c0_13 = arith.constant 0 : index
    %c0_14 = arith.constant 0 : index
    %27 = vector.load %arg4[%c0_13, %c0_14] : memref<1x32xf32, #tpu.memory_space<vmem>>, vector<1x32xf32>
    %28 = arith.mulf %17, %26 : vector<1x32xf32>
    %29 = arith.subf %27, %28 : vector<1x32xf32>
    %30 = vector.broadcast %26 : vector<1x32xf32> to vector<32x32xf32>
    %31 = arith.mulf %10, %30 : vector<32x32xf32>
    %32 = vector.broadcast %29 : vector<1x32xf32> to vector<32x32xf32>
    %33 = arith.addf %31, %32 : vector<32x32xf32>
    %cst_15 = arith.constant 0.000000e+00 : f32
    %34 = vector.broadcast %cst_15 : f32 to vector<32x32xf32>
    %35 = arith.maximumf %33, %34 : vector<32x32xf32>
    %cst_16 = arith.constant 0.000000e+00 : f32
    %36 = vector.broadcast %cst_16 : f32 to vector<1x2x32xf32>
    %c0_17 = arith.constant 0 : index
    %c0_18 = arith.constant 0 : index
    %c0_19 = arith.constant 0 : index
    %37 = vector.load %arg16[%c0_17, %c0_18, %c0_19] : memref<18x2x32xf32, #tpu.memory_space<vmem>>, vector<1x2x32xf32>
    tpu.vector_store %arg16[%c0_17, %c0_18, %c0_19], %36 {strides = array<i32>} : memref<18x2x32xf32, #tpu.memory_space<vmem>>, vector<1x2x32xf32>,
    %c17 = arith.constant 17 : index
    %c0_20 = arith.constant 0 : index
    %c0_21 = arith.constant 0 : index
    %38 = vector.load %arg16[%c17, %c0_20, %c0_21] : memref<18x2x32xf32, #tpu.memory_space<vmem>>, vector<1x2x32xf32>
    tpu.vector_store %arg16[%c17, %c0_20, %c0_21], %36 {strides = array<i32>} : memref<18x2x32xf32, #tpu.memory_space<vmem>>, vector<1x2x32xf32>,
    %39 = vector.shape_cast %35 : vector<32x32xf32> to vector<16x2x32xf32>
    %c1 = arith.constant 1 : index
    %c0_22 = arith.constant 0 : index
    %c0_23 = arith.constant 0 : index
    %40 = vector.load %arg16[%c1, %c0_22, %c0_23] : memref<18x2x32xf32, #tpu.memory_space<vmem>>, vector<16x2x32xf32>
    tpu.vector_store %arg16[%c1, %c0_22, %c0_23], %39 {strides = array<i32>} : memref<18x2x32xf32, #tpu.memory_space<vmem>>, vector<16x2x32xf32>,
    %c0_24 = arith.constant 0 : index
    %c0_25 = arith.constant 0 : index
    %c0_26 = arith.constant 0 : index
    %41 = vector.load %arg16[%c0_24, %c0_25, %c0_26] : memref<18x2x32xf32, #tpu.memory_space<vmem>>, vector<18x2x32xf32>
    %42 = vector.extract_strided_slice %41 {offsets = [0, 0, 0], sizes = [16, 2, 32], strides = [1, 1, 1]} : vector<18x2x32xf32> to vector<16x2x32xf32>
    %43 = vector.extract_strided_slice %41 {offsets = [1, 0, 0], sizes = [16, 2, 32], strides = [1, 1, 1]} : vector<18x2x32xf32> to vector<16x2x32xf32>
    %44 = vector.extract_strided_slice %41 {offsets = [2, 0, 0], sizes = [16, 2, 32], strides = [1, 1, 1]} : vector<18x2x32xf32> to vector<16x2x32xf32>
    %45 = tpu.concatenate %42, %43, %44 in 2 : vector<16x2x32xf32>, vector<16x2x32xf32>, vector<16x2x32xf32> -> vector<16x2x96xf32>
    %46 = vector.shape_cast %45 : vector<16x2x96xf32> to vector<32x96xf32>
    %c0_27 = arith.constant 0 : index
    %c0_28 = arith.constant 0 : index
    %47 = vector.load %arg5[%c0_27, %c0_28] : memref<96x32xf32, #tpu.memory_space<vmem>>, vector<96x32xf32>
    %cst_29 = arith.constant dense<0.000000e+00> : vector<32x32xf32>
    %48 = tpu.matmul %46, %47, %cst_29 {dimension_numbers = #tpu.dot_dimension_numbers<[1], [0], [0], [1], [0, 0, 1, 1], [], []>} : vector<32x96xf32>, vector<96x32xf32>, vector<32x32xf32> -> vector<32x32xf32>
    %c0_30 = arith.constant 0 : index
    %c0_31 = arith.constant 0 : index
    %49 = vector.load %arg6[%c0_30, %c0_31] : memref<1x32xf32, #tpu.memory_space<vmem>>, vector<1x32xf32>
    %50 = vector.broadcast %49 : vector<1x32xf32> to vector<32x32xf32>
    %51 = arith.addf %48, %50 : vector<32x32xf32>
    %cst_32 = arith.constant dense<0.000000e+00> : vector<32xf32>
    %52 = vector.multi_reduction <add>, %51, %cst_32 [0] : vector<32x32xf32> to vector<32xf32>
    %53 = vector.shape_cast %52 : vector<32xf32> to vector<1x32xf32>
    %54 = arith.mulf %51, %51 : vector<32x32xf32>
    %cst_33 = arith.constant dense<0.000000e+00> : vector<32xf32>
    %55 = vector.multi_reduction <add>, %54, %cst_33 [0] : vector<32x32xf32> to vector<32xf32>
    %56 = vector.shape_cast %55 : vector<32xf32> to vector<1x32xf32>
    %cst_34 = arith.constant 3.125000e-02 : f32
    %57 = vector.broadcast %cst_34 : f32 to vector<1x32xf32>
    %58 = arith.mulf %53, %57 : vector<1x32xf32>
    %cst_35 = arith.constant 3.125000e-02 : f32
    %59 = vector.broadcast %cst_35 : f32 to vector<1x32xf32>
    %60 = arith.mulf %56, %59 : vector<1x32xf32>
    %61 = arith.mulf %58, %58 : vector<1x32xf32>
    %62 = arith.subf %60, %61 : vector<1x32xf32>
    %c0_36 = arith.constant 0 : index
    %c0_37 = arith.constant 0 : index
    %63 = vector.load %arg7[%c0_36, %c0_37] : memref<1x32xf32, #tpu.memory_space<vmem>>, vector<1x32xf32>
    %cst_38 = arith.constant 9.99999974E-6 : f32
    %64 = vector.broadcast %cst_38 : f32 to vector<1x32xf32>
    %65 = arith.addf %62, %64 : vector<1x32xf32>
    %66 = math.rsqrt %65 : vector<1x32xf32>
    %67 = arith.mulf %63, %66 : vector<1x32xf32>
    %c0_39 = arith.constant 0 : index
    %c0_40 = arith.constant 0 : index
    %68 = vector.load %arg8[%c0_39, %c0_40] : memref<1x32xf32, #tpu.memory_space<vmem>>, vector<1x32xf32>
    %69 = arith.mulf %58, %67 : vector<1x32xf32>
    %70 = arith.subf %68, %69 : vector<1x32xf32>
    %71 = vector.broadcast %67 : vector<1x32xf32> to vector<32x32xf32>
    %72 = arith.mulf %51, %71 : vector<32x32xf32>
    %73 = vector.broadcast %70 : vector<1x32xf32> to vector<32x32xf32>
    %74 = arith.addf %72, %73 : vector<32x32xf32>
    %cst_41 = arith.constant 0.000000e+00 : f32
    %75 = vector.broadcast %cst_41 : f32 to vector<32x32xf32>
    %76 = arith.maximumf %74, %75 : vector<32x32xf32>
    %77 = vector.shape_cast %76 : vector<32x32xf32> to vector<16x2x32xf32>
    %c0_42 = arith.constant 0 : index
    %c0_43 = arith.constant 0 : index
    %c0_44 = arith.constant 0 : index
    %78 = vector.load %arg13[%c0_42, %c0_43, %c0_44] : memref<16x2x32xf32, #tpu.memory_space<vmem>>, vector<16x2x32xf32>
    tpu.vector_store %arg13[%c0_42, %c0_43, %c0_44], %77 {strides = array<i32>} : memref<16x2x32xf32, #tpu.memory_space<vmem>>, vector<16x2x32xf32>,
    %c0_45 = arith.constant 0 : index
    %c0_46 = arith.constant 0 : index
    %79 = vector.load %arg9[%c0_45, %c0_46] : memref<32x96xf32, #tpu.memory_space<vmem>>, vector<32x96xf32>
    %cst_47 = arith.constant dense<0.000000e+00> : vector<32x96xf32>
    %80 = tpu.matmul %76, %79, %cst_47 {dimension_numbers = #tpu.dot_dimension_numbers<[1], [0], [0], [1], [0, 0, 1, 1], [], []>} : vector<32x32xf32>, vector<32x96xf32>, vector<32x96xf32> -> vector<32x96xf32>
    %c0_48 = arith.constant 0 : index
    %c0_49 = arith.constant 0 : index
    %81 = vector.load %arg10[%c0_48, %c0_49] : memref<1x96xf32, #tpu.memory_space<vmem>>, vector<1x96xf32>
    %82 = vector.broadcast %81 : vector<1x96xf32> to vector<32x96xf32>
    %83 = arith.addf %80, %82 : vector<32x96xf32>
    %84 = vector.shape_cast %83 : vector<32x96xf32> to vector<16x2x96xf32>
    %c0_50 = arith.constant 0 : index
    %c0_51 = arith.constant 0 : index
    %85 = vector.load %arg11[%c0_50, %c0_51] : memref<32x96xf32, #tpu.memory_space<vmem>>, vector<32x96xf32>
    %c0_52 = arith.constant 0 : index
    %c0_53 = arith.constant 0 : index
    %86 = vector.load %arg12[%c0_52, %c0_53] : memref<1x96xf32, #tpu.memory_space<vmem>>, vector<1x96xf32>
    %cst_54 = arith.constant 0.000000e+00 : f32
    %87 = vector.broadcast %cst_54 : f32 to vector<2x32xf32>
    %cst_55 = arith.constant dense<0.000000e+00> : vector<2x96xf32>
    %88 = tpu.matmul %87, %85, %cst_55 {dimension_numbers = #tpu.dot_dimension_numbers<[1], [0], [0], [1], [0, 0, 1, 1], [], []>} : vector<2x32xf32>, vector<32x96xf32>, vector<2x96xf32> -> vector<2x96xf32>
    %89 = vector.broadcast %86 : vector<1x96xf32> to vector<2x96xf32>
    %90 = arith.addf %88, %89 : vector<2x96xf32>
    %91 = vector.extract_strided_slice %84 {offsets = [0, 0, 0], sizes = [1, 2, 96], strides = [1, 1, 1]} : vector<16x2x96xf32> to vector<1x2x96xf32>
    %92 = vector.shape_cast %91 : vector<1x2x96xf32> to vector<2x96xf32>
    %93 = vector.extract_strided_slice %92 {offsets = [0, 0], sizes = [2, 32], strides = [1, 1]} : vector<2x96xf32> to vector<2x32xf32>
    %94 = vector.extract_strided_slice %90 {offsets = [0, 0], sizes = [2, 32], strides = [1, 1]} : vector<2x96xf32> to vector<2x32xf32>
    %95 = arith.addf %93, %94 : vector<2x32xf32>
    %96 = arith.negf %95 : vector<2x32xf32>
    %97 = math.exp %96 : vector<2x32xf32>
    %cst_56 = arith.constant 1.000000e+00 : f32
    %98 = vector.broadcast %cst_56 : f32 to vector<2x32xf32>
    %99 = arith.addf %98, %97 : vector<2x32xf32>
    %100 = arith.divf %98, %99 : vector<2x32xf32>
    %101 = vector.extract_strided_slice %92 {offsets = [0, 32], sizes = [2, 32], strides = [1, 1]} : vector<2x96xf32> to vector<2x32xf32>
    %102 = vector.extract_strided_slice %90 {offsets = [0, 32], sizes = [2, 32], strides = [1, 1]} : vector<2x96xf32> to vector<2x32xf32>
    %103 = arith.addf %101, %102 : vector<2x32xf32>
    %104 = arith.negf %103 : vector<2x32xf32>
    %105 = math.exp %104 : vector<2x32xf32>
    %cst_57 = arith.constant 1.000000e+00 : f32
    %106 = vector.broadcast %cst_57 : f32 to vector<2x32xf32>
    %107 = arith.addf %106, %105 : vector<2x32xf32>
    %108 = arith.divf %106, %107 : vector<2x32xf32>
    %109 = vector.extract_strided_slice %92 {offsets = [0, 64], sizes = [2, 32], strides = [1, 1]} : vector<2x96xf32> to vector<2x32xf32>
    %110 = vector.extract_strided_slice %90 {offsets = [0, 64], sizes = [2, 32], strides = [1, 1]} : vector<2x96xf32> to vector<2x32xf32>
    %111 = arith.mulf %100, %110 : vector<2x32xf32>
    %112 = arith.addf %109, %111 : vector<2x32xf32>
    %113 = math.tanh %112 : vector<2x32xf32>
    %cst_58 = arith.constant 1.000000e+00 : f32
    %114 = vector.broadcast %cst_58 : f32 to vector<2x32xf32>
    %115 = arith.subf %114, %108 : vector<2x32xf32>
    %116 = arith.mulf %115, %113 : vector<2x32xf32>
    %117 = arith.mulf %108, %87 : vector<2x32xf32>
    %118 = arith.addf %116, %117 : vector<2x32xf32>
    %cst_59 = arith.constant dense<0.000000e+00> : vector<2x96xf32>
    %119 = tpu.matmul %118, %85, %cst_59 {dimension_numbers = #tpu.dot_dimension_numbers<[1], [0], [0], [1], [0, 0, 1, 1], [], []>} : vector<2x32xf32>, vector<32x96xf32>, vector<2x96xf32> -> vector<2x96xf32>
    %120 = vector.broadcast %86 : vector<1x96xf32> to vector<2x96xf32>
    %121 = arith.addf %119, %120 : vector<2x96xf32>
    %122 = vector.extract_strided_slice %84 {offsets = [1, 0, 0], sizes = [1, 2, 96], strides = [1, 1, 1]} : vector<16x2x96xf32> to vector<1x2x96xf32>
    %123 = vector.shape_cast %122 : vector<1x2x96xf32> to vector<2x96xf32>
    %124 = vector.extract_strided_slice %123 {offsets = [0, 0], sizes = [2, 32], strides = [1, 1]} : vector<2x96xf32> to vector<2x32xf32>
    %125 = vector.extract_strided_slice %121 {offsets = [0, 0], sizes = [2, 32], strides = [1, 1]} : vector<2x96xf32> to vector<2x32xf32>
    %126 = arith.addf %124, %125 : vector<2x32xf32>
    %127 = arith.negf %126 : vector<2x32xf32>
    %128 = math.exp %127 : vector<2x32xf32>
    %cst_60 = arith.constant 1.000000e+00 : f32
    %129 = vector.broadcast %cst_60 : f32 to vector<2x32xf32>
    %130 = arith.addf %129, %128 : vector<2x32xf32>
    %131 = arith.divf %129, %130 : vector<2x32xf32>
    %132 = vector.extract_strided_slice %123 {offsets = [0, 32], sizes = [2, 32], strides = [1, 1]} : vector<2x96xf32> to vector<2x32xf32>
    %133 = vector.extract_strided_slice %121 {offsets = [0, 32], sizes = [2, 32], strides = [1, 1]} : vector<2x96xf32> to vector<2x32xf32>
    %134 = arith.addf %132, %133 : vector<2x32xf32>
    %135 = arith.negf %134 : vector<2x32xf32>
    %136 = math.exp %135 : vector<2x32xf32>
    %cst_61 = arith.constant 1.000000e+00 : f32
    %137 = vector.broadcast %cst_61 : f32 to vector<2x32xf32>
    %138 = arith.addf %137, %136 : vector<2x32xf32>
    %139 = arith.divf %137, %138 : vector<2x32xf32>
    %140 = vector.extract_strided_slice %123 {offsets = [0, 64], sizes = [2, 32], strides = [1, 1]} : vector<2x96xf32> to vector<2x32xf32>
    %141 = vector.extract_strided_slice %121 {offsets = [0, 64], sizes = [2, 32], strides = [1, 1]} : vector<2x96xf32> to vector<2x32xf32>
    %142 = arith.mulf %131, %141 : vector<2x32xf32>
    %143 = arith.addf %140, %142 : vector<2x32xf32>
    %144 = math.tanh %143 : vector<2x32xf32>
    %cst_62 = arith.constant 1.000000e+00 : f32
    %145 = vector.broadcast %cst_62 : f32 to vector<2x32xf32>
    %146 = arith.subf %145, %139 : vector<2x32xf32>
    %147 = arith.mulf %146, %144 : vector<2x32xf32>
    %148 = arith.mulf %139, %118 : vector<2x32xf32>
    %149 = arith.addf %147, %148 : vector<2x32xf32>
    %150 = arith.maximumf %118, %149 : vector<2x32xf32>
    %cst_63 = arith.constant dense<0.000000e+00> : vector<2x96xf32>
    %151 = tpu.matmul %149, %85, %cst_63 {dimension_numbers = #tpu.dot_dimension_numbers<[1], [0], [0], [1], [0, 0, 1, 1], [], []>} : vector<2x32xf32>, vector<32x96xf32>, vector<2x96xf32> -> vector<2x96xf32>
    %152 = vector.broadcast %86 : vector<1x96xf32> to vector<2x96xf32>
    %153 = arith.addf %151, %152 : vector<2x96xf32>
    %154 = vector.extract_strided_slice %84 {offsets = [2, 0, 0], sizes = [1, 2, 96], strides = [1, 1, 1]} : vector<16x2x96xf32> to vector<1x2x96xf32>
    %155 = vector.shape_cast %154 : vector<1x2x96xf32> to vector<2x96xf32>
    %156 = vector.extract_strided_slice %155 {offsets = [0, 0], sizes = [2, 32], strides = [1, 1]} : vector<2x96xf32> to vector<2x32xf32>
    %157 = vector.extract_strided_slice %153 {offsets = [0, 0], sizes = [2, 32], strides = [1, 1]} : vector<2x96xf32> to vector<2x32xf32>
    %158 = arith.addf %156, %157 : vector<2x32xf32>
    %159 = arith.negf %158 : vector<2x32xf32>
    %160 = math.exp %159 : vector<2x32xf32>
    %cst_64 = arith.constant 1.000000e+00 : f32
    %161 = vector.broadcast %cst_64 : f32 to vector<2x32xf32>
    %162 = arith.addf %161, %160 : vector<2x32xf32>
    %163 = arith.divf %161, %162 : vector<2x32xf32>
    %164 = vector.extract_strided_slice %155 {offsets = [0, 32], sizes = [2, 32], strides = [1, 1]} : vector<2x96xf32> to vector<2x32xf32>
    %165 = vector.extract_strided_slice %153 {offsets = [0, 32], sizes = [2, 32], strides = [1, 1]} : vector<2x96xf32> to vector<2x32xf32>
    %166 = arith.addf %164, %165 : vector<2x32xf32>
    %167 = arith.negf %166 : vector<2x32xf32>
    %168 = math.exp %167 : vector<2x32xf32>
    %cst_65 = arith.constant 1.000000e+00 : f32
    %169 = vector.broadcast %cst_65 : f32 to vector<2x32xf32>
    %170 = arith.addf %169, %168 : vector<2x32xf32>
    %171 = arith.divf %169, %170 : vector<2x32xf32>
    %172 = vector.extract_strided_slice %155 {offsets = [0, 64], sizes = [2, 32], strides = [1, 1]} : vector<2x96xf32> to vector<2x32xf32>
    %173 = vector.extract_strided_slice %153 {offsets = [0, 64], sizes = [2, 32], strides = [1, 1]} : vector<2x96xf32> to vector<2x32xf32>
    %174 = arith.mulf %163, %173 : vector<2x32xf32>
    %175 = arith.addf %172, %174 : vector<2x32xf32>
    %176 = math.tanh %175 : vector<2x32xf32>
    %cst_66 = arith.constant 1.000000e+00 : f32
    %177 = vector.broadcast %cst_66 : f32 to vector<2x32xf32>
    %178 = arith.subf %177, %171 : vector<2x32xf32>
    %179 = arith.mulf %178, %176 : vector<2x32xf32>
    %180 = arith.mulf %171, %149 : vector<2x32xf32>
    %181 = arith.addf %179, %180 : vector<2x32xf32>
    %cst_67 = arith.constant dense<0.000000e+00> : vector<2x96xf32>
    %182 = tpu.matmul %181, %85, %cst_67 {dimension_numbers = #tpu.dot_dimension_numbers<[1], [0], [0], [1], [0, 0, 1, 1], [], []>} : vector<2x32xf32>, vector<32x96xf32>, vector<2x96xf32> -> vector<2x96xf32>
    %183 = vector.broadcast %86 : vector<1x96xf32> to vector<2x96xf32>
    %184 = arith.addf %182, %183 : vector<2x96xf32>
    %185 = vector.extract_strided_slice %84 {offsets = [3, 0, 0], sizes = [1, 2, 96], strides = [1, 1, 1]} : vector<16x2x96xf32> to vector<1x2x96xf32>
    %186 = vector.shape_cast %185 : vector<1x2x96xf32> to vector<2x96xf32>
    %187 = vector.extract_strided_slice %186 {offsets = [0, 0], sizes = [2, 32], strides = [1, 1]} : vector<2x96xf32> to vector<2x32xf32>
    %188 = vector.extract_strided_slice %184 {offsets = [0, 0], sizes = [2, 32], strides = [1, 1]} : vector<2x96xf32> to vector<2x32xf32>
    %189 = arith.addf %187, %188 : vector<2x32xf32>
    %190 = arith.negf %189 : vector<2x32xf32>
    %191 = math.exp %190 : vector<2x32xf32>
    %cst_68 = arith.constant 1.000000e+00 : f32
    %192 = vector.broadcast %cst_68 : f32 to vector<2x32xf32>
    %193 = arith.addf %192, %191 : vector<2x32xf32>
    %194 = arith.divf %192, %193 : vector<2x32xf32>
    %195 = vector.extract_strided_slice %186 {offsets = [0, 32], sizes = [2, 32], strides = [1, 1]} : vector<2x96xf32> to vector<2x32xf32>
    %196 = vector.extract_strided_slice %184 {offsets = [0, 32], sizes = [2, 32], strides = [1, 1]} : vector<2x96xf32> to vector<2x32xf32>
    %197 = arith.addf %195, %196 : vector<2x32xf32>
    %198 = arith.negf %197 : vector<2x32xf32>
    %199 = math.exp %198 : vector<2x32xf32>
    %cst_69 = arith.constant 1.000000e+00 : f32
    %200 = vector.broadcast %cst_69 : f32 to vector<2x32xf32>
    %201 = arith.addf %200, %199 : vector<2x32xf32>
    %202 = arith.divf %200, %201 : vector<2x32xf32>
    %203 = vector.extract_strided_slice %186 {offsets = [0, 64], sizes = [2, 32], strides = [1, 1]} : vector<2x96xf32> to vector<2x32xf32>
    %204 = vector.extract_strided_slice %184 {offsets = [0, 64], sizes = [2, 32], strides = [1, 1]} : vector<2x96xf32> to vector<2x32xf32>
    %205 = arith.mulf %194, %204 : vector<2x32xf32>
    %206 = arith.addf %203, %205 : vector<2x32xf32>
    %207 = math.tanh %206 : vector<2x32xf32>
    %cst_70 = arith.constant 1.000000e+00 : f32
    %208 = vector.broadcast %cst_70 : f32 to vector<2x32xf32>
    %209 = arith.subf %208, %202 : vector<2x32xf32>
    %210 = arith.mulf %209, %207 : vector<2x32xf32>
    %211 = arith.mulf %202, %181 : vector<2x32xf32>
    %212 = arith.addf %210, %211 : vector<2x32xf32>
    %213 = arith.maximumf %181, %212 : vector<2x32xf32>
    %cst_71 = arith.constant dense<0.000000e+00> : vector<2x96xf32>
    %214 = tpu.matmul %212, %85, %cst_71 {dimension_numbers = #tpu.dot_dimension_numbers<[1], [0], [0], [1], [0, 0, 1, 1], [], []>} : vector<2x32xf32>, vector<32x96xf32>, vector<2x96xf32> -> vector<2x96xf32>
    %215 = vector.broadcast %86 : vector<1x96xf32> to vector<2x96xf32>
    %216 = arith.addf %214, %215 : vector<2x96xf32>
    %217 = vector.extract_strided_slice %84 {offsets = [4, 0, 0], sizes = [1, 2, 96], strides = [1, 1, 1]} : vector<16x2x96xf32> to vector<1x2x96xf32>
    %218 = vector.shape_cast %217 : vector<1x2x96xf32> to vector<2x96xf32>
    %219 = vector.extract_strided_slice %218 {offsets = [0, 0], sizes = [2, 32], strides = [1, 1]} : vector<2x96xf32> to vector<2x32xf32>
    %220 = vector.extract_strided_slice %216 {offsets = [0, 0], sizes = [2, 32], strides = [1, 1]} : vector<2x96xf32> to vector<2x32xf32>
    %221 = arith.addf %219, %220 : vector<2x32xf32>
    %222 = arith.negf %221 : vector<2x32xf32>
    %223 = math.exp %222 : vector<2x32xf32>
    %cst_72 = arith.constant 1.000000e+00 : f32
    %224 = vector.broadcast %cst_72 : f32 to vector<2x32xf32>
    %225 = arith.addf %224, %223 : vector<2x32xf32>
    %226 = arith.divf %224, %225 : vector<2x32xf32>
    %227 = vector.extract_strided_slice %218 {offsets = [0, 32], sizes = [2, 32], strides = [1, 1]} : vector<2x96xf32> to vector<2x32xf32>
    %228 = vector.extract_strided_slice %216 {offsets = [0, 32], sizes = [2, 32], strides = [1, 1]} : vector<2x96xf32> to vector<2x32xf32>
    %229 = arith.addf %227, %228 : vector<2x32xf32>
    %230 = arith.negf %229 : vector<2x32xf32>
    %231 = math.exp %230 : vector<2x32xf32>
    %cst_73 = arith.constant 1.000000e+00 : f32
    %232 = vector.broadcast %cst_73 : f32 to vector<2x32xf32>
    %233 = arith.addf %232, %231 : vector<2x32xf32>
    %234 = arith.divf %232, %233 : vector<2x32xf32>
    %235 = vector.extract_strided_slice %218 {offsets = [0, 64], sizes = [2, 32], strides = [1, 1]} : vector<2x96xf32> to vector<2x32xf32>
    %236 = vector.extract_strided_slice %216 {offsets = [0, 64], sizes = [2, 32], strides = [1, 1]} : vector<2x96xf32> to vector<2x32xf32>
    %237 = arith.mulf %226, %236 : vector<2x32xf32>
    %238 = arith.addf %235, %237 : vector<2x32xf32>
    %239 = math.tanh %238 : vector<2x32xf32>
    %cst_74 = arith.constant 1.000000e+00 : f32
    %240 = vector.broadcast %cst_74 : f32 to vector<2x32xf32>
    %241 = arith.subf %240, %234 : vector<2x32xf32>
    %242 = arith.mulf %241, %239 : vector<2x32xf32>
    %243 = arith.mulf %234, %212 : vector<2x32xf32>
    %244 = arith.addf %242, %243 : vector<2x32xf32>
    %cst_75 = arith.constant dense<0.000000e+00> : vector<2x96xf32>
    %245 = tpu.matmul %244, %85, %cst_75 {dimension_numbers = #tpu.dot_dimension_numbers<[1], [0], [0], [1], [0, 0, 1, 1], [], []>} : vector<2x32xf32>, vector<32x96xf32>, vector<2x96xf32> -> vector<2x96xf32>
    %246 = vector.broadcast %86 : vector<1x96xf32> to vector<2x96xf32>
    %247 = arith.addf %245, %246 : vector<2x96xf32>
    %248 = vector.extract_strided_slice %84 {offsets = [5, 0, 0], sizes = [1, 2, 96], strides = [1, 1, 1]} : vector<16x2x96xf32> to vector<1x2x96xf32>
    %249 = vector.shape_cast %248 : vector<1x2x96xf32> to vector<2x96xf32>
    %250 = vector.extract_strided_slice %249 {offsets = [0, 0], sizes = [2, 32], strides = [1, 1]} : vector<2x96xf32> to vector<2x32xf32>
    %251 = vector.extract_strided_slice %247 {offsets = [0, 0], sizes = [2, 32], strides = [1, 1]} : vector<2x96xf32> to vector<2x32xf32>
    %252 = arith.addf %250, %251 : vector<2x32xf32>
    %253 = arith.negf %252 : vector<2x32xf32>
    %254 = math.exp %253 : vector<2x32xf32>
    %cst_76 = arith.constant 1.000000e+00 : f32
    %255 = vector.broadcast %cst_76 : f32 to vector<2x32xf32>
    %256 = arith.addf %255, %254 : vector<2x32xf32>
    %257 = arith.divf %255, %256 : vector<2x32xf32>
    %258 = vector.extract_strided_slice %249 {offsets = [0, 32], sizes = [2, 32], strides = [1, 1]} : vector<2x96xf32> to vector<2x32xf32>
    %259 = vector.extract_strided_slice %247 {offsets = [0, 32], sizes = [2, 32], strides = [1, 1]} : vector<2x96xf32> to vector<2x32xf32>
    %260 = arith.addf %258, %259 : vector<2x32xf32>
    %261 = arith.negf %260 : vector<2x32xf32>
    %262 = math.exp %261 : vector<2x32xf32>
    %cst_77 = arith.constant 1.000000e+00 : f32
    %263 = vector.broadcast %cst_77 : f32 to vector<2x32xf32>
    %264 = arith.addf %263, %262 : vector<2x32xf32>
    %265 = arith.divf %263, %264 : vector<2x32xf32>
    %266 = vector.extract_strided_slice %249 {offsets = [0, 64], sizes = [2, 32], strides = [1, 1]} : vector<2x96xf32> to vector<2x32xf32>
    %267 = vector.extract_strided_slice %247 {offsets = [0, 64], sizes = [2, 32], strides = [1, 1]} : vector<2x96xf32> to vector<2x32xf32>
    %268 = arith.mulf %257, %267 : vector<2x32xf32>
    %269 = arith.addf %266, %268 : vector<2x32xf32>
    %270 = math.tanh %269 : vector<2x32xf32>
    %cst_78 = arith.constant 1.000000e+00 : f32
    %271 = vector.broadcast %cst_78 : f32 to vector<2x32xf32>
    %272 = arith.subf %271, %265 : vector<2x32xf32>
    %273 = arith.mulf %272, %270 : vector<2x32xf32>
    %274 = arith.mulf %265, %244 : vector<2x32xf32>
    %275 = arith.addf %273, %274 : vector<2x32xf32>
    %276 = arith.maximumf %244, %275 : vector<2x32xf32>
    %cst_79 = arith.constant dense<0.000000e+00> : vector<2x96xf32>
    %277 = tpu.matmul %275, %85, %cst_79 {dimension_numbers = #tpu.dot_dimension_numbers<[1], [0], [0], [1], [0, 0, 1, 1], [], []>} : vector<2x32xf32>, vector<32x96xf32>, vector<2x96xf32> -> vector<2x96xf32>
    %278 = vector.broadcast %86 : vector<1x96xf32> to vector<2x96xf32>
    %279 = arith.addf %277, %278 : vector<2x96xf32>
    %280 = vector.extract_strided_slice %84 {offsets = [6, 0, 0], sizes = [1, 2, 96], strides = [1, 1, 1]} : vector<16x2x96xf32> to vector<1x2x96xf32>
    %281 = vector.shape_cast %280 : vector<1x2x96xf32> to vector<2x96xf32>
    %282 = vector.extract_strided_slice %281 {offsets = [0, 0], sizes = [2, 32], strides = [1, 1]} : vector<2x96xf32> to vector<2x32xf32>
    %283 = vector.extract_strided_slice %279 {offsets = [0, 0], sizes = [2, 32], strides = [1, 1]} : vector<2x96xf32> to vector<2x32xf32>
    %284 = arith.addf %282, %283 : vector<2x32xf32>
    %285 = arith.negf %284 : vector<2x32xf32>
    %286 = math.exp %285 : vector<2x32xf32>
    %cst_80 = arith.constant 1.000000e+00 : f32
    %287 = vector.broadcast %cst_80 : f32 to vector<2x32xf32>
    %288 = arith.addf %287, %286 : vector<2x32xf32>
    %289 = arith.divf %287, %288 : vector<2x32xf32>
    %290 = vector.extract_strided_slice %281 {offsets = [0, 32], sizes = [2, 32], strides = [1, 1]} : vector<2x96xf32> to vector<2x32xf32>
    %291 = vector.extract_strided_slice %279 {offsets = [0, 32], sizes = [2, 32], strides = [1, 1]} : vector<2x96xf32> to vector<2x32xf32>
    %292 = arith.addf %290, %291 : vector<2x32xf32>
    %293 = arith.negf %292 : vector<2x32xf32>
    %294 = math.exp %293 : vector<2x32xf32>
    %cst_81 = arith.constant 1.000000e+00 : f32
    %295 = vector.broadcast %cst_81 : f32 to vector<2x32xf32>
    %296 = arith.addf %295, %294 : vector<2x32xf32>
    %297 = arith.divf %295, %296 : vector<2x32xf32>
    %298 = vector.extract_strided_slice %281 {offsets = [0, 64], sizes = [2, 32], strides = [1, 1]} : vector<2x96xf32> to vector<2x32xf32>
    %299 = vector.extract_strided_slice %279 {offsets = [0, 64], sizes = [2, 32], strides = [1, 1]} : vector<2x96xf32> to vector<2x32xf32>
    %300 = arith.mulf %289, %299 : vector<2x32xf32>
    %301 = arith.addf %298, %300 : vector<2x32xf32>
    %302 = math.tanh %301 : vector<2x32xf32>
    %cst_82 = arith.constant 1.000000e+00 : f32
    %303 = vector.broadcast %cst_82 : f32 to vector<2x32xf32>
    %304 = arith.subf %303, %297 : vector<2x32xf32>
    %305 = arith.mulf %304, %302 : vector<2x32xf32>
    %306 = arith.mulf %297, %275 : vector<2x32xf32>
    %307 = arith.addf %305, %306 : vector<2x32xf32>
    %cst_83 = arith.constant dense<0.000000e+00> : vector<2x96xf32>
    %308 = tpu.matmul %307, %85, %cst_83 {dimension_numbers = #tpu.dot_dimension_numbers<[1], [0], [0], [1], [0, 0, 1, 1], [], []>} : vector<2x32xf32>, vector<32x96xf32>, vector<2x96xf32> -> vector<2x96xf32>
    %309 = vector.broadcast %86 : vector<1x96xf32> to vector<2x96xf32>
    %310 = arith.addf %308, %309 : vector<2x96xf32>
    %311 = vector.extract_strided_slice %84 {offsets = [7, 0, 0], sizes = [1, 2, 96], strides = [1, 1, 1]} : vector<16x2x96xf32> to vector<1x2x96xf32>
    %312 = vector.shape_cast %311 : vector<1x2x96xf32> to vector<2x96xf32>
    %313 = vector.extract_strided_slice %312 {offsets = [0, 0], sizes = [2, 32], strides = [1, 1]} : vector<2x96xf32> to vector<2x32xf32>
    %314 = vector.extract_strided_slice %310 {offsets = [0, 0], sizes = [2, 32], strides = [1, 1]} : vector<2x96xf32> to vector<2x32xf32>
    %315 = arith.addf %313, %314 : vector<2x32xf32>
    %316 = arith.negf %315 : vector<2x32xf32>
    %317 = math.exp %316 : vector<2x32xf32>
    %cst_84 = arith.constant 1.000000e+00 : f32
    %318 = vector.broadcast %cst_84 : f32 to vector<2x32xf32>
    %319 = arith.addf %318, %317 : vector<2x32xf32>
    %320 = arith.divf %318, %319 : vector<2x32xf32>
    %321 = vector.extract_strided_slice %312 {offsets = [0, 32], sizes = [2, 32], strides = [1, 1]} : vector<2x96xf32> to vector<2x32xf32>
    %322 = vector.extract_strided_slice %310 {offsets = [0, 32], sizes = [2, 32], strides = [1, 1]} : vector<2x96xf32> to vector<2x32xf32>
    %323 = arith.addf %321, %322 : vector<2x32xf32>
    %324 = arith.negf %323 : vector<2x32xf32>
    %325 = math.exp %324 : vector<2x32xf32>
    %cst_85 = arith.constant 1.000000e+00 : f32
    %326 = vector.broadcast %cst_85 : f32 to vector<2x32xf32>
    %327 = arith.addf %326, %325 : vector<2x32xf32>
    %328 = arith.divf %326, %327 : vector<2x32xf32>
    %329 = vector.extract_strided_slice %312 {offsets = [0, 64], sizes = [2, 32], strides = [1, 1]} : vector<2x96xf32> to vector<2x32xf32>
    %330 = vector.extract_strided_slice %310 {offsets = [0, 64], sizes = [2, 32], strides = [1, 1]} : vector<2x96xf32> to vector<2x32xf32>
    %331 = arith.mulf %320, %330 : vector<2x32xf32>
    %332 = arith.addf %329, %331 : vector<2x32xf32>
    %333 = math.tanh %332 : vector<2x32xf32>
    %cst_86 = arith.constant 1.000000e+00 : f32
    %334 = vector.broadcast %cst_86 : f32 to vector<2x32xf32>
    %335 = arith.subf %334, %328 : vector<2x32xf32>
    %336 = arith.mulf %335, %333 : vector<2x32xf32>
    %337 = arith.mulf %328, %307 : vector<2x32xf32>
    %338 = arith.addf %336, %337 : vector<2x32xf32>
    %339 = arith.maximumf %307, %338 : vector<2x32xf32>
    %cst_87 = arith.constant dense<0.000000e+00> : vector<2x96xf32>
    %340 = tpu.matmul %338, %85, %cst_87 {dimension_numbers = #tpu.dot_dimension_numbers<[1], [0], [0], [1], [0, 0, 1, 1], [], []>} : vector<2x32xf32>, vector<32x96xf32>, vector<2x96xf32> -> vector<2x96xf32>
    %341 = vector.broadcast %86 : vector<1x96xf32> to vector<2x96xf32>
    %342 = arith.addf %340, %341 : vector<2x96xf32>
    %343 = vector.extract_strided_slice %84 {offsets = [8, 0, 0], sizes = [1, 2, 96], strides = [1, 1, 1]} : vector<16x2x96xf32> to vector<1x2x96xf32>
    %344 = vector.shape_cast %343 : vector<1x2x96xf32> to vector<2x96xf32>
    %345 = vector.extract_strided_slice %344 {offsets = [0, 0], sizes = [2, 32], strides = [1, 1]} : vector<2x96xf32> to vector<2x32xf32>
    %346 = vector.extract_strided_slice %342 {offsets = [0, 0], sizes = [2, 32], strides = [1, 1]} : vector<2x96xf32> to vector<2x32xf32>
    %347 = arith.addf %345, %346 : vector<2x32xf32>
    %348 = arith.negf %347 : vector<2x32xf32>
    %349 = math.exp %348 : vector<2x32xf32>
    %cst_88 = arith.constant 1.000000e+00 : f32
    %350 = vector.broadcast %cst_88 : f32 to vector<2x32xf32>
    %351 = arith.addf %350, %349 : vector<2x32xf32>
    %352 = arith.divf %350, %351 : vector<2x32xf32>
    %353 = vector.extract_strided_slice %344 {offsets = [0, 32], sizes = [2, 32], strides = [1, 1]} : vector<2x96xf32> to vector<2x32xf32>
    %354 = vector.extract_strided_slice %342 {offsets = [0, 32], sizes = [2, 32], strides = [1, 1]} : vector<2x96xf32> to vector<2x32xf32>
    %355 = arith.addf %353, %354 : vector<2x32xf32>
    %356 = arith.negf %355 : vector<2x32xf32>
    %357 = math.exp %356 : vector<2x32xf32>
    %cst_89 = arith.constant 1.000000e+00 : f32
    %358 = vector.broadcast %cst_89 : f32 to vector<2x32xf32>
    %359 = arith.addf %358, %357 : vector<2x32xf32>
    %360 = arith.divf %358, %359 : vector<2x32xf32>
    %361 = vector.extract_strided_slice %344 {offsets = [0, 64], sizes = [2, 32], strides = [1, 1]} : vector<2x96xf32> to vector<2x32xf32>
    %362 = vector.extract_strided_slice %342 {offsets = [0, 64], sizes = [2, 32], strides = [1, 1]} : vector<2x96xf32> to vector<2x32xf32>
    %363 = arith.mulf %352, %362 : vector<2x32xf32>
    %364 = arith.addf %361, %363 : vector<2x32xf32>
    %365 = math.tanh %364 : vector<2x32xf32>
    %cst_90 = arith.constant 1.000000e+00 : f32
    %366 = vector.broadcast %cst_90 : f32 to vector<2x32xf32>
    %367 = arith.subf %366, %360 : vector<2x32xf32>
    %368 = arith.mulf %367, %365 : vector<2x32xf32>
    %369 = arith.mulf %360, %338 : vector<2x32xf32>
    %370 = arith.addf %368, %369 : vector<2x32xf32>
    %cst_91 = arith.constant dense<0.000000e+00> : vector<2x96xf32>
    %371 = tpu.matmul %370, %85, %cst_91 {dimension_numbers = #tpu.dot_dimension_numbers<[1], [0], [0], [1], [0, 0, 1, 1], [], []>} : vector<2x32xf32>, vector<32x96xf32>, vector<2x96xf32> -> vector<2x96xf32>
    %372 = vector.broadcast %86 : vector<1x96xf32> to vector<2x96xf32>
    %373 = arith.addf %371, %372 : vector<2x96xf32>
    %374 = vector.extract_strided_slice %84 {offsets = [9, 0, 0], sizes = [1, 2, 96], strides = [1, 1, 1]} : vector<16x2x96xf32> to vector<1x2x96xf32>
    %375 = vector.shape_cast %374 : vector<1x2x96xf32> to vector<2x96xf32>
    %376 = vector.extract_strided_slice %375 {offsets = [0, 0], sizes = [2, 32], strides = [1, 1]} : vector<2x96xf32> to vector<2x32xf32>
    %377 = vector.extract_strided_slice %373 {offsets = [0, 0], sizes = [2, 32], strides = [1, 1]} : vector<2x96xf32> to vector<2x32xf32>
    %378 = arith.addf %376, %377 : vector<2x32xf32>
    %379 = arith.negf %378 : vector<2x32xf32>
    %380 = math.exp %379 : vector<2x32xf32>
    %cst_92 = arith.constant 1.000000e+00 : f32
    %381 = vector.broadcast %cst_92 : f32 to vector<2x32xf32>
    %382 = arith.addf %381, %380 : vector<2x32xf32>
    %383 = arith.divf %381, %382 : vector<2x32xf32>
    %384 = vector.extract_strided_slice %375 {offsets = [0, 32], sizes = [2, 32], strides = [1, 1]} : vector<2x96xf32> to vector<2x32xf32>
    %385 = vector.extract_strided_slice %373 {offsets = [0, 32], sizes = [2, 32], strides = [1, 1]} : vector<2x96xf32> to vector<2x32xf32>
    %386 = arith.addf %384, %385 : vector<2x32xf32>
    %387 = arith.negf %386 : vector<2x32xf32>
    %388 = math.exp %387 : vector<2x32xf32>
    %cst_93 = arith.constant 1.000000e+00 : f32
    %389 = vector.broadcast %cst_93 : f32 to vector<2x32xf32>
    %390 = arith.addf %389, %388 : vector<2x32xf32>
    %391 = arith.divf %389, %390 : vector<2x32xf32>
    %392 = vector.extract_strided_slice %375 {offsets = [0, 64], sizes = [2, 32], strides = [1, 1]} : vector<2x96xf32> to vector<2x32xf32>
    %393 = vector.extract_strided_slice %373 {offsets = [0, 64], sizes = [2, 32], strides = [1, 1]} : vector<2x96xf32> to vector<2x32xf32>
    %394 = arith.mulf %383, %393 : vector<2x32xf32>
    %395 = arith.addf %392, %394 : vector<2x32xf32>
    %396 = math.tanh %395 : vector<2x32xf32>
    %cst_94 = arith.constant 1.000000e+00 : f32
    %397 = vector.broadcast %cst_94 : f32 to vector<2x32xf32>
    %398 = arith.subf %397, %391 : vector<2x32xf32>
    %399 = arith.mulf %398, %396 : vector<2x32xf32>
    %400 = arith.mulf %391, %370 : vector<2x32xf32>
    %401 = arith.addf %399, %400 : vector<2x32xf32>
    %402 = arith.maximumf %370, %401 : vector<2x32xf32>
    %cst_95 = arith.constant dense<0.000000e+00> : vector<2x96xf32>
    %403 = tpu.matmul %401, %85, %cst_95 {dimension_numbers = #tpu.dot_dimension_numbers<[1], [0], [0], [1], [0, 0, 1, 1], [], []>} : vector<2x32xf32>, vector<32x96xf32>, vector<2x96xf32> -> vector<2x96xf32>
    %404 = vector.broadcast %86 : vector<1x96xf32> to vector<2x96xf32>
    %405 = arith.addf %403, %404 : vector<2x96xf32>
    %406 = vector.extract_strided_slice %84 {offsets = [10, 0, 0], sizes = [1, 2, 96], strides = [1, 1, 1]} : vector<16x2x96xf32> to vector<1x2x96xf32>
    %407 = vector.shape_cast %406 : vector<1x2x96xf32> to vector<2x96xf32>
    %408 = vector.extract_strided_slice %407 {offsets = [0, 0], sizes = [2, 32], strides = [1, 1]} : vector<2x96xf32> to vector<2x32xf32>
    %409 = vector.extract_strided_slice %405 {offsets = [0, 0], sizes = [2, 32], strides = [1, 1]} : vector<2x96xf32> to vector<2x32xf32>
    %410 = arith.addf %408, %409 : vector<2x32xf32>
    %411 = arith.negf %410 : vector<2x32xf32>
    %412 = math.exp %411 : vector<2x32xf32>
    %cst_96 = arith.constant 1.000000e+00 : f32
    %413 = vector.broadcast %cst_96 : f32 to vector<2x32xf32>
    %414 = arith.addf %413, %412 : vector<2x32xf32>
    %415 = arith.divf %413, %414 : vector<2x32xf32>
    %416 = vector.extract_strided_slice %407 {offsets = [0, 32], sizes = [2, 32], strides = [1, 1]} : vector<2x96xf32> to vector<2x32xf32>
    %417 = vector.extract_strided_slice %405 {offsets = [0, 32], sizes = [2, 32], strides = [1, 1]} : vector<2x96xf32> to vector<2x32xf32>
    %418 = arith.addf %416, %417 : vector<2x32xf32>
    %419 = arith.negf %418 : vector<2x32xf32>
    %420 = math.exp %419 : vector<2x32xf32>
    %cst_97 = arith.constant 1.000000e+00 : f32
    %421 = vector.broadcast %cst_97 : f32 to vector<2x32xf32>
    %422 = arith.addf %421, %420 : vector<2x32xf32>
    %423 = arith.divf %421, %422 : vector<2x32xf32>
    %424 = vector.extract_strided_slice %407 {offsets = [0, 64], sizes = [2, 32], strides = [1, 1]} : vector<2x96xf32> to vector<2x32xf32>
    %425 = vector.extract_strided_slice %405 {offsets = [0, 64], sizes = [2, 32], strides = [1, 1]} : vector<2x96xf32> to vector<2x32xf32>
    %426 = arith.mulf %415, %425 : vector<2x32xf32>
    %427 = arith.addf %424, %426 : vector<2x32xf32>
    %428 = math.tanh %427 : vector<2x32xf32>
    %cst_98 = arith.constant 1.000000e+00 : f32
    %429 = vector.broadcast %cst_98 : f32 to vector<2x32xf32>
    %430 = arith.subf %429, %423 : vector<2x32xf32>
    %431 = arith.mulf %430, %428 : vector<2x32xf32>
    %432 = arith.mulf %423, %401 : vector<2x32xf32>
    %433 = arith.addf %431, %432 : vector<2x32xf32>
    %cst_99 = arith.constant dense<0.000000e+00> : vector<2x96xf32>
    %434 = tpu.matmul %433, %85, %cst_99 {dimension_numbers = #tpu.dot_dimension_numbers<[1], [0], [0], [1], [0, 0, 1, 1], [], []>} : vector<2x32xf32>, vector<32x96xf32>, vector<2x96xf32> -> vector<2x96xf32>
    %435 = vector.broadcast %86 : vector<1x96xf32> to vector<2x96xf32>
    %436 = arith.addf %434, %435 : vector<2x96xf32>
    %437 = vector.extract_strided_slice %84 {offsets = [11, 0, 0], sizes = [1, 2, 96], strides = [1, 1, 1]} : vector<16x2x96xf32> to vector<1x2x96xf32>
    %438 = vector.shape_cast %437 : vector<1x2x96xf32> to vector<2x96xf32>
    %439 = vector.extract_strided_slice %438 {offsets = [0, 0], sizes = [2, 32], strides = [1, 1]} : vector<2x96xf32> to vector<2x32xf32>
    %440 = vector.extract_strided_slice %436 {offsets = [0, 0], sizes = [2, 32], strides = [1, 1]} : vector<2x96xf32> to vector<2x32xf32>
    %441 = arith.addf %439, %440 : vector<2x32xf32>
    %442 = arith.negf %441 : vector<2x32xf32>
    %443 = math.exp %442 : vector<2x32xf32>
    %cst_100 = arith.constant 1.000000e+00 : f32
    %444 = vector.broadcast %cst_100 : f32 to vector<2x32xf32>
    %445 = arith.addf %444, %443 : vector<2x32xf32>
    %446 = arith.divf %444, %445 : vector<2x32xf32>
    %447 = vector.extract_strided_slice %438 {offsets = [0, 32], sizes = [2, 32], strides = [1, 1]} : vector<2x96xf32> to vector<2x32xf32>
    %448 = vector.extract_strided_slice %436 {offsets = [0, 32], sizes = [2, 32], strides = [1, 1]} : vector<2x96xf32> to vector<2x32xf32>
    %449 = arith.addf %447, %448 : vector<2x32xf32>
    %450 = arith.negf %449 : vector<2x32xf32>
    %451 = math.exp %450 : vector<2x32xf32>
    %cst_101 = arith.constant 1.000000e+00 : f32
    %452 = vector.broadcast %cst_101 : f32 to vector<2x32xf32>
    %453 = arith.addf %452, %451 : vector<2x32xf32>
    %454 = arith.divf %452, %453 : vector<2x32xf32>
    %455 = vector.extract_strided_slice %438 {offsets = [0, 64], sizes = [2, 32], strides = [1, 1]} : vector<2x96xf32> to vector<2x32xf32>
    %456 = vector.extract_strided_slice %436 {offsets = [0, 64], sizes = [2, 32], strides = [1, 1]} : vector<2x96xf32> to vector<2x32xf32>
    %457 = arith.mulf %446, %456 : vector<2x32xf32>
    %458 = arith.addf %455, %457 : vector<2x32xf32>
    %459 = math.tanh %458 : vector<2x32xf32>
    %cst_102 = arith.constant 1.000000e+00 : f32
    %460 = vector.broadcast %cst_102 : f32 to vector<2x32xf32>
    %461 = arith.subf %460, %454 : vector<2x32xf32>
    %462 = arith.mulf %461, %459 : vector<2x32xf32>
    %463 = arith.mulf %454, %433 : vector<2x32xf32>
    %464 = arith.addf %462, %463 : vector<2x32xf32>
    %465 = arith.maximumf %433, %464 : vector<2x32xf32>
    %cst_103 = arith.constant dense<0.000000e+00> : vector<2x96xf32>
    %466 = tpu.matmul %464, %85, %cst_103 {dimension_numbers = #tpu.dot_dimension_numbers<[1], [0], [0], [1], [0, 0, 1, 1], [], []>} : vector<2x32xf32>, vector<32x96xf32>, vector<2x96xf32> -> vector<2x96xf32>
    %467 = vector.broadcast %86 : vector<1x96xf32> to vector<2x96xf32>
    %468 = arith.addf %466, %467 : vector<2x96xf32>
    %469 = vector.extract_strided_slice %84 {offsets = [12, 0, 0], sizes = [1, 2, 96], strides = [1, 1, 1]} : vector<16x2x96xf32> to vector<1x2x96xf32>
    %470 = vector.shape_cast %469 : vector<1x2x96xf32> to vector<2x96xf32>
    %471 = vector.extract_strided_slice %470 {offsets = [0, 0], sizes = [2, 32], strides = [1, 1]} : vector<2x96xf32> to vector<2x32xf32>
    %472 = vector.extract_strided_slice %468 {offsets = [0, 0], sizes = [2, 32], strides = [1, 1]} : vector<2x96xf32> to vector<2x32xf32>
    %473 = arith.addf %471, %472 : vector<2x32xf32>
    %474 = arith.negf %473 : vector<2x32xf32>
    %475 = math.exp %474 : vector<2x32xf32>
    %cst_104 = arith.constant 1.000000e+00 : f32
    %476 = vector.broadcast %cst_104 : f32 to vector<2x32xf32>
    %477 = arith.addf %476, %475 : vector<2x32xf32>
    %478 = arith.divf %476, %477 : vector<2x32xf32>
    %479 = vector.extract_strided_slice %470 {offsets = [0, 32], sizes = [2, 32], strides = [1, 1]} : vector<2x96xf32> to vector<2x32xf32>
    %480 = vector.extract_strided_slice %468 {offsets = [0, 32], sizes = [2, 32], strides = [1, 1]} : vector<2x96xf32> to vector<2x32xf32>
    %481 = arith.addf %479, %480 : vector<2x32xf32>
    %482 = arith.negf %481 : vector<2x32xf32>
    %483 = math.exp %482 : vector<2x32xf32>
    %cst_105 = arith.constant 1.000000e+00 : f32
    %484 = vector.broadcast %cst_105 : f32 to vector<2x32xf32>
    %485 = arith.addf %484, %483 : vector<2x32xf32>
    %486 = arith.divf %484, %485 : vector<2x32xf32>
    %487 = vector.extract_strided_slice %470 {offsets = [0, 64], sizes = [2, 32], strides = [1, 1]} : vector<2x96xf32> to vector<2x32xf32>
    %488 = vector.extract_strided_slice %468 {offsets = [0, 64], sizes = [2, 32], strides = [1, 1]} : vector<2x96xf32> to vector<2x32xf32>
    %489 = arith.mulf %478, %488 : vector<2x32xf32>
    %490 = arith.addf %487, %489 : vector<2x32xf32>
    %491 = math.tanh %490 : vector<2x32xf32>
    %cst_106 = arith.constant 1.000000e+00 : f32
    %492 = vector.broadcast %cst_106 : f32 to vector<2x32xf32>
    %493 = arith.subf %492, %486 : vector<2x32xf32>
    %494 = arith.mulf %493, %491 : vector<2x32xf32>
    %495 = arith.mulf %486, %464 : vector<2x32xf32>
    %496 = arith.addf %494, %495 : vector<2x32xf32>
    %cst_107 = arith.constant dense<0.000000e+00> : vector<2x96xf32>
    %497 = tpu.matmul %496, %85, %cst_107 {dimension_numbers = #tpu.dot_dimension_numbers<[1], [0], [0], [1], [0, 0, 1, 1], [], []>} : vector<2x32xf32>, vector<32x96xf32>, vector<2x96xf32> -> vector<2x96xf32>
    %498 = vector.broadcast %86 : vector<1x96xf32> to vector<2x96xf32>
    %499 = arith.addf %497, %498 : vector<2x96xf32>
    %500 = vector.extract_strided_slice %84 {offsets = [13, 0, 0], sizes = [1, 2, 96], strides = [1, 1, 1]} : vector<16x2x96xf32> to vector<1x2x96xf32>
    %501 = vector.shape_cast %500 : vector<1x2x96xf32> to vector<2x96xf32>
    %502 = vector.extract_strided_slice %501 {offsets = [0, 0], sizes = [2, 32], strides = [1, 1]} : vector<2x96xf32> to vector<2x32xf32>
    %503 = vector.extract_strided_slice %499 {offsets = [0, 0], sizes = [2, 32], strides = [1, 1]} : vector<2x96xf32> to vector<2x32xf32>
    %504 = arith.addf %502, %503 : vector<2x32xf32>
    %505 = arith.negf %504 : vector<2x32xf32>
    %506 = math.exp %505 : vector<2x32xf32>
    %cst_108 = arith.constant 1.000000e+00 : f32
    %507 = vector.broadcast %cst_108 : f32 to vector<2x32xf32>
    %508 = arith.addf %507, %506 : vector<2x32xf32>
    %509 = arith.divf %507, %508 : vector<2x32xf32>
    %510 = vector.extract_strided_slice %501 {offsets = [0, 32], sizes = [2, 32], strides = [1, 1]} : vector<2x96xf32> to vector<2x32xf32>
    %511 = vector.extract_strided_slice %499 {offsets = [0, 32], sizes = [2, 32], strides = [1, 1]} : vector<2x96xf32> to vector<2x32xf32>
    %512 = arith.addf %510, %511 : vector<2x32xf32>
    %513 = arith.negf %512 : vector<2x32xf32>
    %514 = math.exp %513 : vector<2x32xf32>
    %cst_109 = arith.constant 1.000000e+00 : f32
    %515 = vector.broadcast %cst_109 : f32 to vector<2x32xf32>
    %516 = arith.addf %515, %514 : vector<2x32xf32>
    %517 = arith.divf %515, %516 : vector<2x32xf32>
    %518 = vector.extract_strided_slice %501 {offsets = [0, 64], sizes = [2, 32], strides = [1, 1]} : vector<2x96xf32> to vector<2x32xf32>
    %519 = vector.extract_strided_slice %499 {offsets = [0, 64], sizes = [2, 32], strides = [1, 1]} : vector<2x96xf32> to vector<2x32xf32>
    %520 = arith.mulf %509, %519 : vector<2x32xf32>
    %521 = arith.addf %518, %520 : vector<2x32xf32>
    %522 = math.tanh %521 : vector<2x32xf32>
    %cst_110 = arith.constant 1.000000e+00 : f32
    %523 = vector.broadcast %cst_110 : f32 to vector<2x32xf32>
    %524 = arith.subf %523, %517 : vector<2x32xf32>
    %525 = arith.mulf %524, %522 : vector<2x32xf32>
    %526 = arith.mulf %517, %496 : vector<2x32xf32>
    %527 = arith.addf %525, %526 : vector<2x32xf32>
    %528 = arith.maximumf %496, %527 : vector<2x32xf32>
    %cst_111 = arith.constant dense<0.000000e+00> : vector<2x96xf32>
    %529 = tpu.matmul %527, %85, %cst_111 {dimension_numbers = #tpu.dot_dimension_numbers<[1], [0], [0], [1], [0, 0, 1, 1], [], []>} : vector<2x32xf32>, vector<32x96xf32>, vector<2x96xf32> -> vector<2x96xf32>
    %530 = vector.broadcast %86 : vector<1x96xf32> to vector<2x96xf32>
    %531 = arith.addf %529, %530 : vector<2x96xf32>
    %532 = vector.extract_strided_slice %84 {offsets = [14, 0, 0], sizes = [1, 2, 96], strides = [1, 1, 1]} : vector<16x2x96xf32> to vector<1x2x96xf32>
    %533 = vector.shape_cast %532 : vector<1x2x96xf32> to vector<2x96xf32>
    %534 = vector.extract_strided_slice %533 {offsets = [0, 0], sizes = [2, 32], strides = [1, 1]} : vector<2x96xf32> to vector<2x32xf32>
    %535 = vector.extract_strided_slice %531 {offsets = [0, 0], sizes = [2, 32], strides = [1, 1]} : vector<2x96xf32> to vector<2x32xf32>
    %536 = arith.addf %534, %535 : vector<2x32xf32>
    %537 = arith.negf %536 : vector<2x32xf32>
    %538 = math.exp %537 : vector<2x32xf32>
    %cst_112 = arith.constant 1.000000e+00 : f32
    %539 = vector.broadcast %cst_112 : f32 to vector<2x32xf32>
    %540 = arith.addf %539, %538 : vector<2x32xf32>
    %541 = arith.divf %539, %540 : vector<2x32xf32>
    %542 = vector.extract_strided_slice %533 {offsets = [0, 32], sizes = [2, 32], strides = [1, 1]} : vector<2x96xf32> to vector<2x32xf32>
    %543 = vector.extract_strided_slice %531 {offsets = [0, 32], sizes = [2, 32], strides = [1, 1]} : vector<2x96xf32> to vector<2x32xf32>
    %544 = arith.addf %542, %543 : vector<2x32xf32>
    %545 = arith.negf %544 : vector<2x32xf32>
    %546 = math.exp %545 : vector<2x32xf32>
    %cst_113 = arith.constant 1.000000e+00 : f32
    %547 = vector.broadcast %cst_113 : f32 to vector<2x32xf32>
    %548 = arith.addf %547, %546 : vector<2x32xf32>
    %549 = arith.divf %547, %548 : vector<2x32xf32>
    %550 = vector.extract_strided_slice %533 {offsets = [0, 64], sizes = [2, 32], strides = [1, 1]} : vector<2x96xf32> to vector<2x32xf32>
    %551 = vector.extract_strided_slice %531 {offsets = [0, 64], sizes = [2, 32], strides = [1, 1]} : vector<2x96xf32> to vector<2x32xf32>
    %552 = arith.mulf %541, %551 : vector<2x32xf32>
    %553 = arith.addf %550, %552 : vector<2x32xf32>
    %554 = math.tanh %553 : vector<2x32xf32>
    %cst_114 = arith.constant 1.000000e+00 : f32
    %555 = vector.broadcast %cst_114 : f32 to vector<2x32xf32>
    %556 = arith.subf %555, %549 : vector<2x32xf32>
    %557 = arith.mulf %556, %554 : vector<2x32xf32>
    %558 = arith.mulf %549, %527 : vector<2x32xf32>
    %559 = arith.addf %557, %558 : vector<2x32xf32>
    %cst_115 = arith.constant dense<0.000000e+00> : vector<2x96xf32>
    %560 = tpu.matmul %559, %85, %cst_115 {dimension_numbers = #tpu.dot_dimension_numbers<[1], [0], [0], [1], [0, 0, 1, 1], [], []>} : vector<2x32xf32>, vector<32x96xf32>, vector<2x96xf32> -> vector<2x96xf32>
    %561 = vector.broadcast %86 : vector<1x96xf32> to vector<2x96xf32>
    %562 = arith.addf %560, %561 : vector<2x96xf32>
    %563 = vector.extract_strided_slice %84 {offsets = [15, 0, 0], sizes = [1, 2, 96], strides = [1, 1, 1]} : vector<16x2x96xf32> to vector<1x2x96xf32>
    %564 = vector.shape_cast %563 : vector<1x2x96xf32> to vector<2x96xf32>
    %565 = vector.extract_strided_slice %564 {offsets = [0, 0], sizes = [2, 32], strides = [1, 1]} : vector<2x96xf32> to vector<2x32xf32>
    %566 = vector.extract_strided_slice %562 {offsets = [0, 0], sizes = [2, 32], strides = [1, 1]} : vector<2x96xf32> to vector<2x32xf32>
    %567 = arith.addf %565, %566 : vector<2x32xf32>
    %568 = arith.negf %567 : vector<2x32xf32>
    %569 = math.exp %568 : vector<2x32xf32>
    %cst_116 = arith.constant 1.000000e+00 : f32
    %570 = vector.broadcast %cst_116 : f32 to vector<2x32xf32>
    %571 = arith.addf %570, %569 : vector<2x32xf32>
    %572 = arith.divf %570, %571 : vector<2x32xf32>
    %573 = vector.extract_strided_slice %564 {offsets = [0, 32], sizes = [2, 32], strides = [1, 1]} : vector<2x96xf32> to vector<2x32xf32>
    %574 = vector.extract_strided_slice %562 {offsets = [0, 32], sizes = [2, 32], strides = [1, 1]} : vector<2x96xf32> to vector<2x32xf32>
    %575 = arith.addf %573, %574 : vector<2x32xf32>
    %576 = arith.negf %575 : vector<2x32xf32>
    %577 = math.exp %576 : vector<2x32xf32>
    %cst_117 = arith.constant 1.000000e+00 : f32
    %578 = vector.broadcast %cst_117 : f32 to vector<2x32xf32>
    %579 = arith.addf %578, %577 : vector<2x32xf32>
    %580 = arith.divf %578, %579 : vector<2x32xf32>
    %581 = vector.extract_strided_slice %564 {offsets = [0, 64], sizes = [2, 32], strides = [1, 1]} : vector<2x96xf32> to vector<2x32xf32>
    %582 = vector.extract_strided_slice %562 {offsets = [0, 64], sizes = [2, 32], strides = [1, 1]} : vector<2x96xf32> to vector<2x32xf32>
    %583 = arith.mulf %572, %582 : vector<2x32xf32>
    %584 = arith.addf %581, %583 : vector<2x32xf32>
    %585 = math.tanh %584 : vector<2x32xf32>
    %cst_118 = arith.constant 1.000000e+00 : f32
    %586 = vector.broadcast %cst_118 : f32 to vector<2x32xf32>
    %587 = arith.subf %586, %580 : vector<2x32xf32>
    %588 = arith.mulf %587, %585 : vector<2x32xf32>
    %589 = arith.mulf %580, %559 : vector<2x32xf32>
    %590 = arith.addf %588, %589 : vector<2x32xf32>
    %591 = arith.maximumf %559, %590 : vector<2x32xf32>
    %592 = vector.shape_cast %118 : vector<2x32xf32> to vector<1x2x32xf32>
    %593 = vector.shape_cast %149 : vector<2x32xf32> to vector<1x2x32xf32>
    %594 = vector.shape_cast %181 : vector<2x32xf32> to vector<1x2x32xf32>
    %595 = vector.shape_cast %212 : vector<2x32xf32> to vector<1x2x32xf32>
    %596 = vector.shape_cast %244 : vector<2x32xf32> to vector<1x2x32xf32>
    %597 = vector.shape_cast %275 : vector<2x32xf32> to vector<1x2x32xf32>
    %598 = vector.shape_cast %307 : vector<2x32xf32> to vector<1x2x32xf32>
    %599 = vector.shape_cast %338 : vector<2x32xf32> to vector<1x2x32xf32>
    %600 = vector.shape_cast %370 : vector<2x32xf32> to vector<1x2x32xf32>
    %601 = vector.shape_cast %401 : vector<2x32xf32> to vector<1x2x32xf32>
    %602 = vector.shape_cast %433 : vector<2x32xf32> to vector<1x2x32xf32>
    %603 = vector.shape_cast %464 : vector<2x32xf32> to vector<1x2x32xf32>
    %604 = vector.shape_cast %496 : vector<2x32xf32> to vector<1x2x32xf32>
    %605 = vector.shape_cast %527 : vector<2x32xf32> to vector<1x2x32xf32>
    %606 = vector.shape_cast %559 : vector<2x32xf32> to vector<1x2x32xf32>
    %607 = vector.shape_cast %590 : vector<2x32xf32> to vector<1x2x32xf32>
    %608 = tpu.concatenate %592, %593, %594, %595, %596, %597, %598, %599, %600, %601, %602, %603, %604, %605, %606, %607 in 0 : vector<1x2x32xf32>, vector<1x2x32xf32>, vector<1x2x32xf32>, vector<1x2x32xf32>, vector<1x2x32xf32>, vector<1x2x32xf32>, vector<1x2x32xf32>, vector<1x2x32xf32>, vector<1x2x32xf32>, vector<1x2x32xf32>, vector<1x2x32xf32>, vector<1x2x32xf32>, vector<1x2x32xf32>, vector<1x2x32xf32>, vector<1x2x32xf32>, vector<1x2x32xf32> -> vector<16x2x32xf32>
    %c0_119 = arith.constant 0 : index
    %c0_120 = arith.constant 0 : index
    %c0_121 = arith.constant 0 : index
    %609 = vector.load %arg14[%c0_119, %c0_120, %c0_121] : memref<16x2x32xf32, #tpu.memory_space<vmem>>, vector<16x2x32xf32>
    tpu.vector_store %arg14[%c0_119, %c0_120, %c0_121], %608 {strides = array<i32>} : memref<16x2x32xf32, #tpu.memory_space<vmem>>, vector<16x2x32xf32>,
    %610 = vector.shape_cast %150 : vector<2x32xf32> to vector<1x2x32xf32>
    %611 = vector.shape_cast %213 : vector<2x32xf32> to vector<1x2x32xf32>
    %612 = vector.shape_cast %276 : vector<2x32xf32> to vector<1x2x32xf32>
    %613 = vector.shape_cast %339 : vector<2x32xf32> to vector<1x2x32xf32>
    %614 = vector.shape_cast %402 : vector<2x32xf32> to vector<1x2x32xf32>
    %615 = vector.shape_cast %465 : vector<2x32xf32> to vector<1x2x32xf32>
    %616 = vector.shape_cast %528 : vector<2x32xf32> to vector<1x2x32xf32>
    %617 = vector.shape_cast %591 : vector<2x32xf32> to vector<1x2x32xf32>
    %618 = tpu.concatenate %610, %611, %612, %613, %614, %615, %616, %617 in 0 : vector<1x2x32xf32>, vector<1x2x32xf32>, vector<1x2x32xf32>, vector<1x2x32xf32>, vector<1x2x32xf32>, vector<1x2x32xf32>, vector<1x2x32xf32>, vector<1x2x32xf32> -> vector<8x2x32xf32>
    %c0_122 = arith.constant 0 : index
    %c0_123 = arith.constant 0 : index
    %c0_124 = arith.constant 0 : index
    %619 = vector.load %arg15[%c0_122, %c0_123, %c0_124] : memref<8x2x32xf32, #tpu.memory_space<vmem>>, vector<8x2x32xf32>
    tpu.vector_store %arg15[%c0_122, %c0_123, %c0_124], %618 {strides = array<i32>} : memref<8x2x32xf32, #tpu.memory_space<vmem>>, vector<8x2x32xf32>,
    return
  }
}

</mosaic_0001>

<bundles_post_ra>
// kernel: urnet_down_block.1
= control target key start
LH: loop header
LB: loop body
LE: loop exit
PB: predicated region body
PF: predicated region fallthrough
CT: control target
= control target key end

     0   :  { %s3933_s22 = smov 4   ;;  %s3934_s25 = smov 8   ;;  %vm314_vm0 = vcmask 1043456   ;;  %vm3935_vm1 = vmmov 1   ;;  %v3936_v28 = vmov 1983009808   ;;  %v242_v30 = vlaneseq  ;;  %s5039_s0 = inlined_call_operand.vmem [shape: f32[18,2,4], index: 0, kind: input, shape index: {}]   ;;  %s5040_s1 = inlined_call_operand.vmem [shape: f32[12,32], index: 1, kind: input, shape index: {}]   ;;  %s5041_s2 = inlined_call_operand.vmem [shape: f32[1,32], index: 2, kind: input, shape index: {}]   ;;  %s5042_s3 = inlined_call_operand.vmem [shape: f32[1,32], index: 3, kind: input, shape index: {}]   ;;  %s5043_s4 = inlined_call_operand.vmem [shape: f32[1,32], index: 4, kind: input, shape index: {}]   ;;  %s5044_s5 = inlined_call_operand.vmem [shape: f32[96,32], index: 5, kind: input, shape index: {}]   ;;  %s5045_s9 = inlined_call_operand.vmem [shape: f32[32,96], index: 9, kind: input, shape index: {}]   ;;  %s5046_s11 = inlined_call_operand.vmem [shape: f32[32,96], index: 11, kind: input, shape index: {}]   ;;  %s5047_s6 = inlined_call_operand.vmem [shape: f32[1,32], index: 6, kind: input, shape index: {}]   ;;  %s5048_s7 = inlined_call_operand.vmem [shape: f32[1,32], index: 7, kind: input, shape index: {}]   ;;  %s5049_s8 = inlined_call_operand.vmem [shape: f32[1,32], index: 8, kind: input, shape index: {}]   ;;  %s5050_s13 = inlined_call_operand.vmem [shape: f32[16,2,32], index: 13, kind: output, shape index: {0}]   ;;  %s5051_s10 = inlined_call_operand.vmem [shape: f32[1,96], index: 10, kind: input, shape index: {}]   ;;  %s5052_s12 = inlined_call_operand.vmem [shape: f32[1,96], index: 12, kind: input, shape index: {}]   ;;  %s5053_s14 = inlined_call_operand.vmem [shape: f32[16,2,32], index: 14, kind: output, shape index: {1}]   ;;  %s5054_s15 = inlined_call_operand.vmem [shape: f32[8,2,32], index: 15, kind: output, shape index: {2}]  }
   0x1   :  { %v4026_v0 = vld [vmem:[%s5039_s0 + $0x6] sm:$0x3]  ;;  %v4031_v1 = vld [vmem:[%s5039_s0 + $0x2] sm:$0x3]  ;;  %v4040_v2 = vld [vmem:[%s5039_s0 + $0x8] sm:$0x3]  ;;  %v240_v29 = vunpack.c.l.s4 %v3936_v28 }
   0x2   :  { %85 = vrot.lane.b32.xlu1 %v4026_v0, %s3933_s22  ;;  %81 = vrot.lane.b32.xlu0 %v4031_v1, %s3933_s22  ;;  %v4045_v3 = vld [vmem:[%s5039_s0 + $0x4] sm:$0x3]  ;;  %v4054_v4 = vld [vmem:[%s5039_s0 + $0xc] sm:$0x3]  ;;  %vm3689_vm2 = vmpackc.low %vm314_vm0, %vm3935_vm1  ;;  %vm178_vm3 = vcmask 31744   ;;  %vm195_vm4 = vcmask 64512  }
   0x3   :  { %v4059_v5 = vld [vmem:[%s5039_s0 + $0xa] sm:$0x3]  ;;  %v4068_v6 = vld [vmem:[%s5039_s0 + $0x10] sm:$0x3]  ;;  %v4073_v7 = vld [vmem:[%s5039_s0 + $0xe] sm:$0x3]  ;;  %v241_v36 = vunpack.c.0.s8 %v240_v29 }
   0x4   :  { %v212_v8 = vld [vmem:[%s5040_s1] sm:$0xff]  ;;  %v213_v9 = vld [vmem:[%s5040_s1 + $0x8] sm:$0xf]  ;;  %v4100_v11 = vld [vmem:[%s5039_s0 + $0x12] sm:$0x3]  ;;  %v4177_v37 = vshrl.u32 %v242_v30, 7 }
   0x5   :  { %v3688_v10 = vpack.c.bf16 %v213_v9, %v212_v8  ;;  %v4109_v12 = vld [vmem:[%s5039_s0 + $0x14] sm:$0x3]  ;;  %v4118_v13 = vld [vmem:[%s5039_s0 + $0x18] sm:$0x3]  ;;  %v4123_v14 = vld [vmem:[%s5039_s0 + $0x16] sm:$0x3] }
   0x6   :  { %87 = vrot.lane.b32.xlu1 %v4040_v2, %s3933_s22  ;;  %83 = vrot.lane.b32.xlu0 %v4045_v3, %s3933_s22  ;;  %v4132_v15 = vld [vmem:[%s5039_s0 + $0x1c] sm:$0x3]  ;;  %v4137_v16 = vld [vmem:[%s5039_s0 + $0x1a] sm:$0x3]  ;;  %v4186_v45 = vsub.s32 %v241_v36, %v4177_v37  ;;  %vm305_vm5 = vcmask 97280   ;;  %vm403_vm6 = vcmask 261120  }
   0x7   :  { %3690 = vmatprep.subr.msk.bf16.mxu0 %vm3689_vm2, %v3688_v10  ;;  %v63_v17 = vld [vmem:[%s5039_s0 + $0x20] sm:$0x3]  ;;  %v4149_v18 = vld [vmem:[%s5039_s0 + $0x1e] sm:$0x3]  ;;  %v64_v19 = vld [vmem:[%s5039_s0 + $0x22] sm:$0x3] }
   0x8   :  { %3693 = vmatpush3.bf16.msk.msra.mxu0 %vm3689_vm2, %v3688_v10  ;;  %v47_v31 = vld [vmem:[%s5039_s0] sm:$0x3]  ;;  %vm469_vm7 = vcmask 254976   ;;  %vm725_vm8 = vcmask 523264   ;;  %vm845_vm9 = vcmask 785408   ;;  %vm3941_vm10 = vmmov 0  }
   0xa   :  { %91 = vrot.lane.b32.xlu1 %v4054_v4, %s3933_s22  ;;  %89 = vrot.lane.b32.xlu0 %v4059_v5, %s3933_s22 }
   0xe   :  { %95 = vrot.lane.b32.xlu1 %v4068_v6, %s3933_s22  ;;  %93 = vrot.lane.b32.xlu0 %v4073_v7, %s3933_s22 }
  0x12   :  { %132 = vrot.lane.b32.xlu1 %v4026_v0, %s3934_s25  ;;  %130 = vrot.lane.b32.xlu0 %v4045_v3, %s3934_s25 }
  0x16   :  { %136 = vrot.lane.b32.xlu1 %v4059_v5, %s3934_s25  ;;  %134 = vrot.lane.b32.xlu0 %v4040_v2, %s3934_s25 }
  0x1a   :  { %140 = vrot.lane.b32.xlu1 %v4073_v7, %s3934_s25  ;;  %138 = vrot.lane.b32.xlu0 %v4054_v4, %s3934_s25 }
  0x1e   :  { %144 = vrot.lane.b32.xlu1 %v4100_v11, %s3934_s25  ;;  %142 = vrot.lane.b32.xlu0 %v4068_v6, %s3934_s25 }
  0x22   :  { %99 = vrot.lane.b32.xlu1 %v4109_v12, %s3933_s22  ;;  %97 = vrot.lane.b32.xlu0 %v4100_v11, %s3933_s22 }
  0x26   :  { %103 = vrot.lane.b32.xlu1 %v4118_v13, %s3933_s22  ;;  %101 = vrot.lane.b32.xlu0 %v4123_v14, %s3933_s22 }
  0x2a   :  { %107 = vrot.lane.b32.xlu1 %v4132_v15, %s3933_s22  ;;  %105 = vrot.lane.b32.xlu0 %v4137_v16, %s3933_s22 }
  0x2e   :  { %111 = vrot.lane.b32.xlu1 %v63_v17, %s3933_s22  ;;  %109 = vrot.lane.b32.xlu0 %v4149_v18, %s3933_s22 }
  0x32   :  { %148 = vrot.lane.b32.xlu1 %v4123_v14, %s3934_s25  ;;  %146 = vrot.lane.b32.xlu0 %v4109_v12, %s3934_s25 }
  0x36   :  { %152 = vrot.lane.b32.xlu1 %v4137_v16, %s3934_s25  ;;  %150 = vrot.lane.b32.xlu0 %v4118_v13, %s3934_s25 }
  0x3a   :  { %156 = vrot.lane.b32.xlu1 %v4149_v18, %s3934_s25  ;;  %154 = vrot.lane.b32.xlu0 %v4132_v15, %s3934_s25 }
  0x3e   :  { %160 = vrot.lane.b32.xlu1 %v64_v19, %s3934_s25  ;;  %158 = vrot.lane.b32.xlu0 %v63_v17, %s3934_s25 }
  0x74   :  { %v86_v20 = vpop.permute.xlu1 %85  ;;  %v82_v21 = vpop.permute.xlu0 %81 }
  0x75   :  { %v179_v32 = vsel %vm178_vm3, %v47_v31, %v82_v21  ;;  %v181_v40 = vsel %vm178_vm3, %v4045_v3, %v86_v20 }
  0x78   :  { %v88_v22 = vpop.permute.xlu1 %87  ;;  %v84_v23 = vpop.permute.xlu0 %83 }
  0x79   :  { %v180_v33 = vsel %vm178_vm3, %v4031_v1, %v84_v23  ;;  %v182_v41 = vsel %vm178_vm3, %v4026_v0, %v88_v22 }
  0x7c   :  { %v92_v24 = vpop.permute.xlu1 %91  ;;  %v90_v25 = vpop.permute.xlu0 %89 }
  0x7d   :  { %v184_v49 = vsel %vm178_vm3, %v4059_v5, %v92_v24  ;;  %v183_v50 = vsel %vm178_vm3, %v4040_v2, %v90_v25 }
  0x80   :  { %v96_v26 = vpop.permute.xlu1 %95  ;;  %v94_v27 = vpop.permute.xlu0 %93 }
  0x81   :  { %v186_v58 = vsel %vm178_vm3, %v4073_v7, %v96_v26  ;;  %v185_v59 = vsel %vm178_vm3, %v4054_v4, %v94_v27 }
  0x84   :  { %v133_v34 = vpop.permute.xlu1 %132  ;;  %v131_v35 = vpop.permute.xlu0 %130 }
  0x85   :  { %v197_v38 = vsel %vm195_vm4, %v180_v33, %v133_v34  ;;  %v196_v39 = vsel %vm195_vm4, %v179_v32, %v131_v35 }
  0x86   :  { %v237_v42 = vcombine.low %v196_v39, %v197_v38 }
  0x88   :  { %v137_v43 = vpop.permute.xlu1 %136  ;;  %v135_v44 = vpop.permute.xlu0 %134  ;;  %v245_v53 = vrot.slane %v237_v42, %v4186_v45 }
  0x89   :  { %v199_v46 = vsel %vm195_vm4, %v182_v41, %v137_v43  ;;  %v198_v47 = vsel %vm195_vm4, %v181_v40, %v135_v44 }
  0x8a   :  { %v238_v48 = vcombine.low %v198_v47, %v199_v46 }
  0x8c   :  { %v141_v51 = vpop.permute.xlu1 %140  ;;  %v139_v52 = vpop.permute.xlu0 %138  ;;  %v252_v54 = vrot.slane %v238_v48, %v4186_v45 }
  0x8d   :  { %v201_v55 = vsel %vm195_vm4, %v184_v49, %v141_v51  ;;  %v200_v56 = vsel %vm195_vm4, %v183_v50, %v139_v52 }
  0x8e   :  { %v253_v57 = vcombine.low %v245_v53, %v252_v54  ;;  %v254_v60 = vcombine.low %v200_v56, %v201_v55 }
  0x90   :  { %v145_v61 = vpop.permute.xlu1 %144  ;;  %v143_v62 = vpop.permute.xlu0 %142  ;;  %3462 = vmatprep.mubr.msk.f32.mxu0 %vm305_vm5, %v253_v57  ;;  %v262_v2 = vrot.slane %v254_v60, %v4186_v45 }
  0x91   :  { %v203_v63 = vsel %vm195_vm4, %v186_v58, %v145_v61  ;;  %v202_v0 = vsel %vm195_vm4, %v185_v59, %v143_v62  ;;  %v3937_v62 = vmov 0.0  }
  0x92   :  { %v255_v1 = vcombine.low %v202_v0, %v203_v63  ;;  %472 = vst.msk [vmem:[#allocation2 + $0x22] sm:$0x3] %vm469_vm7, %v3937_v62  ;;  %470 = vst.msk [vmem:[#allocation2] sm:$0x3] %vm469_vm7, %v3937_v62 }
  0x94   :  { %v269_v3 = vrot.slane %v255_v1, %v4186_v45  ;;  %v100_v5 = vpop.permute.xlu1 %99  ;;  %v98_v8 = vpop.permute.xlu0 %97 }
  0x95   :  { %v188_v21 = vsel %vm178_vm3, %v4100_v11, %v100_v5  ;;  %v187_v22 = vsel %vm178_vm3, %v4068_v6, %v98_v8 }
  0x96   :  { %v270_v7 = vcombine.low %v262_v2, %v269_v3 }
  0x98   :  { %v104_v9 = vpop.permute.xlu1 %103  ;;  %v102_v10 = vpop.permute.xlu0 %101  ;;  %3463 = vmatmul.mubr.msk.f32.vlgmr.msra.gmra.mrb[0].mxu0 %vm305_vm5, %v270_v7 }
  0x99   :  { %v190_v27 = vsel %vm178_vm3, %v4123_v14, %v104_v9  ;;  %v189_v28 = vsel %vm178_vm3, %v4109_v12, %v102_v10 }
  0x9c   :  { %v108_v4 = vpop.permute.xlu1 %107  ;;  %v106_v17 = vpop.permute.xlu0 %105 }
  0x9d   :  { %v192_v33 = vsel %vm178_vm3, %v4137_v16, %v108_v4  ;;  %v191_v34 = vsel %vm178_vm3, %v4118_v13, %v106_v17 }
  0xa0   :  { %v112_v19 = vpop.permute.xlu1 %111  ;;  %v110_v20 = vpop.permute.xlu0 %109 }
  0xa1   :  { %v194_v41 = vsel %vm178_vm3, %v4149_v18, %v112_v19  ;;  %v193_v16 = vsel %vm178_vm3, %v4132_v15, %v110_v20  ;;  %v3300_v15 = vld [vmem:[%s5041_s2] ss:$0 sm:$0xff] }
  0xa4   :  { %v149_v23 = vpop.permute.xlu1 %148  ;;  %v147_v24 = vpop.permute.xlu0 %146 }
  0xa5   :  { %v205_v25 = vsel %vm195_vm4, %v188_v21, %v149_v23  ;;  %v204_v26 = vsel %vm195_vm4, %v187_v22, %v147_v24 }
  0xa6   :  { %v271_v29 = vcombine.low %v204_v26, %v205_v25 }
  0xa8   :  { %v153_v30 = vpop.permute.xlu1 %152  ;;  %v151_v31 = vpop.permute.xlu0 %150  ;;  %v279_v35 = vrot.slane %v271_v29, %v4186_v45 }
  0xa9   :  { %v207_v11 = vsel %vm195_vm4, %v190_v27, %v153_v30  ;;  %v206_v32 = vsel %vm195_vm4, %v189_v28, %v151_v31 }
  0xaa   :  { %v272_v6 = vcombine.low %v206_v32, %v207_v11 }
  0xac   :  { %v286_v14 = vrot.slane %v272_v6, %v4186_v45  ;;  %v157_v36 = vpop.permute.xlu1 %156  ;;  %v155_v12 = vpop.permute.xlu0 %154 }
  0xad   :  { %v209_v38 = vsel %vm195_vm4, %v192_v33, %v157_v36  ;;  %v208_v39 = vsel %vm195_vm4, %v191_v34, %v155_v12  ;;  %v4257_v36 = vsub.s32 0, %v4177_v37 }
  0xae   :  { %v287_v40 = vcombine.low %v279_v35, %v286_v14  ;;  %v288_v42 = vcombine.low %v208_v39, %v209_v38  ;;  %v438_v14 = vld [vmem:[%s5042_s3] sm:$0x1]  ;;  %s3938_s3 = smov 64  }
  0xaf   :  { %v442_v39 = vld [vmem:[%s5043_s4] sm:$0x1]  ;;  %s3939_s4 = smov 32  }
  0xb0   :  { %v161_v43 = vpop.permute.xlu1 %160  ;;  %v159_v13 = vpop.permute.xlu0 %158  ;;  %3465 = vmatprep.mubr.msk.f32.mxu0 %vm305_vm5, %v287_v40  ;;  %v296_v48 = vrot.slane %v288_v42, %v4186_v45 }
  0xb1   :  { %v211_v44 = vsel %vm195_vm4, %v194_v41, %v161_v43  ;;  %v210_v46 = vsel %vm195_vm4, %v193_v16, %v159_v13 }
  0xb2   :  { %v289_v47 = vcombine.low %v210_v46, %v211_v44 }
  0xb4   :  { %v303_v49 = vrot.slane %v289_v47, %v4186_v45 }
  0xb6   :  { %v304_v50 = vcombine.low %v296_v48, %v303_v49 }
  0xb8   :  { %3466 = vmatmul.mubr.msk.f32.gmra.mrb[2].mxu0 %vm305_vm5, %v304_v50 }
 0x16b   :  { %v3464_v18 = vpop.f32.mrb[0].mxu0 }
 0x16c   :  { %v390_v51 = vadd.f32 %v3464_v18, %v3300_v15  ;;  %v384_v52 = vpop.f32.mrb[1].mxu0 }
 0x16d   :  { %v385_v53 = vadd.f32 %v3300_v15, %v384_v52 }
 0x16e   :  { %v405_v54 = vsel %vm403_vm6, %v390_v51, 0.0  ;;  %v418_v55 = vmul.f32 %v390_v51, %v390_v51 }
 0x16f   :  { %v404_v56 = vsel %vm403_vm6, %v385_v53, 0.0  ;;  %v417_v57 = vmul.f32 %v385_v53, %v385_v53 }
 0x170   :  { %v422_v58 = vsel %vm403_vm6, %v418_v55, 0.0  ;;  %v406_v59 = vadd.f32 %v405_v54, %v404_v56 }
 0x171   :  { %v421_v60 = vsel %vm403_vm6, %v417_v57, 0.0 }
 0x172   :  { %v423_v61 = vadd.f32 %v422_v58, %v421_v60 }
 0x18b   :  { %v3467_v63 = vpop.f32.mrb[2].mxu0 }
 0x18c   :  { %v400_v0 = vadd.f32 %v3467_v63, %v3300_v15  ;;  %v394_v1 = vpop.f32.mrb[3].mxu0 }
 0x18d   :  { %v395_v2 = vadd.f32 %v3300_v15, %v394_v1 }
 0x18e   :  { %v420_v3 = vmul.f32 %v400_v0, %v400_v0  ;;  %v409_v9 = vsel %vm403_vm6, %v400_v0, 0.0 }
 0x18f   :  { %v407_v5 = vsel %vm403_vm6, %v395_v2, 0.0  ;;  %v419_v8 = vmul.f32 %v395_v2, %v395_v2 }
 0x190   :  { %v408_v7 = vadd.f32 %v407_v5, %v406_v59  ;;  %v426_v19 = vsel %vm403_vm6, %v420_v3, 0.0 }
 0x191   :  { %v424_v10 = vsel %vm403_vm6, %v419_v8, 0.0 }
 0x192   :  { %v410_v4 = vadd.f32 %v409_v9, %v408_v7  ;;  %v425_v17 = vadd.f32 %v424_v10, %v423_v61 }
 0x194   :  { %v411_v20 = vrot.slane %v410_v4, 4  ;;  %v427_v21 = vadd.f32 %v426_v19, %v425_v17 }
 0x196   :  { %v412_v22 = vadd.f32 %v411_v20, %v410_v4  ;;  %v428_v23 = vrot.slane %v427_v21, 4 }
 0x198   :  { %v413_v24 = vrot.slane %v412_v22, 2  ;;  %v429_v25 = vadd.f32 %v428_v23, %v427_v21 }
 0x19a   :  { %v414_v26 = vadd.f32 %v413_v24, %v412_v22  ;;  %v430_v27 = vrot.slane %v429_v25, 2 }
 0x19c   :  { %v415_v28 = vrot.slane %v414_v26, 1  ;;  %v431_v29 = vadd.f32 %v430_v27, %v429_v25  ;;  %v742_v25 = vld [vmem:[%s5044_s5] sm:$0xff] }
 0x19e   :  { %v416_v30 = vadd.f32 %v415_v28, %v414_v26  ;;  %v432_v31 = vrot.slane %v431_v29, 1  ;;  %v743_v26 = vld [vmem:[%s5044_s5 + $0x8] sm:$0xff]  ;;  %v744_v28 = vld [vmem:[%s5044_s5 + $0x10] sm:$0xff] }
 0x19f   :  { %v3694_v27 = vpack.c.bf16 %v743_v26, %v742_v25 }
 0x1a0   :  { %v433_v11 = vadd.f32 %v432_v31, %v431_v29  ;;  %v434_v32 = vmul.f32 0.03125, %v416_v30  ;;  %v745_v29 = vld [vmem:[%s5044_s5 + $0x18] sm:$0xff] }
 0x1a1   :  { %3695 = vmatprep.subr.bf16.mxu1 %v3694_v27  ;;  %v3698_v30 = vpack.c.bf16 %v745_v29, %v744_v28 }
 0x1a2   :  { %v435_v6 = vmul.f32 0.03125, %v433_v11  ;;  %v436_v33 = vmul.f32 %v434_v32, %v434_v32  ;;  %3697 = vmatpush3.bf16.msra.mxu1 %v3694_v27  ;;  %v746_v11 = vld [vmem:[%s5044_s5 + $0x20] sm:$0xff] }
 0x1a3   :  { %3699 = vmatprep.subr.bf16.mxu1 %v3698_v30 }
 0x1a4   :  { %v437_v34 = vsub.f32 %v435_v6, %v436_v33 }
 0x1a6   :  { %v439_v35 = vadd.f32 1e-05, %v437_v34  ;;  %3701 = vmatpush3.bf16.msra.mxu1 %v3698_v30 }
 0x1a8   :  { %3832 = vrsqrt.f32 %v439_v35  ;;  %v748_v35 = vld [vmem:[%s5044_s5 + $0x30] sm:$0xff] }
 0x1b2   :  { %v3833_v12 = vpop.eup %3832 }
 0x1b3   :  { %v441_v38 = vmul.f32 %v3833_v12, %v438_v14  ;;  %v749_v14 = vld [vmem:[%s5044_s5 + $0x38] sm:$0xff] }
 0x1b4   :  { %v3706_v12 = vpack.c.bf16 %v749_v14, %v748_v35 }
 0x1b5   :  { %v443_v40 = vmul.f32 %v441_v38, %v434_v32  ;;  %v449_v41 = vrot.slane %v441_v38, %v4257_v36  ;;  %v747_v32 = vld [vmem:[%s5044_s5 + $0x28] sm:$0xff] }
 0x1b6   :  { %v3702_v6 = vpack.c.bf16 %v747_v32, %v746_v11 }
 0x1b7   :  { %v444_v16 = vsub.f32 %v442_v39, %v443_v40  ;;  %v451_v42 = vmul.f32 %v449_v41, %v385_v53  ;;  %v452_v43 = vmul.f32 %v449_v41, %v390_v51  ;;  %v453_v13 = vmul.f32 %v449_v41, %v395_v2  ;;  %v750_v39 = vld [vmem:[%s5044_s5 + $0x40] sm:$0xff]  ;;  %v751_v40 = vld [vmem:[%s5044_s5 + $0x48] sm:$0xff] }
 0x1b8   :  { %v454_v44 = vmul.f32 %v449_v41, %v400_v0  ;;  %3703 = vmatprep.subr.bf16.mxu1 %v3702_v6  ;;  %v3710_v41 = vpack.c.bf16 %v751_v40, %v750_v39 }
 0x1b9   :  { %v459_v46 = vrot.slane %v444_v16, %v4257_v36  ;;  %3705 = vmatpush3.bf16.msra.mxu1 %v3702_v6  ;;  %v752_v16 = vld [vmem:[%s5044_s5 + $0x50] sm:$0xff] }
 0x1ba   :  { %3707 = vmatprep.subr.bf16.mxu1 %v3706_v12 }
 0x1bb   :  { %v461_v47 = vadd.f32 %v459_v46, %v451_v42  ;;  %v462_v48 = vadd.f32 %v459_v46, %v452_v43  ;;  %v463_v37 = vadd.f32 %v459_v46, %v453_v13  ;;  %v464_v49 = vadd.f32 %v459_v46, %v454_v44  ;;  %v753_v42 = vld [vmem:[%s5044_s5 + $0x58] sm:$0xff] }
 0x1bc   :  { %v3714_v43 = vpack.c.bf16 %v753_v42, %v752_v16 }
 0x1bd   :  { %v465_v50 = vmax.f32 %v461_v47, 0.0  ;;  %v466_v15 = vmax.f32 %v462_v48, 0.0  ;;  %v467_v18 = vmax.f32 %v463_v37, 0.0  ;;  %v468_v52 = vmax.f32 %v464_v49, 0.0  ;;  %3709 = vmatpush3.bf16.msra.mxu1 %v3706_v12  ;;  %v595_v48 = vld [vmem:[#allocation2 + $0x22] sm:$0x3] }
 0x1be   :  { %3711 = vmatprep.subr.bf16.mxu1 %v3710_v41 }
 0x1bf   :  { %v477_v54 = vcombine.high %v465_v50, %v465_v50  ;;  %v484_v55 = vrot.slane %v465_v50, %v4186_v45  ;;  %v494_v56 = vcombine.high %v466_v15, %v466_v15  ;;  %v501_v57 = vrot.slane %v466_v15, %v4186_v45 }
 0x1c0   :  { %v511_v53 = vcombine.high %v467_v18, %v467_v18  ;;  %v518_v51 = vrot.slane %v467_v18, %v4186_v45  ;;  %v528_v58 = vcombine.high %v468_v52, %v468_v52  ;;  %v535_v59 = vrot.slane %v468_v52, %v4186_v45 }
 0x1c1   :  { %v491_v60 = vrot.slane %v477_v54, %v4186_v45  ;;  %v492_v61 = vcombine.high %v484_v55, %v484_v55  ;;  %v508_v63 = vrot.slane %v494_v56, %v4186_v45  ;;  %v509_v0 = vcombine.high %v501_v57, %v501_v57  ;;  %562 = vst.msk [vmem:[#allocation2 + $0x2] sm:$0x3] %vm469_vm7, %v484_v55 }
 0x1c2   :  { %566 = vst.msk [vmem:[#allocation2 + $0xa] sm:$0x3] %vm469_vm7, %v501_v57  ;;  %v525_v1 = vrot.slane %v511_v53, %v4186_v45  ;;  %v526_v2 = vcombine.high %v518_v51, %v518_v51  ;;  %v542_v3 = vrot.slane %v528_v58, %v4186_v45  ;;  %v543_v5 = vcombine.high %v535_v59, %v535_v59 }
 0x1c3   :  { %570 = vst.msk [vmem:[#allocation2 + $0x12] sm:$0x3] %vm469_vm7, %v518_v51  ;;  %574 = vst.msk [vmem:[#allocation2 + $0x1a] sm:$0x3] %vm469_vm7, %v535_v59  ;;  %v493_v8 = vcombine.high %v491_v60, %v491_v60  ;;  %v510_v7 = vcombine.high %v508_v63, %v508_v63  ;;  %3713 = vmatpush3.bf16.msra.mxu1 %v3710_v41 }
 0x1c4   :  { %563 = vst.msk [vmem:[#allocation2 + $0x4] sm:$0x3] %vm469_vm7, %v492_v61  ;;  %564 = vst.msk [vmem:[#allocation2 + $0x6] sm:$0x3] %vm469_vm7, %v491_v60  ;;  %v527_v9 = vcombine.high %v525_v1, %v525_v1  ;;  %v544_v10 = vcombine.high %v542_v3, %v542_v3  ;;  %3715 = vmatprep.subr.bf16.mxu1 %v3714_v43 }
 0x1c5   :  { %567 = vst.msk [vmem:[#allocation2 + $0xc] sm:$0x3] %vm469_vm7, %v509_v0  ;;  %568 = vst.msk [vmem:[#allocation2 + $0xe] sm:$0x3] %vm469_vm7, %v508_v63 }
 0x1c6   :  { %571 = vst.msk [vmem:[#allocation2 + $0x14] sm:$0x3] %vm469_vm7, %v526_v2  ;;  %572 = vst.msk [vmem:[#allocation2 + $0x16] sm:$0x3] %vm469_vm7, %v525_v1 }
 0x1c7   :  { %575 = vst.msk [vmem:[#allocation2 + $0x1c] sm:$0x3] %vm469_vm7, %v543_v5  ;;  %576 = vst.msk [vmem:[#allocation2 + $0x1e] sm:$0x3] %vm469_vm7, %v542_v3  ;;  %3717 = vmatpush3.bf16.msra.mxu1 %v3714_v43 }
 0x1c8   :  { %565 = vst.msk [vmem:[#allocation2 + $0x8] sm:$0x3] %vm469_vm7, %v493_v8  ;;  %569 = vst.msk [vmem:[#allocation2 + $0x10] sm:$0x3] %vm469_vm7, %v510_v7  ;;  %v4290_v17 = vld [vmem:[#allocation2 + $0x2] sm:$0x3] }
 0x1c9   :  { %573 = vst.msk [vmem:[#allocation2 + $0x18] sm:$0x3] %vm469_vm7, %v527_v9  ;;  %577 = vst.msk [vmem:[#allocation2 + $0x20] sm:$0x3] %vm469_vm7, %v544_v10  ;;  %v4288_v4 = vld [vmem:[#allocation2 + $0xa] sm:$0x3]  ;;  %612 = vrot.lane.b32.xlu0 %v4290_v17, %s3939_s4 }
 0x1ca   :  { %667 = vrot.lane.b32.xlu1 %v4288_v4, %s3938_s3  ;;  %v4296_v19 = vld [vmem:[#allocation2 + $0x12] sm:$0x3]  ;;  %v4302_v20 = vld [vmem:[#allocation2 + $0x1a] sm:$0x3]  ;;  %v578_v8 = vld [vmem:[#allocation2] sm:$0x3] }
 0x1cb   :  { %v4308_v21 = vld [vmem:[#allocation2 + $0x4] sm:$0x3]  ;;  %v4316_v23 = vld [vmem:[#allocation2 + $0x6] sm:$0x3] }
 0x1cc   :  { %v4314_v22 = vld [vmem:[#allocation2 + $0xc] sm:$0x3]  ;;  %v4322_v24 = vld [vmem:[#allocation2 + $0xe] sm:$0x3] }
 0x1cd   :  { %620 = vrot.lane.b32.xlu0 %v4288_v4, %s3939_s4  ;;  %v4344_v31 = vld [vmem:[#allocation2 + $0x14] sm:$0x3]  ;;  %v4358_v34 = vld [vmem:[#allocation2 + $0x16] sm:$0x3] }
 0x1ce   :  { %675 = vrot.lane.b32.xlu1 %v4296_v19, %s3938_s3  ;;  %v4356_v33 = vld [vmem:[#allocation2 + $0x1c] sm:$0x3]  ;;  %v4370_v38 = vld [vmem:[#allocation2 + $0x1e] sm:$0x3] }
 0x1cf   :  { %v582_v13 = vld [vmem:[#allocation2 + $0x8] sm:$0x3]  ;;  %v586_v44 = vld [vmem:[#allocation2 + $0x10] sm:$0x3] }
 0x1d0   :  { %v4397_v46 = vld [vmem:[#allocation2 + $0x18] sm:$0x3]  ;;  %v594_v47 = vld [vmem:[#allocation2 + $0x20] sm:$0x3] }
 0x1d1   :  { %628 = vrot.lane.b32.xlu0 %v4296_v19, %s3939_s4 }
 0x1d2   :  { %683 = vrot.lane.b32.xlu1 %v4302_v20, %s3938_s3 }
 0x1d5   :  { %636 = vrot.lane.b32.xlu0 %v4302_v20, %s3939_s4 }
 0x1d6   :  { %614 = vrot.lane.b32.xlu1 %v4308_v21, %s3939_s4 }
 0x1d9   :  { %616 = vrot.lane.b32.xlu0 %v4316_v23, %s3939_s4 }
 0x1da   :  { %622 = vrot.lane.b32.xlu1 %v4314_v22, %s3939_s4 }
 0x1dd   :  { %624 = vrot.lane.b32.xlu0 %v4322_v24, %s3939_s4 }
 0x1de   :  { %663 = vrot.lane.b32.xlu1 %v4316_v23, %s3938_s3 }
 0x1e1   :  { %661 = vrot.lane.b32.xlu0 %v4308_v21, %s3938_s3 }
 0x1e2   :  { %671 = vrot.lane.b32.xlu1 %v4322_v24, %s3938_s3 }
 0x1e5   :  { %669 = vrot.lane.b32.xlu0 %v4314_v22, %s3938_s3 }
 0x1e6   :  { %630 = vrot.lane.b32.xlu1 %v4344_v31, %s3939_s4 }
 0x1e9   :  { %632 = vrot.lane.b32.xlu0 %v4358_v34, %s3939_s4 }
 0x1ea   :  { %638 = vrot.lane.b32.xlu1 %v4356_v33, %s3939_s4 }
 0x1ed   :  { %640 = vrot.lane.b32.xlu0 %v4370_v38, %s3939_s4 }
 0x1ee   :  { %679 = vrot.lane.b32.xlu1 %v4358_v34, %s3938_s3 }
 0x1f1   :  { %677 = vrot.lane.b32.xlu0 %v4344_v31, %s3938_s3 }
 0x1f2   :  { %687 = vrot.lane.b32.xlu1 %v4370_v38, %s3938_s3 }
 0x1f5   :  { %685 = vrot.lane.b32.xlu0 %v4356_v33, %s3938_s3 }
 0x1f6   :  { %618 = vrot.lane.b32.xlu1 %v582_v13, %s3939_s4 }
 0x1f9   :  { %665 = vrot.lane.b32.xlu0 %v582_v13, %s3938_s3 }
 0x1fa   :  { %626 = vrot.lane.b32.xlu1 %v586_v44, %s3939_s4 }
 0x1fd   :  { %673 = vrot.lane.b32.xlu0 %v586_v44, %s3938_s3 }
 0x1fe   :  { %634 = vrot.lane.b32.xlu1 %v4397_v46, %s3939_s4 }
 0x201   :  { %681 = vrot.lane.b32.xlu0 %v4397_v46, %s3938_s3 }
 0x202   :  { %642 = vrot.lane.b32.xlu1 %v594_v47, %s3939_s4 }
 0x205   :  { %689 = vrot.lane.b32.xlu0 %v594_v47, %s3938_s3 }
 0x206   :  { %691 = vrot.lane.b32.xlu1 %v595_v48, %s3938_s3 }
 0x23b   :  { %v613_v49 = vpop.permute.xlu0 %612 }
 0x23c   :  { %v668_v37 = vpop.permute.xlu1 %667  ;;  %v709_v7 = vsel %vm403_vm6, %v578_v8, %v613_v49 }
 0x23f   :  { %v621_v15 = vpop.permute.xlu0 %620 }
 0x240   :  { %v676_v50 = vpop.permute.xlu1 %675  ;;  %v713_v29 = vsel %vm403_vm6, %v582_v13, %v621_v15 }
 0x243   :  { %v629_v52 = vpop.permute.xlu0 %628 }
 0x244   :  { %v4407_v18 = vpop.permute.xlu1 %683  ;;  %v717_v40 = vsel %vm403_vm6, %v586_v44, %v629_v52 }
 0x247   :  { %v637_v54 = vpop.permute.xlu0 %636 }
 0x248   :  { %v615_v55 = vpop.permute.xlu1 %614  ;;  %v721_v15 = vsel %vm403_vm6, %v4397_v46, %v637_v54 }
 0x249   :  { %v710_v26 = vsel %vm403_vm6, %v4290_v17, %v615_v55 }
 0x24b   :  { %v617_v57 = vpop.permute.xlu0 %616 }
 0x24c   :  { %v623_v56 = vpop.permute.xlu1 %622  ;;  %v711_v30 = vsel %vm403_vm6, %v4308_v21, %v617_v57 }
 0x24d   :  { %v714_v17 = vsel %vm403_vm6, %v4288_v4, %v623_v56 }
 0x24f   :  { %v625_v51 = vpop.permute.xlu0 %624 }
 0x250   :  { %v664_v53 = vpop.permute.xlu1 %663  ;;  %v715_v41 = vsel %vm403_vm6, %v4314_v22, %v625_v51 }
 0x251   :  { %v727_v28 = vsel %vm725_vm8, %v710_v26, %v664_v53  ;;  %v1110_v26 = vld [vmem:[%s5045_s9 + $0x10] sm:$0xff] }
 0x253   :  { %v662_v59 = vpop.permute.xlu0 %661 }
 0x254   :  { %v672_v58 = vpop.permute.xlu1 %671  ;;  %v726_v25 = vsel %vm725_vm8, %v709_v7, %v662_v59 }
 0x255   :  { %v777_v11 = vcombine.low %v726_v25, %v727_v28  ;;  %v731_v21 = vsel %vm725_vm8, %v714_v17, %v672_v58 }
 0x257   :  { %v670_v61 = vpop.permute.xlu0 %669  ;;  %v785_v13 = vrot.slane %v777_v11, %v4186_v45 }
 0x258   :  { %v631_v60 = vpop.permute.xlu1 %630  ;;  %v730_v35 = vsel %vm725_vm8, %v713_v29, %v670_v61  ;;  %v1300_v29 = vld [vmem:[%s5046_s11] sm:$0xff] }
 0x259   :  { %v794_v16 = vcombine.low %v730_v35, %v731_v21  ;;  %v718_v44 = vsel %vm403_vm6, %v4296_v19, %v631_v60  ;;  %v1303_v35 = vld [vmem:[%s5046_s11 + $0x18] sm:$0xff] }
 0x25b   :  { %v633_v0 = vpop.permute.xlu0 %632  ;;  %v802_v55 = vrot.slane %v794_v16, %v4186_v45 }
 0x25c   :  { %v639_v63 = vpop.permute.xlu1 %638  ;;  %v719_v56 = vsel %vm403_vm6, %v4344_v31, %v633_v0 }
 0x25d   :  { %v722_v54 = vsel %vm403_vm6, %v4302_v20, %v639_v63 }
 0x25f   :  { %v641_v2 = vpop.permute.xlu0 %640 }
 0x260   :  { %v680_v1 = vpop.permute.xlu1 %679  ;;  %v723_v31 = vsel %vm403_vm6, %v4356_v33, %v641_v2 }
 0x261   :  { %v735_v52 = vsel %vm725_vm8, %v718_v44, %v680_v1 }
 0x263   :  { %v678_v5 = vpop.permute.xlu0 %677 }
 0x264   :  { %v688_v3 = vpop.permute.xlu1 %687  ;;  %v734_v4 = vsel %vm725_vm8, %v717_v40, %v678_v5 }
 0x265   :  { %v739_v60 = vsel %vm725_vm8, %v722_v54, %v688_v3 }
 0x267   :  { %v686_v9 = vpop.permute.xlu0 %685 }
 0x268   :  { %v619_v10 = vpop.permute.xlu1 %618 }
 0x269   :  { %v712_v27 = vsel %vm403_vm6, %v4316_v23, %v619_v10  ;;  %v1109_v10 = vld [vmem:[%s5045_s9 + $0x8] sm:$0xff] }
 0x26a   :  { %v729_v12 = vsel %vm725_vm8, %v712_v27, %v668_v37  ;;  %v1111_v27 = vld [vmem:[%s5045_s9 + $0x18] sm:$0xff] }
 0x26b   :  { %v666_v32 = vpop.permute.xlu0 %665  ;;  %v3722_v28 = vpack.c.bf16 %v1111_v27, %v1110_v26 }
 0x26c   :  { %v627_v6 = vpop.permute.xlu1 %626  ;;  %v728_v14 = vsel %vm725_vm8, %v711_v30, %v666_v32  ;;  %v1301_v30 = vld [vmem:[%s5046_s11 + $0x8] sm:$0xff]  ;;  %v3940_v32 = vmov 0.0|0.0  }
 0x26d   :  { %v778_v23 = vcombine.low %v728_v14, %v729_v12  ;;  %v716_v39 = vsel %vm403_vm6, %v4322_v24, %v627_v6  ;;  %v4485_v11 = vpack.c.bf16 %v1301_v30, %v1300_v29  ;;  %3738 = vmatprep.subr.bf16.mxu1 %v3940_v32  ;;  %v1302_v6 = vld [vmem:[%s5046_s11 + $0x10] sm:$0xff]  ;;  %v3306_v12 = vld [vmem:[%s5047_s6] ss:$0 sm:$0xff] }
 0x26e   :  { %v733_v24 = vsel %vm725_vm8, %v716_v39, %v676_v50  ;;  %v811_v50 = vcombine.low %v734_v4, %v735_v52  ;;  %v4497_v14 = vpack.c.bf16 %v1303_v35, %v1302_v6 }
 0x26f   :  { %v674_v42 = vpop.permute.xlu0 %673  ;;  %v792_v47 = vrot.slane %v778_v23, %v4186_v45 }
 0x270   :  { %v635_v43 = vpop.permute.xlu1 %634  ;;  %v732_v48 = vsel %vm725_vm8, %v715_v41, %v674_v42  ;;  %v819_v61 = vrot.slane %v811_v50, %v4186_v45 }
 0x271   :  { %v795_v37 = vcombine.low %v732_v48, %v733_v24  ;;  %v720_v22 = vsel %vm403_vm6, %v4358_v34, %v635_v43  ;;  %v793_v49 = vcombine.low %v785_v13, %v792_v47  ;;  %v738_v34 = vsel %vm725_vm8, %v721_v15, %v686_v9 }
 0x272   :  { %v737_v46 = vsel %vm725_vm8, %v720_v22, %v4407_v18  ;;  %v828_v0 = vcombine.low %v738_v34, %v739_v60 }
 0x273   :  { %v809_v57 = vrot.slane %v795_v37, %v4186_v45  ;;  %v682_v53 = vpop.permute.xlu0 %681  ;;  %3492 = vmatprep.mubr.msk.f32.mxu1 %vm845_vm9, %v793_v49 }
 0x274   :  { %v643_v19 = vpop.permute.xlu1 %642  ;;  %v736_v51 = vsel %vm725_vm8, %v719_v56, %v682_v53  ;;  %v836_v2 = vrot.slane %v828_v0, %v4186_v45 }
 0x275   :  { %v810_v58 = vcombine.low %v802_v55, %v809_v57  ;;  %v812_v59 = vcombine.low %v736_v51, %v737_v46  ;;  %v724_v5 = vsel %vm403_vm6, %v4370_v38, %v643_v19  ;;  %v1108_v38 = vld [vmem:[%s5045_s9] sm:$0xff] }
 0x276   :  { %v3718_v25 = vpack.c.bf16 %v1109_v10, %v1108_v38 }
 0x277   :  { %v826_v1 = vrot.slane %v812_v59, %v4186_v45  ;;  %v690_v8 = vpop.permute.xlu0 %689  ;;  %3493 = vmatmul.mubr.msk.f32.vlgmr.msra.gmra.mrb[0].mxu1 %vm845_vm9, %v810_v58 }
 0x278   :  { %v692_v18 = vpop.permute.xlu1 %691  ;;  %v740_v20 = vsel %vm725_vm8, %v723_v31, %v690_v8  ;;  %3719 = vmatprep.subr.bf16.mxu0 %v3718_v25  ;;  %3740 = vmatpush3.bf16.msra.mxu1 %v4485_v11 }
 0x279   :  { %v741_v63 = vsel %vm725_vm8, %v724_v5, %v692_v18  ;;  %v827_v7 = vcombine.low %v819_v61, %v826_v1  ;;  %3721 = vmatpush3.bf16.msra.mxu0 %v3718_v25  ;;  %3741 = vmatprep.subr.bf16.mxu1 %v3940_v32 }
 0x27a   :  { %v829_v33 = vcombine.low %v740_v20, %v741_v63  ;;  %3723 = vmatprep.subr.bf16.mxu0 %v3722_v28 }
 0x27b   :  { %3495 = vmatprep.mubr.msk.f32.mxu1 %vm845_vm9, %v827_v7 }
 0x27c   :  { %v843_v3 = vrot.slane %v829_v33, %v4186_v45  ;;  %3743 = vmatpush3.bf16.msra.mxu1 %v4497_v14  ;;  %v973_v33 = vld [vmem:[%s5048_s7] sm:$0x1] }
 0x27d   :  { %3725 = vmatpush3.bf16.msra.mxu0 %v3722_v28  ;;  %3750 = vmatprep.subr.bf16.mxu1 %v3940_v32 }
 0x27e   :  { %v844_v9 = vcombine.low %v836_v2, %v843_v3  ;;  %3726 = vmatprep.subr.bf16.mxu0 %v3940_v32 }
 0x280   :  { %3496 = vmatmul.mubr.msk.f32.gmra.mrb[2].mxu1 %vm845_vm9, %v844_v9  ;;  %v977_v9 = vld [vmem:[%s5049_s8] sm:$0x1] }
 0x281   :  { %3542 = vmatprep.mubr.msk.f32.mxu1 %vm3941_vm10, %v3937_v62 }
 0x34a   :  { %v3494_v17 = vpop.f32.mrb[0].mxu1 }
 0x34b   :  { %v926_v23 = vadd.f32 %v3494_v17, %v3306_v12  ;;  %v920_v39 = vpop.f32.mrb[1].mxu1 }
 0x34c   :  { %v921_v40 = vadd.f32 %v3306_v12, %v920_v39 }
 0x34d   :  { %v940_v21 = vsel %vm403_vm6, %v926_v23, 0.0  ;;  %v953_v41 = vmul.f32 %v926_v23, %v926_v23 }
 0x34e   :  { %v939_v16 = vsel %vm403_vm6, %v921_v40, 0.0  ;;  %v952_v42 = vmul.f32 %v921_v40, %v921_v40 }
 0x34f   :  { %v957_v43 = vsel %vm403_vm6, %v953_v41, 0.0  ;;  %v941_v13 = vadd.f32 %v940_v21, %v939_v16 }
 0x350   :  { %v956_v47 = vsel %vm403_vm6, %v952_v42, 0.0 }
 0x351   :  { %v958_v4 = vadd.f32 %v957_v43, %v956_v47 }
 0x353   :  { %v3497_v48 = vpop.f32.mrb[2].mxu1 }
 0x354   :  { %v936_v24 = vadd.f32 %v3497_v48, %v3306_v12  ;;  %v930_v44 = vpop.f32.mrb[3].mxu1 }
 0x355   :  { %v931_v37 = vadd.f32 %v3306_v12, %v930_v44 }
 0x356   :  { %v955_v22 = vmul.f32 %v936_v24, %v936_v24  ;;  %v944_v55 = vsel %vm403_vm6, %v936_v24, 0.0 }
 0x357   :  { %v942_v49 = vsel %vm403_vm6, %v931_v37, 0.0  ;;  %v954_v15 = vmul.f32 %v931_v37, %v931_v37 }
 0x358   :  { %v943_v52 = vadd.f32 %v942_v49, %v941_v13  ;;  %v961_v53 = vsel %vm403_vm6, %v955_v22, 0.0 }
 0x359   :  { %v959_v56 = vsel %vm403_vm6, %v954_v15, 0.0 }
 0x35a   :  { %v945_v50 = vadd.f32 %v944_v55, %v943_v52  ;;  %v960_v57 = vadd.f32 %v959_v56, %v958_v4 }
 0x35c   :  { %v946_v19 = vrot.slane %v945_v50, 4  ;;  %v962_v34 = vadd.f32 %v961_v53, %v960_v57  ;;  %v3311_v53 = vld [vmem:[%s5051_s10] ss:$0 sm:$0xff]  ;;  %s3942_s10 = smov 96  }
 0x35e   :  { %v947_v51 = vadd.f32 %v946_v19, %v945_v50  ;;  %v963_v46 = vrot.slane %v962_v34, 4 }
 0x360   :  { %v948_v54 = vrot.slane %v947_v51, 2  ;;  %v964_v58 = vadd.f32 %v963_v46, %v962_v34 }
 0x362   :  { %v949_v59 = vadd.f32 %v948_v54, %v947_v51  ;;  %v965_v31 = vrot.slane %v964_v58, 2 }
 0x364   :  { %v950_v60 = vrot.slane %v949_v59, 1  ;;  %v966_v61 = vadd.f32 %v965_v31, %v964_v58  ;;  %v4623_v31 = vld [vmem:[%s5052_s12] ss:$0 sm:$0xff] }
 0x366   :  { %v951_v0 = vadd.f32 %v950_v60, %v949_v59  ;;  %v967_v1 = vrot.slane %v966_v61, 1 }
 0x368   :  { %v968_v5 = vadd.f32 %v967_v1, %v966_v61  ;;  %v969_v8 = vmul.f32 0.03125, %v951_v0 }
 0x36a   :  { %v970_v18 = vmul.f32 0.03125, %v968_v5  ;;  %v971_v20 = vmul.f32 %v969_v8, %v969_v8 }
 0x36c   :  { %v972_v63 = vsub.f32 %v970_v18, %v971_v20 }
 0x36e   :  { %v974_v7 = vadd.f32 1e-05, %v972_v63 }
 0x370   :  { %3834 = vrsqrt.f32 %v974_v7 }
 0x37a   :  { %v3835_v2 = vpop.eup %3834 }
 0x37b   :  { %v976_v3 = vmul.f32 %v3835_v2, %v973_v33 }
 0x37d   :  { %v978_v38 = vmul.f32 %v976_v3, %v969_v8  ;;  %v984_v10 = vrot.slane %v976_v3, %v4257_v36 }
 0x37f   :  { %v979_v25 = vsub.f32 %v977_v9, %v978_v38  ;;  %v988_v26 = vmul.f32 %v984_v10, %v931_v37  ;;  %v986_v27 = vmul.f32 %v984_v10, %v921_v40  ;;  %v987_v28 = vmul.f32 %v984_v10, %v926_v23 }
 0x380   :  { %v989_v29 = vmul.f32 %v984_v10, %v936_v24 }
 0x381   :  { %v994_v30 = vrot.slane %v979_v25, %v4257_v36 }
 0x383   :  { %v998_v6 = vadd.f32 %v994_v30, %v988_v26  ;;  %v996_v35 = vadd.f32 %v994_v30, %v986_v27  ;;  %v997_v12 = vadd.f32 %v994_v30, %v987_v28  ;;  %v999_v17 = vadd.f32 %v994_v30, %v989_v29 }
 0x385   :  { %v1000_v39 = vmax.f32 %v996_v35, 0.0  ;;  %v1001_v21 = vmax.f32 %v997_v12, 0.0  ;;  %v1002_v41 = vmax.f32 %v998_v6, 0.0  ;;  %v1003_v16 = vmax.f32 %v999_v17, 0.0 }
 0x387   :  { %v1008_v42 = vcombine.high %v1000_v39, %v1000_v39  ;;  %v1015_v43 = vrot.slane %v1000_v39, %v4186_v45  ;;  %3506 = vmatprep.mubr.msk.f32.mxu0 %vm403_vm6, %v1000_v39  ;;  %v1025_v13 = vcombine.high %v1001_v21, %v1001_v21  ;;  %v1032_v40 = vrot.slane %v1001_v21, %v4186_v45 }
 0x388   :  { %3507 = vmatmul.mubr.msk.f32.vlgmr.msra.gmra.mrb[4].mxu0 %vm403_vm6, %v1001_v21  ;;  %v1042_v23 = vcombine.high %v1002_v41, %v1002_v41  ;;  %v1049_v36 = vrot.slane %v1002_v41, %v4186_v45  ;;  %v1059_v47 = vcombine.high %v1003_v16, %v1003_v16  ;;  %v1066_v4 = vrot.slane %v1003_v16, %v4186_v45 }
 0x389   :  { %v1022_v48 = vrot.slane %v1008_v42, %v4186_v45  ;;  %v1023_v24 = vcombine.high %v1015_v43, %v1015_v43  ;;  %1092 = vst.msk [vmem:[%s5050_s13] sm:$0x3] %vm469_vm7, %v1015_v43  ;;  %v1039_v44 = vrot.slane %v1025_v13, %v4186_v45  ;;  %v1040_v37 = vcombine.high %v1032_v40, %v1032_v40 }
 0x38a   :  { %1096 = vst.msk [vmem:[%s5050_s13 + $0x8] sm:$0x3] %vm469_vm7, %v1032_v40  ;;  %3728 = vmatpush3.bf16.msra.mxu0 %v4485_v11  ;;  %v1056_v22 = vrot.slane %v1042_v23, %v4186_v45  ;;  %v1057_v49 = vcombine.high %v1049_v36, %v1049_v36  ;;  %1100 = vst.msk [vmem:[%s5050_s13 + $0x10] sm:$0x3] %vm469_vm7, %v1049_v36  ;;  %3509 = vmatprep.mubr.msk.f32.mxu0 %vm403_vm6, %v1002_v41 }
 0x38b   :  { %3729 = vmatprep.subr.bf16.mxu0 %v3940_v32  ;;  %v1073_v15 = vrot.slane %v1059_v47, %v4186_v45  ;;  %1104 = vst.msk [vmem:[%s5050_s13 + $0x18] sm:$0x3] %vm469_vm7, %v1066_v4  ;;  %v1024_v52 = vcombine.high %v1022_v48, %v1022_v48  ;;  %1093 = vst.msk [vmem:[%s5050_s13 + $0x2] sm:$0x3] %vm469_vm7, %v1023_v24  ;;  %v1041_v55 = vcombine.high %v1039_v44, %v1039_v44 }
 0x38c   :  { %1094 = vst.msk [vmem:[%s5050_s13 + $0x4] sm:$0x3] %vm469_vm7, %v1022_v48  ;;  %1097 = vst.msk [vmem:[%s5050_s13 + $0xa] sm:$0x3] %vm469_vm7, %v1040_v37  ;;  %v1074_v56 = vcombine.high %v1066_v4, %v1066_v4  ;;  %v1058_v50 = vcombine.high %v1056_v22, %v1056_v22  ;;  %3510 = vmatmul.mubr.msk.f32.gmra.mrb[6].mxu0 %vm403_vm6, %v1003_v16 }
 0x38d   :  { %1098 = vst.msk [vmem:[%s5050_s13 + $0xc] sm:$0x3] %vm469_vm7, %v1039_v44  ;;  %1101 = vst.msk [vmem:[%s5050_s13 + $0x12] sm:$0x3] %vm469_vm7, %v1057_v49  ;;  %v1075_v57 = vcombine.high %v1073_v15, %v1073_v15  ;;  %3520 = vmatprep.mubr.msk.f32.mxu0 %vm3941_vm10, %v3937_v62 }
 0x38e   :  { %1102 = vst.msk [vmem:[%s5050_s13 + $0x14] sm:$0x3] %vm469_vm7, %v1056_v22  ;;  %1106 = vst.msk [vmem:[%s5050_s13 + $0x1c] sm:$0x3] %vm469_vm7, %v1073_v15  ;;  %3731 = vmatpush3.bf16.msra.mxu0 %v4497_v14 }
 0x38f   :  { %1095 = vst.msk [vmem:[%s5050_s13 + $0x6] sm:$0x3] %vm469_vm7, %v1024_v52  ;;  %1099 = vst.msk [vmem:[%s5050_s13 + $0xe] sm:$0x3] %vm469_vm7, %v1041_v55  ;;  %3732 = vmatprep.subr.bf16.mxu0 %v3940_v32 }
 0x390   :  { %1105 = vst.msk [vmem:[%s5050_s13 + $0x1a] sm:$0x3] %vm469_vm7, %v1074_v56  ;;  %1103 = vst.msk [vmem:[%s5050_s13 + $0x16] sm:$0x3] %vm469_vm7, %v1058_v50 }
 0x391   :  { %1107 = vst.msk [vmem:[%s5050_s13 + $0x1e] sm:$0x3] %vm469_vm7, %v1075_v57  ;;  %3521 = vmatmul.mubr.f32.vlgmr.msra.gmra.mrb[8].mxu0 %v3937_v62 }
 0x392   :  { %3734 = vmatpush3.bf16.msra.mxu0 %v4485_v11  ;;  %3531 = vmatprep.mubr.msk.f32.mxu0 %vm3941_vm10, %v3937_v62 }
 0x393   :  { %3735 = vmatprep.subr.bf16.mxu0 %v3940_v32 }
 0x396   :  { %3737 = vmatpush3.bf16.msra.mxu0 %v4497_v14 }
 0x397   :  { %3744 = vmatprep.subr.bf16.mxu0 %v3940_v32 }
 0x45b   :  { %v3508_v19 = vpop.f32.mrb[4].mxu0 }
 0x45c   :  { %v4614_v34 = vadd.f32 %v3508_v19, %v3311_v53  ;;  %v1193_v51 = vpop.f32.mrb[5].mxu0 }
 0x45d   :  { %v4628_v5 = vadd.f32 %v3311_v53, %v1193_v51 }
 0x45f   :  { %v3511_v46 = vpop.f32.mrb[6].mxu0  ;;  %v1223_v8 = vrot.slane %v4628_v5, %v4186_v45  ;;  %v1216_v57 = vcombine.high %v4628_v5, %v4628_v5 }
 0x460   :  { %v4616_v54 = vadd.f32 %v3511_v46, %v3311_v53  ;;  %v1203_v58 = vpop.f32.mrb[7].mxu0 }
 0x461   :  { %v4618_v59 = vadd.f32 %v3311_v53, %v1203_v58  ;;  %v1231_v21 = vcombine.high %v1223_v8, %v1223_v8  ;;  %v1230_v53 = vrot.slane %v1216_v57, %v4186_v45 }
 0x464   :  { %v1380_v60 = vpop.f32.mrb[8].mxu0 }
 0x465   :  { %v1381_v61 = vadd.f32 %v4623_v31, %v1380_v60  ;;  %v3522_v0 = vpop.f32.mrb[9].mxu0 }
 0x467   :  { %v1398_v1 = vrot.slane %v1381_v61, %v4186_v45  ;;  %v1384_v18 = vadd.f32 %v1381_v61, %v1223_v8 }
 0x469   :  { %1399 = vrot.lane.b32.xlu0 %v1398_v1, %s3938_s3  ;;  %v3317_v20 = vmul.f32 -1.442695, %v1384_v18 }
 0x46b   :  { %3836 = vpow2.f32 %v3317_v20 }
 0x475   :  { %v3837_v63 = vpop.eup %3836 }
 0x476   :  { %v1388_v7 = vadd.f32 1.0, %v3837_v63 }
 0x478   :  { %3838 = vrcp.f32 %v1388_v7 }
 0x482   :  { %v3839_v33 = vpop.eup %3838 }
 0x483   :  { %v1409_v25 = vsub.f32 1.0, %v3839_v33  ;;  %v1415_v27 = vmul.f32 0.0, %v3839_v33 }
 0x4db   :  { %v1400_v2 = vpop.permute.xlu0 %1399 }
 0x4dc   :  { %v1402_v3 = vmul.f32 %v3839_v33, %v1400_v2 }
 0x4de   :  { %1404 = vrot.lane.b32.xlu1 %v1402_v3, %s3938_s3 }
 0x550   :  { %v1405_v9 = vpop.permute.xlu1 %1404 }
 0x551   :  { %v1407_v38 = vadd.f32 %v1405_v9, %v1223_v8 }
 0x553   :  { %3840 = vtanh.f32 %v1407_v38 }
 0x55d   :  { %v3841_v10 = vpop.eup %3840 }
 0x55e   :  { %1411 = vrot.lane.b32.xlu0 %v3841_v10, %s3942_s10 }
 0x5d0   :  { %v1412_v26 = vpop.permute.xlu0 %1411 }
 0x5d1   :  { %v1414_v28 = vmul.f32 %v1412_v26, %v1409_v25  ;;  %v1232_v26 = vcombine.high %v1230_v53, %v1230_v53 }
 0x5d3   :  { %v4634_v29 = vadd.f32 %v1415_v27, %v1414_v28 }
 0x5d5   :  { %v1424_v30 = vrot.slane %v4634_v29, %v4186_v45 }
 0x5d7   :  { %1425 = vrot.lane.b32.xlu1 %v1424_v30, %s3942_s10 }
 0x649   :  { %v1426_v6 = vpop.permute.xlu1 %1425 }
 0x64a   :  { %3176 = vst.msk [vmem:[%s5053_s14] sm:$0x3] %vm469_vm7, %v1426_v6  ;;  %3532 = vmatmul.mubr.msk.f32.vlgmr.msra.gmra.mrb[10].mxu0 %vm403_vm6, %v1426_v6 }
 0x64b   :  { %3746 = vmatpush3.bf16.msra.mxu0 %v4485_v11  ;;  %3553 = vmatprep.mubr.msk.f32.mxu0 %vm3941_vm10, %v3937_v62 }
 0x64c   :  { %3747 = vmatprep.subr.bf16.mxu0 %v3940_v32 }
 0x64f   :  { %3749 = vmatpush3.bf16.msra.mxu0 %v4497_v14 }
 0x650   :  { %3756 = vmatprep.subr.bf16.mxu0 %v3940_v32 }
 0x71d   :  { %v1495_v35 = vpop.f32.mrb[10].mxu0 }
 0x71e   :  { %v1496_v12 = vadd.f32 %v4623_v31, %v1495_v35  ;;  %v3533_v17 = vpop.f32.mrb[11].mxu0 }
 0x720   :  { %v1513_v39 = vrot.slane %v1496_v12, %v4186_v45  ;;  %v1499_v41 = vadd.f32 %v1496_v12, %v1231_v21 }
 0x722   :  { %1514 = vrot.lane.b32.xlu0 %v1513_v39, %s3938_s3  ;;  %v3319_v16 = vmul.f32 -1.442695, %v1499_v41 }
 0x724   :  { %3842 = vpow2.f32 %v3319_v16 }
 0x72e   :  { %v3843_v42 = vpop.eup %3842 }
 0x72f   :  { %v1503_v43 = vadd.f32 1.0, %v3843_v42 }
 0x731   :  { %3844 = vrcp.f32 %v1503_v43 }
 0x73b   :  { %v3845_v13 = vpop.eup %3844 }
 0x73c   :  { %v1524_v48 = vsub.f32 1.0, %v3845_v13  ;;  %v1530_v44 = vmul.f32 %v3845_v13, %v4634_v29 }
 0x794   :  { %v1515_v40 = vpop.permute.xlu0 %1514 }
 0x795   :  { %v1517_v23 = vmul.f32 %v3845_v13, %v1515_v40 }
 0x797   :  { %1519 = vrot.lane.b32.xlu1 %v1517_v23, %s3938_s3 }
 0x809   :  { %v1520_v36 = vpop.permute.xlu1 %1519 }
 0x80a   :  { %v1522_v47 = vadd.f32 %v1520_v36, %v1231_v21 }
 0x80c   :  { %3846 = vtanh.f32 %v1522_v47 }
 0x816   :  { %v3847_v4 = vpop.eup %3846 }
 0x817   :  { %1526 = vrot.lane.b32.xlu0 %v3847_v4, %s3942_s10 }
 0x889   :  { %v1527_v24 = vpop.permute.xlu0 %1526 }
 0x88a   :  { %v1529_v37 = vmul.f32 %v1527_v24, %v1524_v48 }
 0x88c   :  { %v4656_v22 = vadd.f32 %v1530_v44, %v1529_v37  ;;  %v1240_v44 = vrot.slane %v4614_v34, %v4186_v45 }
 0x88e   :  { %v1540_v49 = vrot.slane %v4656_v22, %v4186_v45 }
 0x890   :  { %1541 = vrot.lane.b32.xlu1 %v1540_v49, %s3942_s10 }
 0x902   :  { %v1542_v15 = vpop.permute.xlu1 %1541 }
 0x903   :  { %3177 = vst.msk [vmem:[%s5053_s14 + $0x2] sm:$0x3] %vm469_vm7, %v1542_v15  ;;  %3543 = vmatmul.mubr.msk.f32.vlgmr.msra.gmra.mrb[4].mxu1 %vm403_vm6, %v1542_v15 }
 0x904   :  { %3752 = vmatpush3.bf16.msra.mxu1 %v4485_v11  ;;  %3564 = vmatprep.mubr.msk.f32.mxu1 %vm3941_vm10, %v3937_v62 }
 0x905   :  { %3753 = vmatprep.subr.bf16.mxu1 %v3940_v32 }
 0x908   :  { %3755 = vmatpush3.bf16.msra.mxu1 %v4497_v14 }
 0x909   :  { %3762 = vmatprep.subr.bf16.mxu1 %v3940_v32 }
 0x9d6   :  { %v1611_v52 = vpop.f32.mrb[4].mxu1 }
 0x9d7   :  { %v1612_v55 = vadd.f32 %v4623_v31, %v1611_v52  ;;  %v3544_v56 = vpop.f32.mrb[5].mxu1 }
 0x9d9   :  { %v1629_v50 = vrot.slane %v1612_v55, %v4186_v45  ;;  %v1615_v19 = vadd.f32 %v1612_v55, %v1230_v53 }
 0x9db   :  { %1630 = vrot.lane.b32.xlu0 %v1629_v50, %s3938_s3  ;;  %v3321_v51 = vmul.f32 -1.442695, %v1615_v19 }
 0x9dd   :  { %3848 = vpow2.f32 %v3321_v51 }
 0x9e7   :  { %v3849_v46 = vpop.eup %3848 }
 0x9e8   :  { %v1619_v58 = vadd.f32 1.0, %v3849_v46 }
 0x9ea   :  { %3850 = vrcp.f32 %v1619_v58 }
 0x9f4   :  { %v3851_v60 = vpop.eup %3850 }
 0x9f5   :  { %v1640_v5 = vsub.f32 1.0, %v3851_v60  ;;  %v1646_v63 = vmul.f32 %v3851_v60, %v4656_v22 }
 0xa4d   :  { %v1631_v61 = vpop.permute.xlu0 %1630 }
 0xa4e   :  { %v1633_v0 = vmul.f32 %v3851_v60, %v1631_v61 }
 0xa50   :  { %1635 = vrot.lane.b32.xlu1 %v1633_v0, %s3938_s3 }
 0xac2   :  { %v1636_v1 = vpop.permute.xlu1 %1635 }
 0xac3   :  { %v1638_v8 = vadd.f32 %v1636_v1, %v1230_v53 }
 0xac5   :  { %3852 = vtanh.f32 %v1638_v8 }
 0xacf   :  { %v3853_v18 = vpop.eup %3852 }
 0xad0   :  { %1642 = vrot.lane.b32.xlu0 %v3853_v18, %s3942_s10 }
 0xb42   :  { %v1643_v20 = vpop.permute.xlu0 %1642 }
 0xb43   :  { %v1645_v7 = vmul.f32 %v1643_v20, %v1640_v5 }
 0xb45   :  { %v4681_v33 = vadd.f32 %v1646_v63, %v1645_v7  ;;  %v1248_v63 = vcombine.high %v1240_v44, %v1240_v44 }
 0xb47   :  { %v1655_v2 = vrot.slane %v4681_v33, %v4186_v45 }
 0xb49   :  { %1656 = vrot.lane.b32.xlu1 %v1655_v2, %s3942_s10 }
 0xbbb   :  { %v1657_v3 = vpop.permute.xlu1 %1656 }
 0xbbc   :  { %3178 = vst.msk [vmem:[%s5053_s14 + $0x4] sm:$0x3] %vm469_vm7, %v1657_v3  ;;  %3554 = vmatmul.mubr.msk.f32.vlgmr.msra.gmra.mrb[12].mxu0 %vm403_vm6, %v1657_v3 }
 0xbbd   :  { %3758 = vmatpush3.bf16.msra.mxu0 %v4485_v11  ;;  %3575 = vmatprep.mubr.msk.f32.mxu0 %vm3941_vm10, %v3937_v62 }
 0xbbe   :  { %3759 = vmatprep.subr.bf16.mxu0 %v3940_v32 }
 0xbc1   :  { %3761 = vmatpush3.bf16.msra.mxu0 %v4497_v14 }
 0xbc2   :  { %3768 = vmatprep.subr.bf16.mxu0 %v3940_v32 }
 0xc8f   :  { %v1726_v9 = vpop.f32.mrb[12].mxu0 }
 0xc90   :  { %v1727_v38 = vadd.f32 %v4623_v31, %v1726_v9  ;;  %v3555_v10 = vpop.f32.mrb[13].mxu0 }
 0xc92   :  { %v1744_v25 = vrot.slane %v1727_v38, %v4186_v45  ;;  %v1730_v27 = vadd.f32 %v1727_v38, %v1232_v26 }
 0xc94   :  { %1745 = vrot.lane.b32.xlu0 %v1744_v25, %s3938_s3  ;;  %v3323_v28 = vmul.f32 -1.442695, %v1730_v27 }
 0xc96   :  { %3854 = vpow2.f32 %v3323_v28 }
 0xca0   :  { %v3855_v30 = vpop.eup %3854 }
 0xca1   :  { %v1734_v6 = vadd.f32 1.0, %v3855_v30 }
 0xca3   :  { %3856 = vrcp.f32 %v1734_v6 }
 0xcad   :  { %v3857_v35 = vpop.eup %3856 }
 0xcae   :  { %v1755_v16 = vsub.f32 1.0, %v3857_v35  ;;  %v1761_v43 = vmul.f32 %v3857_v35, %v4681_v33 }
 0xd06   :  { %v1746_v12 = vpop.permute.xlu0 %1745 }
 0xd07   :  { %v1748_v17 = vmul.f32 %v3857_v35, %v1746_v12 }
 0xd09   :  { %1750 = vrot.lane.b32.xlu1 %v1748_v17, %s3938_s3 }
 0xd7b   :  { %v1751_v39 = vpop.permute.xlu1 %1750 }
 0xd7c   :  { %v1753_v21 = vadd.f32 %v1751_v39, %v1232_v26 }
 0xd7e   :  { %3858 = vtanh.f32 %v1753_v21 }
 0xd88   :  { %v3859_v41 = vpop.eup %3858 }
 0xd89   :  { %1757 = vrot.lane.b32.xlu0 %v3859_v41, %s3942_s10 }
 0xdfb   :  { %v1758_v42 = vpop.permute.xlu0 %1757 }
 0xdfc   :  { %v1760_v13 = vmul.f32 %v1758_v42, %v1755_v16 }
 0xdfe   :  { %v4703_v40 = vadd.f32 %v1761_v43, %v1760_v13  ;;  %v1233_v13 = vcombine.high %v4614_v34, %v4614_v34 }
 0xe00   :  { %v1771_v23 = vrot.slane %v4703_v40, %v4186_v45 }
 0xe02   :  { %1772 = vrot.lane.b32.xlu1 %v1771_v23, %s3942_s10  ;;  %v1247_v23 = vrot.slane %v1233_v13, %v4186_v45 }
 0xe74   :  { %v1773_v36 = vpop.permute.xlu1 %1772 }
 0xe75   :  { %3179 = vst.msk [vmem:[%s5053_s14 + $0x6] sm:$0x3] %vm469_vm7, %v1773_v36  ;;  %3565 = vmatmul.mubr.msk.f32.vlgmr.msra.gmra.mrb[6].mxu1 %vm403_vm6, %v1773_v36 }
 0xe76   :  { %3764 = vmatpush3.bf16.msra.mxu1 %v4485_v11  ;;  %3586 = vmatprep.mubr.msk.f32.mxu1 %vm3941_vm10, %v3937_v62 }
 0xe77   :  { %3765 = vmatprep.subr.bf16.mxu1 %v3940_v32 }
 0xe7a   :  { %3767 = vmatpush3.bf16.msra.mxu1 %v4497_v14 }
 0xe7b   :  { %3774 = vmatprep.subr.bf16.mxu1 %v3940_v32 }
 0xf48   :  { %v1842_v47 = vpop.f32.mrb[6].mxu1 }
 0xf49   :  { %v1843_v4 = vadd.f32 %v4623_v31, %v1842_v47  ;;  %v3566_v48 = vpop.f32.mrb[7].mxu1 }
 0xf4b   :  { %v1860_v24 = vrot.slane %v1843_v4, %v4186_v45  ;;  %v1846_v37 = vadd.f32 %v1843_v4, %v1240_v44 }
 0xf4d   :  { %1861 = vrot.lane.b32.xlu0 %v1860_v24, %s3938_s3  ;;  %v3325_v49 = vmul.f32 -1.442695, %v1846_v37 }
 0xf4f   :  { %3860 = vpow2.f32 %v3325_v49 }
 0xf59   :  { %v3861_v15 = vpop.eup %3860 }
 0xf5a   :  { %v1850_v52 = vadd.f32 1.0, %v3861_v15 }
 0xf5c   :  { %3862 = vrcp.f32 %v1850_v52 }
 0xf66   :  { %v3863_v55 = vpop.eup %3862 }
 0xf67   :  { %v1871_v51 = vsub.f32 1.0, %v3863_v55  ;;  %v1877_v58 = vmul.f32 %v3863_v55, %v4703_v40 }
 0xfbf   :  { %v1862_v56 = vpop.permute.xlu0 %1861 }
 0xfc0   :  { %v1864_v50 = vmul.f32 %v3863_v55, %v1862_v56 }
 0xfc2   :  { %1866 = vrot.lane.b32.xlu1 %v1864_v50, %s3938_s3 }
0x1034   :  { %v1867_v57 = vpop.permute.xlu1 %1866 }
0x1035   :  { %v1869_v53 = vadd.f32 %v1867_v57, %v1240_v44 }
0x1037   :  { %3864 = vtanh.f32 %v1869_v53 }
0x1041   :  { %v3865_v19 = vpop.eup %3864 }
0x1042   :  { %1873 = vrot.lane.b32.xlu0 %v3865_v19, %s3942_s10 }
0x10b4   :  { %v1874_v46 = vpop.permute.xlu0 %1873 }
0x10b5   :  { %v1876_v60 = vmul.f32 %v1874_v46, %v1871_v51 }
0x10b7   :  { %v4727_v61 = vadd.f32 %v1877_v58, %v1876_v60 }
0x10b9   :  { %v1886_v0 = vrot.slane %v4727_v61, %v4186_v45 }
0x10bb   :  { %1887 = vrot.lane.b32.xlu1 %v1886_v0, %s3942_s10  ;;  %v1249_v0 = vcombine.high %v1247_v23, %v1247_v23 }
0x112d   :  { %v1888_v1 = vpop.permute.xlu1 %1887 }
0x112e   :  { %3180 = vst.msk [vmem:[%s5053_s14 + $0x8] sm:$0x3] %vm469_vm7, %v1888_v1  ;;  %3576 = vmatmul.mubr.msk.f32.vlgmr.msra.gmra.mrb[14].mxu0 %vm403_vm6, %v1888_v1 }
0x112f   :  { %3770 = vmatpush3.bf16.msra.mxu0 %v4485_v11  ;;  %3597 = vmatprep.mubr.msk.f32.mxu0 %vm3941_vm10, %v3937_v62 }
0x1130   :  { %3771 = vmatprep.subr.bf16.mxu0 %v3940_v32 }
0x1133   :  { %3773 = vmatpush3.bf16.msra.mxu0 %v4497_v14 }
0x1134   :  { %3780 = vmatprep.subr.bf16.mxu0 %v3940_v32 }
0x1201   :  { %v1957_v8 = vpop.f32.mrb[14].mxu0 }
0x1202   :  { %v1958_v18 = vadd.f32 %v4623_v31, %v1957_v8  ;;  %v3577_v5 = vpop.f32.mrb[15].mxu0 }
0x1204   :  { %v1975_v20 = vrot.slane %v1958_v18, %v4186_v45  ;;  %v1961_v7 = vadd.f32 %v1958_v18, %v1248_v63 }
0x1206   :  { %1976 = vrot.lane.b32.xlu0 %v1975_v20, %s3938_s3  ;;  %v3327_v2 = vmul.f32 -1.442695, %v1961_v7 }
0x1208   :  { %3866 = vpow2.f32 %v3327_v2 }
0x1212   :  { %v3867_v3 = vpop.eup %3866 }
0x1213   :  { %v1965_v9 = vadd.f32 1.0, %v3867_v3 }
0x1215   :  { %3868 = vrcp.f32 %v1965_v9 }
0x121f   :  { %v3869_v38 = vpop.eup %3868 }
0x1220   :  { %v1986_v30 = vsub.f32 1.0, %v3869_v38  ;;  %v1992_v35 = vmul.f32 %v3869_v38, %v4727_v61 }
0x1278   :  { %v1977_v10 = vpop.permute.xlu0 %1976 }
0x1279   :  { %v1979_v25 = vmul.f32 %v3869_v38, %v1977_v10 }
0x127b   :  { %1981 = vrot.lane.b32.xlu1 %v1979_v25, %s3938_s3 }
0x12ed   :  { %v1982_v26 = vpop.permute.xlu1 %1981 }
0x12ee   :  { %v1984_v27 = vadd.f32 %v1982_v26, %v1248_v63 }
0x12f0   :  { %3870 = vtanh.f32 %v1984_v27 }
0x12fa   :  { %v3871_v28 = vpop.eup %3870 }
0x12fb   :  { %1988 = vrot.lane.b32.xlu0 %v3871_v28, %s3942_s10 }
0x136d   :  { %v1989_v6 = vpop.permute.xlu0 %1988 }
0x136e   :  { %v1991_v12 = vmul.f32 %v1989_v6, %v1986_v30 }
0x1370   :  { %v4749_v17 = vadd.f32 %v1992_v35, %v1991_v12 }
0x1372   :  { %v2002_v39 = vrot.slane %v4749_v17, %v4186_v45 }
0x1374   :  { %2003 = vrot.lane.b32.xlu1 %v2002_v39, %s3942_s10 }
0x13e6   :  { %v2004_v21 = vpop.permute.xlu1 %2003 }
0x13e7   :  { %3181 = vst.msk [vmem:[%s5053_s14 + $0xa] sm:$0x3] %vm469_vm7, %v2004_v21  ;;  %3587 = vmatmul.mubr.msk.f32.vlgmr.msra.gmra.mrb[8].mxu1 %vm403_vm6, %v2004_v21  ;;  %v1257_v21 = vrot.slane %v4618_v59, %v4186_v45 }
0x13e8   :  { %3776 = vmatpush3.bf16.msra.mxu1 %v4485_v11  ;;  %3608 = vmatprep.mubr.msk.f32.mxu1 %vm3941_vm10, %v3937_v62 }
0x13e9   :  { %3777 = vmatprep.subr.bf16.mxu1 %v3940_v32 }
0x13ec   :  { %3779 = vmatpush3.bf16.msra.mxu1 %v4497_v14 }
0x13ed   :  { %3786 = vmatprep.subr.bf16.mxu1 %v3940_v32 }
0x14ba   :  { %v2073_v41 = vpop.f32.mrb[8].mxu1 }
0x14bb   :  { %v2074_v16 = vadd.f32 %v4623_v31, %v2073_v41  ;;  %v3588_v42 = vpop.f32.mrb[9].mxu1 }
0x14bd   :  { %v2091_v43 = vrot.slane %v2074_v16, %v4186_v45  ;;  %v2077_v36 = vadd.f32 %v2074_v16, %v1247_v23 }
0x14bf   :  { %2092 = vrot.lane.b32.xlu0 %v2091_v43, %s3938_s3  ;;  %v3329_v47 = vmul.f32 -1.442695, %v2077_v36 }
0x14c1   :  { %3872 = vpow2.f32 %v3329_v47 }
0x14cb   :  { %v3873_v4 = vpop.eup %3872 }
0x14cc   :  { %v2081_v48 = vadd.f32 1.0, %v3873_v4 }
0x14ce   :  { %3874 = vrcp.f32 %v2081_v48 }
0x14d8   :  { %v3875_v24 = vpop.eup %3874 }
0x14d9   :  { %v2102_v34 = vsub.f32 1.0, %v3875_v24  ;;  %v2108_v56 = vmul.f32 %v3875_v24, %v4749_v17 }
0x1531   :  { %v2093_v44 = vpop.permute.xlu0 %2092 }
0x1532   :  { %v2095_v37 = vmul.f32 %v3875_v24, %v2093_v44 }
0x1534   :  { %2097 = vrot.lane.b32.xlu1 %v2095_v37, %s3938_s3 }
0x15a6   :  { %v2098_v49 = vpop.permute.xlu1 %2097 }
0x15a7   :  { %v2100_v15 = vadd.f32 %v2098_v49, %v1247_v23 }
0x15a9   :  { %3876 = vtanh.f32 %v2100_v15 }
0x15b3   :  { %v3877_v52 = vpop.eup %3876 }
0x15b4   :  { %2104 = vrot.lane.b32.xlu0 %v3877_v52, %s3942_s10 }
0x1626   :  { %v2105_v55 = vpop.permute.xlu0 %2104 }
0x1627   :  { %v2107_v50 = vmul.f32 %v2105_v55, %v2102_v34 }
0x1629   :  { %v4774_v57 = vadd.f32 %v2108_v56, %v2107_v50 }
0x162b   :  { %v2117_v53 = vrot.slane %v4774_v57, %v4186_v45 }
0x162d   :  { %2118 = vrot.lane.b32.xlu1 %v2117_v53, %s3942_s10 }
0x169f   :  { %v2119_v19 = vpop.permute.xlu1 %2118 }
0x16a0   :  { %3182 = vst.msk [vmem:[%s5053_s14 + $0xc] sm:$0x3] %vm469_vm7, %v2119_v19  ;;  %3598 = vmatmul.mubr.msk.f32.vlgmr.msra.gmra.mrb[16].mxu0 %vm403_vm6, %v2119_v19  ;;  %v1265_v19 = vcombine.high %v1257_v21, %v1257_v21 }
0x16a1   :  { %3782 = vmatpush3.bf16.msra.mxu0 %v4485_v11  ;;  %3619 = vmatprep.mubr.msk.f32.mxu0 %vm3941_vm10, %v3937_v62 }
0x16a2   :  { %3783 = vmatprep.subr.bf16.mxu0 %v3940_v32 }
0x16a5   :  { %3785 = vmatpush3.bf16.msra.mxu0 %v4497_v14 }
0x16a6   :  { %3792 = vmatprep.subr.bf16.mxu0 %v3940_v32 }
0x1773   :  { %v2188_v51 = vpop.f32.mrb[16].mxu0 }
0x1774   :  { %v2189_v46 = vadd.f32 %v4623_v31, %v2188_v51  ;;  %v3599_v58 = vpop.f32.mrb[17].mxu0 }
0x1776   :  { %v2206_v60 = vrot.slane %v2189_v46, %v4186_v45  ;;  %v2192_v1 = vadd.f32 %v2189_v46, %v1249_v0 }
0x1778   :  { %2207 = vrot.lane.b32.xlu0 %v2206_v60, %s3938_s3  ;;  %v3331_v8 = vmul.f32 -1.442695, %v2192_v1 }
0x177a   :  { %3878 = vpow2.f32 %v3331_v8 }
0x1784   :  { %v3879_v18 = vpop.eup %3878 }
0x1785   :  { %v2196_v5 = vadd.f32 1.0, %v3879_v18 }
0x1787   :  { %3880 = vrcp.f32 %v2196_v5 }
0x1791   :  { %v3881_v20 = vpop.eup %3880 }
0x1792   :  { %v2217_v38 = vsub.f32 1.0, %v3881_v20  ;;  %v2223_v25 = vmul.f32 %v3881_v20, %v4774_v57 }
0x17ea   :  { %v2208_v63 = vpop.permute.xlu0 %2207 }
0x17eb   :  { %v2210_v7 = vmul.f32 %v3881_v20, %v2208_v63 }
0x17ed   :  { %2212 = vrot.lane.b32.xlu1 %v2210_v7, %s3938_s3 }
0x185f   :  { %v2213_v2 = vpop.permute.xlu1 %2212 }
0x1860   :  { %v2215_v3 = vadd.f32 %v2213_v2, %v1249_v0 }
0x1862   :  { %3882 = vtanh.f32 %v2215_v3 }
0x186c   :  { %v3883_v9 = vpop.eup %3882 }
0x186d   :  { %2219 = vrot.lane.b32.xlu0 %v3883_v9, %s3942_s10 }
0x18df   :  { %v2220_v10 = vpop.permute.xlu0 %2219 }
0x18e0   :  { %v2222_v26 = vmul.f32 %v2220_v10, %v2217_v38 }
0x18e2   :  { %v4796_v27 = vadd.f32 %v2223_v25, %v2222_v26 }
0x18e4   :  { %v2233_v28 = vrot.slane %v4796_v27, %v4186_v45 }
0x18e6   :  { %2234 = vrot.lane.b32.xlu1 %v2233_v28, %s3942_s10 }
0x1958   :  { %v2235_v30 = vpop.permute.xlu1 %2234 }
0x1959   :  { %3183 = vst.msk [vmem:[%s5053_s14 + $0xe] sm:$0x3] %vm469_vm7, %v2235_v30  ;;  %3609 = vmatmul.mubr.msk.f32.vlgmr.msra.gmra.mrb[10].mxu1 %vm403_vm6, %v2235_v30 }
0x195a   :  { %3788 = vmatpush3.bf16.msra.mxu1 %v4485_v11  ;;  %3630 = vmatprep.mubr.msk.f32.mxu1 %vm3941_vm10, %v3937_v62 }
0x195b   :  { %3789 = vmatprep.subr.bf16.mxu1 %v3940_v32 }
0x195e   :  { %3791 = vmatpush3.bf16.msra.mxu1 %v4497_v14 }
0x195f   :  { %3798 = vmatprep.subr.bf16.mxu1 %v3940_v32 }
0x1a2c   :  { %v2304_v6 = vpop.f32.mrb[10].mxu1 }
0x1a2d   :  { %v2305_v35 = vadd.f32 %v4623_v31, %v2304_v6  ;;  %v3610_v12 = vpop.f32.mrb[11].mxu1  ;;  %v1250_v6 = vcombine.high %v4618_v59, %v4618_v59 }
0x1a2f   :  { %v2322_v39 = vrot.slane %v2305_v35, %v4186_v45  ;;  %v2308_v41 = vadd.f32 %v2305_v35, %v1257_v21  ;;  %v1264_v35 = vrot.slane %v1250_v6, %v4186_v45 }
0x1a31   :  { %2323 = vrot.lane.b32.xlu0 %v2322_v39, %s3938_s3  ;;  %v3333_v16 = vmul.f32 -1.442695, %v2308_v41 }
0x1a33   :  { %3884 = vpow2.f32 %v3333_v16 }
0x1a3d   :  { %v3885_v42 = vpop.eup %3884 }
0x1a3e   :  { %v2312_v43 = vadd.f32 1.0, %v3885_v42 }
0x1a40   :  { %3886 = vrcp.f32 %v2312_v43 }
0x1a4a   :  { %v3887_v13 = vpop.eup %3886 }
0x1a4b   :  { %v2333_v24 = vsub.f32 1.0, %v3887_v13  ;;  %v2339_v37 = vmul.f32 %v3887_v13, %v4796_v27 }
0x1aa3   :  { %v2324_v23 = vpop.permute.xlu0 %2323 }
0x1aa4   :  { %v2326_v36 = vmul.f32 %v3887_v13, %v2324_v23 }
0x1aa6   :  { %2328 = vrot.lane.b32.xlu1 %v2326_v36, %s3938_s3 }
0x1b18   :  { %v2329_v47 = vpop.permute.xlu1 %2328 }
0x1b19   :  { %v2331_v4 = vadd.f32 %v2329_v47, %v1257_v21 }
0x1b1b   :  { %3888 = vtanh.f32 %v2331_v4 }
0x1b25   :  { %v3889_v48 = vpop.eup %3888 }
0x1b26   :  { %2335 = vrot.lane.b32.xlu0 %v3889_v48, %s3942_s10 }
0x1b98   :  { %v2336_v44 = vpop.permute.xlu0 %2335 }
0x1b99   :  { %v2338_v49 = vmul.f32 %v2336_v44, %v2333_v24 }
0x1b9b   :  { %v4820_v15 = vadd.f32 %v2339_v37, %v2338_v49 }
0x1b9d   :  { %v2348_v52 = vrot.slane %v4820_v15, %v4186_v45 }
0x1b9f   :  { %2349 = vrot.lane.b32.xlu1 %v2348_v52, %s3942_s10 }
0x1c11   :  { %v2350_v34 = vpop.permute.xlu1 %2349 }
0x1c12   :  { %3184 = vst.msk [vmem:[%s5053_s14 + $0x10] sm:$0x3] %vm469_vm7, %v2350_v34  ;;  %3620 = vmatmul.mubr.msk.f32.vlgmr.msra.gmra.mrb[18].mxu0 %vm403_vm6, %v2350_v34 }
0x1c13   :  { %3794 = vmatpush3.bf16.msra.mxu0 %v4485_v11  ;;  %3641 = vmatprep.mubr.msk.f32.mxu0 %vm3941_vm10, %v3937_v62 }
0x1c14   :  { %3795 = vmatprep.subr.bf16.mxu0 %v3940_v32 }
0x1c17   :  { %3797 = vmatpush3.bf16.msra.mxu0 %v4497_v14 }
0x1c18   :  { %3804 = vmatprep.subr.bf16.mxu0 %v3940_v32 }
0x1ce5   :  { %v2419_v55 = vpop.f32.mrb[18].mxu0 }
0x1ce6   :  { %v2420_v56 = vadd.f32 %v4623_v31, %v2419_v55  ;;  %v3621_v50 = vpop.f32.mrb[19].mxu0 }
0x1ce8   :  { %v2437_v53 = vrot.slane %v2420_v56, %v4186_v45  ;;  %v2423_v51 = vadd.f32 %v2420_v56, %v1265_v19  ;;  %v1266_v56 = vcombine.high %v1264_v35, %v1264_v35 }
0x1cea   :  { %2438 = vrot.lane.b32.xlu0 %v2437_v53, %s3938_s3  ;;  %v3335_v46 = vmul.f32 -1.442695, %v2423_v51 }
0x1cec   :  { %3890 = vpow2.f32 %v3335_v46 }
0x1cf6   :  { %v3891_v58 = vpop.eup %3890 }
0x1cf7   :  { %v2427_v60 = vadd.f32 1.0, %v3891_v58 }
0x1cf9   :  { %3892 = vrcp.f32 %v2427_v60 }
0x1d03   :  { %v3893_v0 = vpop.eup %3892 }
0x1d04   :  { %v2448_v63 = vsub.f32 1.0, %v3893_v0  ;;  %v2454_v2 = vmul.f32 %v3893_v0, %v4820_v15 }
0x1d5c   :  { %v2439_v1 = vpop.permute.xlu0 %2438 }
0x1d5d   :  { %v2441_v8 = vmul.f32 %v3893_v0, %v2439_v1 }
0x1d5f   :  { %2443 = vrot.lane.b32.xlu1 %v2441_v8, %s3938_s3 }
0x1dd1   :  { %v2444_v18 = vpop.permute.xlu1 %2443 }
0x1dd2   :  { %v2446_v5 = vadd.f32 %v2444_v18, %v1265_v19 }
0x1dd4   :  { %3894 = vtanh.f32 %v2446_v5 }
0x1dde   :  { %v3895_v20 = vpop.eup %3894 }
0x1ddf   :  { %2450 = vrot.lane.b32.xlu0 %v3895_v20, %s3942_s10 }
0x1e51   :  { %v2451_v7 = vpop.permute.xlu0 %2450 }
0x1e52   :  { %v2453_v3 = vmul.f32 %v2451_v7, %v2448_v63 }
0x1e54   :  { %v4842_v9 = vadd.f32 %v2454_v2, %v2453_v3 }
0x1e56   :  { %v2464_v38 = vrot.slane %v4842_v9, %v4186_v45 }
0x1e58   :  { %2465 = vrot.lane.b32.xlu1 %v2464_v38, %s3942_s10 }
0x1eca   :  { %v2466_v10 = vpop.permute.xlu1 %2465 }
0x1ecb   :  { %3185 = vst.msk [vmem:[%s5053_s14 + $0x12] sm:$0x3] %vm469_vm7, %v2466_v10  ;;  %3631 = vmatmul.mubr.msk.f32.vlgmr.msra.gmra.mrb[12].mxu1 %vm403_vm6, %v2466_v10 }
0x1ecc   :  { %3800 = vmatpush3.bf16.msra.mxu1 %v4485_v11  ;;  %3652 = vmatprep.mubr.msk.f32.mxu1 %vm3941_vm10, %v3937_v62 }
0x1ecd   :  { %3801 = vmatprep.subr.bf16.mxu1 %v3940_v32 }
0x1ed0   :  { %3803 = vmatpush3.bf16.msra.mxu1 %v4497_v14 }
0x1ed1   :  { %3810 = vmatprep.subr.bf16.mxu1 %v3940_v32 }
0x1f9e   :  { %v2535_v25 = vpop.f32.mrb[12].mxu1 }
0x1f9f   :  { %v2536_v26 = vadd.f32 %v4623_v31, %v2535_v25  ;;  %v3632_v28 = vpop.f32.mrb[13].mxu1 }
0x1fa0   :  { %v1274_v28 = vrot.slane %v4616_v54, %v4186_v45 }
0x1fa1   :  { %v2553_v30 = vrot.slane %v2536_v26, %v4186_v45  ;;  %v2539_v12 = vadd.f32 %v2536_v26, %v1264_v35 }
0x1fa3   :  { %2554 = vrot.lane.b32.xlu0 %v2553_v30, %s3938_s3  ;;  %v3337_v39 = vmul.f32 -1.442695, %v2539_v12 }
0x1fa5   :  { %3896 = vpow2.f32 %v3337_v39 }
0x1faf   :  { %v3897_v21 = vpop.eup %3896 }
0x1fb0   :  { %v2543_v41 = vadd.f32 1.0, %v3897_v21 }
0x1fb2   :  { %3898 = vrcp.f32 %v2543_v41 }
0x1fbc   :  { %v3899_v16 = vpop.eup %3898 }
0x1fbd   :  { %v2564_v59 = vsub.f32 1.0, %v3899_v16  ;;  %v2570_v4 = vmul.f32 %v3899_v16, %v4842_v9 }
0x2015   :  { %v2555_v42 = vpop.permute.xlu0 %2554 }
0x2016   :  { %v2557_v43 = vmul.f32 %v3899_v16, %v2555_v42 }
0x2018   :  { %2559 = vrot.lane.b32.xlu1 %v2557_v43, %s3938_s3 }
0x208a   :  { %v2560_v13 = vpop.permute.xlu1 %2559 }
0x208b   :  { %v2562_v23 = vadd.f32 %v2560_v13, %v1264_v35 }
0x208d   :  { %3900 = vtanh.f32 %v2562_v23 }
0x2097   :  { %v3901_v36 = vpop.eup %3900 }
0x2098   :  { %2566 = vrot.lane.b32.xlu0 %v3901_v36, %s3942_s10 }
0x210a   :  { %v2567_v47 = vpop.permute.xlu0 %2566 }
0x210b   :  { %v2569_v48 = vmul.f32 %v2567_v47, %v2564_v59 }
0x210d   :  { %v4867_v24 = vadd.f32 %v2570_v4, %v2569_v48 }
0x210f   :  { %v2579_v44 = vrot.slane %v4867_v24, %v4186_v45 }
0x2111   :  { %2580 = vrot.lane.b32.xlu1 %v2579_v44, %s3942_s10 }
0x2183   :  { %v2581_v37 = vpop.permute.xlu1 %2580 }
0x2184   :  { %3186 = vst.msk [vmem:[%s5053_s14 + $0x14] sm:$0x3] %vm469_vm7, %v2581_v37  ;;  %3642 = vmatmul.mubr.msk.f32.vlgmr.msra.gmra.mrb[20].mxu0 %vm403_vm6, %v2581_v37 }
0x2185   :  { %3806 = vmatpush3.bf16.msra.mxu0 %v4485_v11  ;;  %3663 = vmatprep.mubr.msk.f32.mxu0 %vm3941_vm10, %v3937_v62 }
0x2186   :  { %3807 = vmatprep.subr.bf16.mxu0 %v3940_v32 }
0x2189   :  { %3809 = vmatpush3.bf16.msra.mxu0 %v4497_v14 }
0x218a   :  { %3816 = vmatprep.subr.bf16.mxu0 %v3940_v32 }
0x2257   :  { %v2650_v49 = vpop.f32.mrb[20].mxu0 }
0x2258   :  { %v2651_v52 = vadd.f32 %v4623_v31, %v2650_v49  ;;  %v3643_v34 = vpop.f32.mrb[21].mxu0 }
0x2259   :  { %v1282_v34 = vcombine.high %v1274_v28, %v1274_v28 }
0x225a   :  { %v2668_v55 = vrot.slane %v2651_v52, %v4186_v45  ;;  %v2654_v50 = vadd.f32 %v2651_v52, %v1266_v56 }
0x225c   :  { %2669 = vrot.lane.b32.xlu0 %v2668_v55, %s3938_s3  ;;  %v3339_v53 = vmul.f32 -1.442695, %v2654_v50 }
0x225e   :  { %3902 = vpow2.f32 %v3339_v53 }
0x2268   :  { %v3903_v19 = vpop.eup %3902 }
0x2269   :  { %v2658_v51 = vadd.f32 1.0, %v3903_v19 }
0x226b   :  { %3904 = vrcp.f32 %v2658_v51 }
0x2275   :  { %v3905_v46 = vpop.eup %3904 }
0x2276   :  { %v2679_v18 = vsub.f32 1.0, %v3905_v46  ;;  %v2685_v20 = vmul.f32 %v3905_v46, %v4867_v24 }
0x22ce   :  { %v2670_v58 = vpop.permute.xlu0 %2669 }
0x22cf   :  { %v2672_v60 = vmul.f32 %v3905_v46, %v2670_v58 }
0x22d1   :  { %2674 = vrot.lane.b32.xlu1 %v2672_v60, %s3938_s3 }
0x2343   :  { %v2675_v0 = vpop.permute.xlu1 %2674 }
0x2344   :  { %v2677_v1 = vadd.f32 %v2675_v0, %v1266_v56 }
0x2346   :  { %3906 = vtanh.f32 %v2677_v1 }
0x2350   :  { %v3907_v8 = vpop.eup %3906 }
0x2351   :  { %2681 = vrot.lane.b32.xlu0 %v3907_v8, %s3942_s10 }
0x23c3   :  { %v2682_v5 = vpop.permute.xlu0 %2681 }
0x23c4   :  { %v2684_v63 = vmul.f32 %v2682_v5, %v2679_v18 }
0x23c6   :  { %v4889_v7 = vadd.f32 %v2685_v20, %v2684_v63 }
0x23c8   :  { %v2695_v2 = vrot.slane %v4889_v7, %v4186_v45 }
0x23ca   :  { %2696 = vrot.lane.b32.xlu1 %v2695_v2, %s3942_s10 }
0x243c   :  { %v2697_v3 = vpop.permute.xlu1 %2696 }
0x243d   :  { %3187 = vst.msk [vmem:[%s5053_s14 + $0x16] sm:$0x3] %vm469_vm7, %v2697_v3  ;;  %3653 = vmatmul.mubr.msk.f32.vlgmr.msra.gmra.mrb[14].mxu1 %vm403_vm6, %v2697_v3  ;;  %v1267_v3 = vcombine.high %v4616_v54, %v4616_v54 }
0x243e   :  { %3812 = vmatpush3.bf16.msra.mxu1 %v4485_v11  ;;  %3674 = vmatprep.mubr.msk.f32.mxu1 %vm3941_vm10, %v3937_v62 }
0x243f   :  { %3813 = vmatprep.subr.bf16.mxu1 %v3940_v32 }
0x2442   :  { %3815 = vmatpush3.bf16.msra.mxu1 %v4497_v14 }
0x2510   :  { %v2766_v38 = vpop.f32.mrb[14].mxu1 }
0x2511   :  { %v2767_v10 = vadd.f32 %v4623_v31, %v2766_v38  ;;  %v3654_v25 = vpop.f32.mrb[15].mxu1  ;;  %v1281_v38 = vrot.slane %v1267_v3, %v4186_v45 }
0x2513   :  { %v2784_v26 = vrot.slane %v2767_v10, %v4186_v45  ;;  %v2770_v30 = vadd.f32 %v2767_v10, %v1274_v28 }
0x2515   :  { %2785 = vrot.lane.b32.xlu0 %v2784_v26, %s3938_s3  ;;  %v3341_v6 = vmul.f32 -1.442695, %v2770_v30 }
0x2517   :  { %3908 = vpow2.f32 %v3341_v6 }
0x2521   :  { %v3909_v35 = vpop.eup %3908 }
0x2522   :  { %v2774_v12 = vadd.f32 1.0, %v3909_v35 }
0x2524   :  { %3910 = vrcp.f32 %v2774_v12 }
0x252e   :  { %v3911_v39 = vpop.eup %3910 }
0x252f   :  { %v2795_v13 = vsub.f32 1.0, %v3911_v39  ;;  %v2801_v36 = vmul.f32 %v3911_v39, %v4889_v7 }
0x2587   :  { %v2786_v21 = vpop.permute.xlu0 %2785 }
0x2588   :  { %v2788_v41 = vmul.f32 %v3911_v39, %v2786_v21 }
0x258a   :  { %2790 = vrot.lane.b32.xlu1 %v2788_v41, %s3938_s3 }
0x25fc   :  { %v2791_v16 = vpop.permute.xlu1 %2790 }
0x25fd   :  { %v2793_v42 = vadd.f32 %v2791_v16, %v1274_v28 }
0x25ff   :  { %3912 = vtanh.f32 %v2793_v42 }
0x2609   :  { %v3913_v43 = vpop.eup %3912 }
0x260a   :  { %2797 = vrot.lane.b32.xlu0 %v3913_v43, %s3942_s10 }
0x267c   :  { %v2798_v23 = vpop.permute.xlu0 %2797 }
0x267d   :  { %v2800_v59 = vmul.f32 %v2798_v23, %v2795_v13 }
0x267f   :  { %v4912_v47 = vadd.f32 %v2801_v36, %v2800_v59  ;;  %v3932_v36 = vld [vmem:[%s5052_s12] ss:$0 sm:$0xff] }
0x2681   :  { %v2810_v4 = vrot.slane %v4912_v47, %v4186_v45 }
0x2683   :  { %2811 = vrot.lane.b32.xlu1 %v2810_v4, %s3942_s10 }
0x26f5   :  { %v2812_v48 = vpop.permute.xlu1 %2811 }
0x26f6   :  { %3188 = vst.msk [vmem:[%s5053_s14 + $0x18] sm:$0x3] %vm469_vm7, %v2812_v48  ;;  %3664 = vmatmul.mubr.msk.f32.vlgmr.msra.gmra.mrb[22].mxu0 %vm403_vm6, %v2812_v48 }
0x26f7   :  { %3818 = vmatpush3.bf16.msra.mxu0 %v4485_v11  ;;  %3685 = vmatprep.mubr.msk.f32.mxu0 %vm3941_vm10, %v3937_v62 }
0x26f8   :  { %3819 = vmatprep.subr.bf16.mxu0 %v3940_v32 }
0x26fb   :  { %3821 = vmatpush3.bf16.msra.mxu0 %v4497_v14 }
0x27c9   :  { %v2881_v44 = vpop.f32.mrb[22].mxu0 }
0x27ca   :  { %v2882_v37 = vadd.f32 %v4623_v31, %v2881_v44  ;;  %v3665_v49 = vpop.f32.mrb[23].mxu0  ;;  %v1283_v44 = vcombine.high %v1281_v38, %v1281_v38 }
0x27cc   :  { %v2899_v52 = vrot.slane %v2882_v37, %v4186_v45  ;;  %v2885_v55 = vadd.f32 %v2882_v37, %v1282_v34 }
0x27ce   :  { %2900 = vrot.lane.b32.xlu0 %v2899_v52, %s3938_s3  ;;  %v3343_v56 = vmul.f32 -1.442695, %v2885_v55 }
0x27d0   :  { %3914 = vpow2.f32 %v3343_v56 }
0x27da   :  { %v3915_v11 = vpop.eup %3914 }
0x27db   :  { %v2889_v50 = vadd.f32 1.0, %v3915_v11  ;;  %v1763_v11 = vmax.f32 %v4681_v33, %v4703_v40 }
0x27dd   :  { %3916 = vrcp.f32 %v2889_v50 }
0x27e7   :  { %v3917_v62 = vpop.eup %3916 }
0x27e8   :  { %v2910_v46 = vsub.f32 1.0, %v3917_v62  ;;  %v2916_v60 = vmul.f32 %v3917_v62, %v4912_v47 }
0x2840   :  { %v2901_v53 = vpop.permute.xlu0 %2900 }
0x2841   :  { %v2903_v32 = vmul.f32 %v3917_v62, %v2901_v53  ;;  %v2225_v62 = vmax.f32 %v4774_v57, %v4796_v27  ;;  %v3213_v53 = vrot.slane %v1763_v11, %v4186_v45  ;;  %v1532_v27 = vmax.f32 %v4634_v29, %v4656_v22 }
0x2843   :  { %2905 = vrot.lane.b32.xlu1 %v2903_v32, %s3938_s3  ;;  %v2687_v32 = vmax.f32 %v4867_v24, %v4889_v7 }
0x28b5   :  { %v2906_v14 = vpop.permute.xlu1 %2905 }
0x28b6   :  { %v2908_v19 = vadd.f32 %v2906_v14, %v1282_v34  ;;  %v3227_v14 = vrot.slane %v2225_v62, %v4186_v45 }
0x28b8   :  { %3918 = vtanh.f32 %v2908_v19  ;;  %v3241_v19 = vrot.slane %v2687_v32, %v4186_v45 }
0x28c2   :  { %v3919_v51 = vpop.eup %3918 }
0x28c3   :  { %2912 = vrot.lane.b32.xlu0 %v3919_v51, %s3942_s10 }
0x2935   :  { %v2913_v58 = vpop.permute.xlu0 %2912 }
0x2936   :  { %v2915_v0 = vmul.f32 %v2913_v58, %v2910_v46  ;;  %v1994_v46 = vmax.f32 %v4727_v61, %v4749_v17  ;;  %v3206_v58 = vrot.slane %v1532_v27, %v4186_v45 }
0x2938   :  { %v4933_v1 = vadd.f32 %v2916_v60, %v2915_v0  ;;  %v2456_v60 = vmax.f32 %v4820_v15, %v4842_v9  ;;  %v3220_v29 = vrot.slane %v1994_v46, %v4186_v45 }
0x293a   :  { %v2926_v8 = vrot.slane %v4933_v1, %v4186_v45  ;;  %v2918_v22 = vmax.f32 %v4912_v47, %v4933_v1  ;;  %v3234_v0 = vrot.slane %v2456_v60, %v4186_v45 }
0x293c   :  { %2927 = vrot.lane.b32.xlu1 %v2926_v8, %s3942_s10  ;;  %v3248_v61 = vrot.slane %v2918_v22, %v4186_v45 }
0x29ae   :  { %v2928_v18 = vpop.permute.xlu1 %2927 }
0x29af   :  { %3189 = vst.msk [vmem:[%s5053_s14 + $0x1a] sm:$0x3] %vm469_vm7, %v2928_v18  ;;  %3675 = vmatmul.mubr.msk.f32.vlgmr.msra.gmra.mrb[16].mxu1 %vm403_vm6, %v2928_v18 }
0x2a82   :  { %v2997_v5 = vpop.f32.mrb[16].mxu1 }
0x2a83   :  { %v2998_v20 = vadd.f32 %v4623_v31, %v2997_v5  ;;  %v3676_v63 = vpop.f32.mrb[17].mxu1 }
0x2a85   :  { %v3015_v2 = vrot.slane %v2998_v20, %v4186_v45  ;;  %v3001_v10 = vadd.f32 %v2998_v20, %v1281_v38 }
0x2a87   :  { %3016 = vrot.lane.b32.xlu0 %v3015_v2, %s3938_s3  ;;  %v3345_v25 = vmul.f32 -1.442695, %v3001_v10 }
0x2a89   :  { %3920 = vpow2.f32 %v3345_v25 }
0x2a93   :  { %v3921_v26 = vpop.eup %3920 }
0x2a94   :  { %v3005_v28 = vadd.f32 1.0, %v3921_v26 }
0x2a96   :  { %3922 = vrcp.f32 %v3005_v28 }
0x2aa0   :  { %v3923_v30 = vpop.eup %3922 }
0x2aa1   :  { %v3026_v54 = vsub.f32 1.0, %v3923_v30  ;;  %v3032_v41 = vmul.f32 %v3923_v30, %v4933_v1 }
0x2af9   :  { %v3017_v6 = vpop.permute.xlu0 %3016 }
0x2afa   :  { %v3019_v35 = vmul.f32 %v3923_v30, %v3017_v6 }
0x2afc   :  { %3021 = vrot.lane.b32.xlu1 %v3019_v35, %s3938_s3 }
0x2b6e   :  { %v3022_v31 = vpop.permute.xlu1 %3021 }
0x2b6f   :  { %v3024_v12 = vadd.f32 %v3022_v31, %v1281_v38 }
0x2b71   :  { %3924 = vtanh.f32 %v3024_v12 }
0x2b7b   :  { %v3925_v39 = vpop.eup %3924 }
0x2b7c   :  { %3028 = vrot.lane.b32.xlu0 %v3925_v39, %s3942_s10 }
0x2bee   :  { %v3029_v21 = vpop.permute.xlu0 %3028 }
0x2bef   :  { %v3031_v16 = vmul.f32 %v3029_v21, %v3026_v54 }
0x2bf1   :  { %v4952_v42 = vadd.f32 %v3032_v41, %v3031_v16 }
0x2bf3   :  { %v3041_v43 = vrot.slane %v4952_v42, %v4186_v45 }
0x2bf5   :  { %3042 = vrot.lane.b32.xlu1 %v3041_v43, %s3942_s10 }
0x2c67   :  { %v3043_v13 = vpop.permute.xlu1 %3042 }
0x2c68   :  { %3190 = vst.msk [vmem:[%s5053_s14 + $0x1c] sm:$0x3] %vm469_vm7, %v3043_v13  ;;  %3686 = vmatmul.mubr.msk.f32.vlgmr.msra.gmra.mrb[24].mxu0 %vm403_vm6, %v3043_v13 }
0x2d3b   :  { %v3112_v23 = vpop.f32.mrb[24].mxu0 }
0x2d3c   :  { %v3113_v59 = vadd.f32 %v3932_v36, %v3112_v23  ;;  %v3687_v4 = vpop.f32.mrb[25].mxu0 }
0x2d3e   :  { %v3130_v48 = vrot.slane %v3113_v59, %v4186_v45  ;;  %v3116_v37 = vadd.f32 %v3113_v59, %v1283_v44 }
0x2d40   :  { %3131 = vrot.lane.b32.xlu0 %v3130_v48, %s3938_s3  ;;  %v3347_v49 = vmul.f32 -1.442695, %v3116_v37 }
0x2d42   :  { %3926 = vpow2.f32 %v3347_v49 }
0x2d4c   :  { %v3927_v52 = vpop.eup %3926 }
0x2d4d   :  { %v3120_v34 = vadd.f32 1.0, %v3927_v52 }
0x2d4f   :  { %3928 = vrcp.f32 %v3120_v34 }
0x2d59   :  { %v3929_v55 = vpop.eup %3928 }
0x2d5a   :  { %v3141_v17 = vsub.f32 1.0, %v3929_v55  ;;  %v3147_v18 = vmul.f32 %v3929_v55, %v4952_v42 }
0x2db2   :  { %v3132_v56 = vpop.permute.xlu0 %3131 }
0x2db3   :  { %v3134_v50 = vmul.f32 %v3929_v55, %v3132_v56 }
0x2db5   :  { %3136 = vrot.lane.b32.xlu1 %v3134_v50, %s3938_s3 }
0x2db9   :  { %3258 = vrot.lane.b32.xlu1 %v3213_v53, %s3942_s10 }
0x2dbd   :  { %3262 = vrot.lane.b32.xlu1 %v3227_v14, %s3942_s10 }
0x2dc1   :  { %3266 = vrot.lane.b32.xlu1 %v3241_v19, %s3942_s10 }
0x2e27   :  { %v3137_v33 = vpop.permute.xlu1 %3136 }
0x2e28   :  { %v3139_v40 = vadd.f32 %v3137_v33, %v1283_v44 }
0x2e2a   :  { %3930 = vtanh.f32 %v3139_v40 }
0x2e2b   :  { %v3259_v51 = vpop.permute.xlu1 %3258 }
0x2e2c   :  { %3281 = vst.msk [vmem:[%s5054_s15 + $0x2] sm:$0x3] %vm469_vm7, %v3259_v51 }
0x2e2f   :  { %v3263_v57 = vpop.permute.xlu1 %3262 }
0x2e30   :  { %3283 = vst.msk [vmem:[%s5054_s15 + $0x6] sm:$0x3] %vm469_vm7, %v3263_v57 }
0x2e33   :  { %v3267_v24 = vpop.permute.xlu1 %3266 }
0x2e34   :  { %v3931_v7 = vpop.eup %3930  ;;  %3285 = vst.msk [vmem:[%s5054_s15 + $0xa] sm:$0x3] %vm469_vm7, %v3267_v24 }
0x2e35   :  { %3143 = vrot.lane.b32.xlu0 %v3931_v7, %s3942_s10 }
0x2e39   :  { %3256 = vrot.lane.b32.xlu0 %v3206_v58, %s3942_s10 }
0x2e3d   :  { %3260 = vrot.lane.b32.xlu0 %v3220_v29, %s3942_s10 }
0x2e41   :  { %3264 = vrot.lane.b32.xlu0 %v3234_v0, %s3942_s10 }
0x2e45   :  { %3268 = vrot.lane.b32.xlu0 %v3248_v61, %s3942_s10 }
0x2ea7   :  { %v3144_v8 = vpop.permute.xlu0 %3143 }
0x2ea8   :  { %v3146_v15 = vmul.f32 %v3144_v8, %v3141_v17 }
0x2eaa   :  { %v3148_v9 = vadd.f32 %v3147_v18, %v3146_v15 }
0x2eab   :  { %v3257_v5 = vpop.permute.xlu0 %3256 }
0x2eac   :  { %v3149_v20 = vmax.f32 %v4952_v42, %v3148_v9  ;;  %v3157_v63 = vrot.slane %v3148_v9, %v4186_v45  ;;  %3280 = vst.msk [vmem:[%s5054_s15] sm:$0x3] %vm469_vm7, %v3257_v5 }
0x2eae   :  { %3158 = vrot.lane.b32.xlu1 %v3157_v63, %s3942_s10  ;;  %v3255_v1 = vrot.slane %v3149_v20, %v4186_v45 }
0x2eaf   :  { %v3261_v47 = vpop.permute.xlu0 %3260 }
0x2eb0   :  { %3282 = vst.msk [vmem:[%s5054_s15 + $0x4] sm:$0x3] %vm469_vm7, %v3261_v47 }
0x2eb2   :  { %3270 = vrot.lane.b32.xlu1 %v3255_v1, %s3942_s10 }
0x2eb3   :  { %v3265_v2 = vpop.permute.xlu0 %3264 }
0x2eb4   :  { %3284 = vst.msk [vmem:[%s5054_s15 + $0x8] sm:$0x3] %vm469_vm7, %v3265_v2 }
0x2eb7   :  { %v3269_v3 = vpop.permute.xlu0 %3268 }
0x2eb8   :  { %3286 = vst.msk [vmem:[%s5054_s15 + $0xc] sm:$0x3] %vm469_vm7, %v3269_v3 }
0x2f20   :  { %v3159_v45 = vpop.permute.xlu1 %3158 }
0x2f21   :  { %3191 = vst.msk [vmem:[%s5053_s14 + $0x1e] sm:$0x3] %vm469_vm7, %v3159_v45 }
0x2f24   :  { %v3271_v38 = vpop.permute.xlu1 %3270 }
0x2f25   :  { %3287 = vst.msk [vmem:[%s5054_s15 + $0xe] sm:$0x3] %vm469_vm7, %v3271_v38 }

</bundles_post_ra>
